<compile_context>
chip_gen: v5e
topology: v5e:2x2
jax: 0.10.0
libtpu: 0.0.40
codegen_flags: <defaults>
</compile_context>

<pallas_src>
import functools

import jax
import jax.numpy as jnp
from jax.experimental import pallas as pl
from jax.experimental.pallas import tpu as pltpu

EPS = 1e-6                     # module builds LayerNorm(emb_size, eps=1e-06)
_INV_SQRT2 = 0.7071067811865476
_SUB = 8                       # f32 sublane tile
_LANES = 128                   # vreg lane width


# ---------------------------------------------------------------------------
# Kernel
# ---------------------------------------------------------------------------
def _make_pwff_kernel(fold: bool, activation: str):
    """Builds the fused kernel body. `fold` => lane-folded layout + segment layer-norm."""

    def _layer_norm(v, seg, gamma, beta):
        if fold:
            # Per-segment (i.e. per original token row) mean/var computed with a
            # block-diagonal averaging matmul so the data never leaves the lane-dense
            # folded layout (no relayout, no masked VPU work).
            mu = jnp.dot(v, seg, preferred_element_type=jnp.float32,
                         precision=jax.lax.Precision.HIGHEST)
            vc = v - mu
            var = jnp.dot(vc * vc, seg, preferred_element_type=jnp.float32,
                          precision=jax.lax.Precision.HIGHEST)
        else:
            mu = jnp.mean(v, axis=-1, keepdims=True)
            vc = v - mu
            var = jnp.mean(vc * vc, axis=-1, keepdims=True)
        return vc * jax.lax.rsqrt(var + EPS) * gamma + beta

    def _act(h):
        if activation == "gelu":          # exact erf: torch F.gelu default
            return 0.5 * h * (1.0 + jax.lax.erf(h * _INV_SQRT2))
        if activation == "gelu_tanh":     # tanh approx -> EUP slot (cheaper when VALU-bound)
            return jax.nn.gelu(h, approximate=True)
        if activation == "softplus":
            return jax.nn.softplus(h)
        if activation == "relu":
            return jnp.maximum(h, 0.0)
        raise ValueError(f"unsupported activation: {activation}")

    def kernel(*refs):
        if fold:
            (x_ref, seg_ref, win_ref, bin_ref, wout_ref, bout_ref,
             gpre_ref, bpre_ref, gpost_ref, bpost_ref, o_ref) = refs
            seg = seg_ref[...]
        else:
            (x_ref, win_ref, bin_ref, wout_ref, bout_ref,
             gpre_ref, bpre_ref, gpost_ref, bpost_ref, o_ref) = refs
            seg = None

        x = x_ref[...].astype(jnp.float32)

        # Hoisted (1, *) parameter reads: each loaded exactly once per tile.
        g_pre = gpre_ref[...].astype(jnp.float32)
        b_pre = bpre_ref[...].astype(jnp.float32)
        g_post = gpost_ref[...].astype(jnp.float32)
        b_post = bpost_ref[...].astype(jnp.float32)
        b_in = bin_ref[...].astype(jnp.float32)
        b_out = bout_ref[...].astype(jnp.float32)

        # --- pre layer-norm (learnable, eps=1e-6) ---
        xn = _layer_norm(x, seg, g_pre, b_pre)

        # --- linear in + bias: bf16 MXU operands, f32 accumulation (intentional
        #     precision trade-off, mirrored by the pure-JAX reference below) ---
        h = jnp.dot(xn.astype(jnp.bfloat16), win_ref[...],
                    preferred_element_type=jnp.float32) + b_in
        h = _act(h)
        # (feedforward dropout: identity in eval mode)

        # --- linear out + bias ---
        y = jnp.dot(h.astype(jnp.bfloat16), wout_ref[...],
                    preferred_element_type=jnp.float32) + b_out
        # (residual dropout: identity in eval mode)

        # --- residual + post layer-norm ---
        o_ref[...] = _layer_norm(y + x, seg, g_post, b_post).astype(o_ref.dtype)

    return kernel


# ---------------------------------------------------------------------------
# One-time parameter preparation (hoisted out of the per-call hot path)
# ---------------------------------------------------------------------------
def prepare_pwff_params(w_in, b_in, w_out, b_out, g_pre, beta_pre, g_post, beta_post):
    """Cast weights to bf16 once and build the lane-folded layout when E < 128.

    For E < 128 (and 128 % E == 0), k = 128 // E token rows are folded into the lane axis:
    weights become block-diagonal (k blocks), biases / LN params are tiled k times, and a
    (k*E, k*E) block-diagonal averaging matrix `seg` is built for the in-kernel segment
    layer-norm statistics.
    """
    E, F = w_in.shape
    fold = (E < _LANES) and (_LANES % E == 0)
    k = (_LANES // E) if fold else 1

    def block_diag(w):
        if k == 1:
            return w
        d0, d1 = w.shape
        eye = jnp.eye(k, dtype=w.dtype)
        return (eye[:, None, :, None] * w[None, :, None, :]).reshape(k * d0, k * d1)

    def row(v):
        v = jnp.asarray(v, jnp.float32).reshape(1, -1)
        return jnp.tile(v, (1, k)) if k > 1 else v

    return {
        "w_in": block_diag(jnp.asarray(w_in, jnp.float32)).astype(jnp.bfloat16),
        "b_in": row(b_in),
        "w_out": block_diag(jnp.asarray(w_out, jnp.float32)).astype(jnp.bfloat16),
        "b_out": row(b_out),
        "g_pre": row(g_pre), "beta_pre": row(beta_pre),
        "g_post": row(g_post), "beta_post": row(beta_post),
        "seg": block_diag(jnp.full((E, E), 1.0 / E, jnp.float32)) if fold else None,
    }


# ---------------------------------------------------------------------------
# pallas_call wrapper
# ---------------------------------------------------------------------------
@functools.partial(jax.jit, static_argnames=("activation", "single_buffer_weights"))
def _pwff_call(x, params, *, activation, single_buffer_weights):
    B, S, E = x.shape
    E_f, F_f = params["w_in"].shape
    if E_f % E:
        raise ValueError("params were prepared for a different emb_size")
    k = E_f // E
    fold = params["seg"] is not None

    rows = B * S
    groups = pl.cdiv(rows, k)                     # folded "group rows" holding real data
    g8 = pl.cdiv(groups, _SUB) * _SUB

    itemsize = jnp.dtype(x.dtype).itemsize

    # Generation-aware VMEM cap (v5e/v6e: 128 MiB physical, v7x: 64 MiB).
    try:
        vmem_cap = int(pltpu.get_tpu_info().vmem_capacity_bytes)
    except Exception:
        vmem_cap = 64 << 20                       # conservative (v7x-sized) fallback

    weight_mult = 1 if single_buffer_weights else 2
    weight_bytes = weight_mult * sum(
        int(v.size) * jnp.dtype(v.dtype).itemsize
        for v in params.values() if v is not None)

    # Row-tile plan (in folded group rows):
    #  * target >= ~1 MiB per streamed x block (mem-bound regime; amortises ~0.35us/step),
    #  * but keep >= 2 (ideally >= 4) grid steps when there is enough work so both v7x
    #    TensorCores are fed under dimension_semantics=("parallel",),
    #  * capped so streamed tiles + f32 intermediates + weights fit the VMEM budget.
    tg = max(256, (1 << 20) // max(E_f * itemsize, 1))
    tg = pl.cdiv(tg, _SUB) * _SUB
    if g8 >= 4 * _SUB:
        min_steps = 4
    elif g8 >= 2 * _SUB:
        min_steps = 2
    else:
        min_steps = 1
    tg = min(tg, max(_SUB, (g8 // min_steps) // _SUB * _SUB))
    per_row_bytes = 4 * E_f * itemsize + (6 * E_f + 3 * F_f) * 4
    budget = max(vmem_cap - (8 << 20) - weight_bytes, 4 << 20)
    tg = min(tg, max(_SUB, (budget // per_row_bytes) // _SUB * _SUB))

    grid_m = pl.cdiv(g8, tg)
    g_pad = grid_m * tg
    rows_pad = g_pad * k

    x2 = x.reshape(rows, E)
    if rows_pad != rows:
        # Padded rows are independent under per-row LN (var=0 -> finite) and sliced off below.
        x2 = jnp.pad(x2, ((0, rows_pad - rows), (0, 0)))
    x_f = x2.reshape(g_pad, E_f)

    vmem_plan = (weight_bytes
                 + 4 * tg * E_f * itemsize         # x + out tiles, double-buffered
                 + tg * per_row_bytes              # live f32 intermediates (generous)
                 + (2 << 20))                      # params / compiler scratch
    vmem_limit = int(min(max(vmem_plan, 16 << 20), vmem_cap - (8 << 20)))

    if single_buffer_weights:
        def invariant(shape):
            # Grid-invariant operands: constant index map -> single buffer is enough.
            return pl.BlockSpec(shape, lambda i: tuple(0 for _ in shape),
                                pipeline_mode=pl.Buffered(1))
    else:
        def invariant(shape):
            return pl.BlockSpec(shape, lambda i: tuple(0 for _ in shape))

    in_specs = [pl.BlockSpec((tg, E_f), lambda i: (i, 0))]       # streamed x row tile
    operands = [x_f]
    if fold:
        in_specs.append(invariant(params["seg"].shape))
        operands.append(params["seg"])
    for name in ("w_in", "b_in", "w_out", "b_out",
                 "g_pre", "beta_pre", "g_post", "beta_post"):
        in_specs.append(invariant(params[name].shape))
        operands.append(params[name])

    out = pl.pallas_call(
        _make_pwff_kernel(fold, activation),
        out_shape=jax.ShapeDtypeStruct((g_pad, E_f), x.dtype),
        grid_spec=pltpu.PrefetchScalarGridSpec(
            num_scalar_prefetch=0,
            grid=(grid_m,),
            in_specs=in_specs,
            out_specs=pl.BlockSpec((tg, E_f), lambda i: (i, 0)),
        ),
        compiler_params=pltpu.CompilerParams(
            dimension_semantics=("parallel",),     # row axis shards across v7x's 2 TCs
            vmem_limit_bytes=vmem_limit,
        ),
    )(*operands)

    out = out.reshape(rows_pad, E)
    if rows_pad != rows:
        out = out[:rows]
    return out.reshape(B, S, E)


def position_wise_feed_forward(x, params, *, activation="gelu"):
    """x: [B, S, E]; params from prepare_pwff_params(); returns [B, S, E]."""
    try:
        return _pwff_call(x, params, activation=activation, single_buffer_weights=True)
    except Exception:
        # Fallback for JAX builds where pipeline_mode=pl.Buffered(1) is unavailable:
        # identical kernel, default double-buffering on the grid-invariant operands.
        return _pwff_call(x, params, activation=activation, single_buffer_weights=False)


# ---------------------------------------------------------------------------
# Pure-JAX reference (mirrors the kernel's bf16-operand / f32-accumulate matmuls)
# ---------------------------------------------------------------------------
def _reference(x, w_in, b_in, w_out, b_out, g_pre, beta_pre, g_post, beta_post):
    def ln(v, g, b):
        mu = jnp.mean(v, axis=-1, keepdims=True)
        var = jnp.mean((v - mu) ** 2, axis=-1, keepdims=True)
        return (v - mu) / jnp.sqrt(var + EPS) * g + b

    xn = ln(x, g_pre, beta_pre)
    h = jnp.dot(xn.astype(jnp.bfloat16), w_in.astype(jnp.bfloat16),
                preferred_element_type=jnp.float32) + b_in
    h = 0.5 * h * (1.0 + jax.lax.erf(h * _INV_SQRT2))
    y = jnp.dot(h.astype(jnp.bfloat16), w_out.astype(jnp.bfloat16),
                preferred_element_type=jnp.float32) + b_out
    return ln(y + x, g_post, beta_post)


if __name__ == "__main__":
    def make_case(key, B, S, E, F):
        kx, kwi, kwo, kbi, kbo = jax.random.split(key, 5)
        x = jax.random.normal(kx, (B, S, E), dtype=jnp.float32)
        # init_parameters() semantics (deterministic via PRNG)
        bound_w = (6.0 / (F + E)) ** 0.5
        w_in = jax.random.uniform(kwi, (E, F), jnp.float32, -bound_w, bound_w)
        w_out = jax.random.uniform(kwo, (F, E), jnp.float32, -bound_w, bound_w)
        b_in = jax.random.uniform(kbi, (F,), jnp.float32, -(3.0 / F) ** 0.5, (3.0 / F) ** 0.5)
        b_out = jax.random.uniform(kbo, (E,), jnp.float32, -(3.0 / E) ** 0.5, (3.0 / E) ** 0.5)
        g_pre = jnp.ones((E,), jnp.float32); beta_pre = jnp.zeros((E,), jnp.float32)
        g_post = jnp.ones((E,), jnp.float32); beta_post = jnp.zeros((E,), jnp.float32)
        return x, (w_in, b_in, w_out, b_out, g_pre, beta_pre, g_post, beta_post)

    key = jax.random.PRNGKey(0)
    k1, k2, k3 = jax.random.split(key, 3)

    # Case 1: module config emb=32, ff=64, gelu, learnable pre/post LN (E < 128 -> folded path).
    x, raw = make_case(k1, 2, 8, 32, 64)
    params = prepare_pwff_params(*raw)
    out = jax.block_until_ready(position_wise_feed_forward(x, params))
    ref = _reference(x, *raw)
    assert out.shape == x.shape
    assert jnp.allclose(out, ref, atol=2e-3, rtol=2e-3), "mismatch vs reference (folded)"

    # Case 2: rows not a multiple of the fold/sublane factor -> exercises row padding.
    xb = jax.random.normal(k2, (3, 5, 32), dtype=jnp.float32)
    outb = jax.block_until_ready(position_wise_feed_forward(xb, params))
    refb = _reference(xb, *raw)
    assert outb.shape == xb.shape
    assert jnp.allclose(outb, refb, atol=2e-3, rtol=2e-3), "mismatch vs reference (padded)"

    # Case 3: E >= 128 -> unfolded path (jnp.mean layer-norm, multi-step row grid).
    xc, rawc = make_case(k3, 2, 8, 128, 256)
    paramsc = prepare_pwff_params(*rawc)
    outc = jax.block_until_ready(position_wise_feed_forward(xc, paramsc))
    refc = _reference(xc, *rawc)
    assert outc.shape == xc.shape
    assert jnp.allclose(outc, refc, atol=2e-3, rtol=2e-3), "mismatch vs reference (unfolded)"

    print("KERNEL_OK")
</pallas_src>

<mosaic_0001>
module attributes {stable_mosaic.version = 11 : i64} {
  func.func @kernel(%arg0: i32, %arg1: memref<8x128xf32, #tpu.memory_space<vmem>>, %arg2: memref<128x128xf32, #tpu.memory_space<vmem>>, %arg3: memref<128x256xbf16, #tpu.memory_space<vmem>>, %arg4: memref<1x256xf32, #tpu.memory_space<vmem>>, %arg5: memref<256x128xbf16, #tpu.memory_space<vmem>>, %arg6: memref<1x128xf32, #tpu.memory_space<vmem>>, %arg7: memref<1x128xf32, #tpu.memory_space<vmem>>, %arg8: memref<1x128xf32, #tpu.memory_space<vmem>>, %arg9: memref<1x128xf32, #tpu.memory_space<vmem>>, %arg10: memref<1x128xf32, #tpu.memory_space<vmem>>, %arg11: memref<8x128xf32, #tpu.memory_space<vmem>>) attributes {dimension_semantics = [#tpu.dimension_semantics<parallel>], iteration_bounds = array<i64: 1>, scalar_prefetch = 0 : i64, scratch_operands = 0 : i64, tpu.core_type = #tpu.core_type<tc>, window_params = [{transform_indices = @transform_0, window_bounds = array<i64: 8, 128>}, {pipeline_mode = #tpu.pipeline_mode<synchronous>, transform_indices = @transform_1, window_bounds = array<i64: 128, 128>}, {pipeline_mode = #tpu.pipeline_mode<synchronous>, transform_indices = @transform_2, window_bounds = array<i64: 128, 256>}, {pipeline_mode = #tpu.pipeline_mode<synchronous>, transform_indices = @transform_3, window_bounds = array<i64: 1, 256>}, {pipeline_mode = #tpu.pipeline_mode<synchronous>, transform_indices = @transform_4, window_bounds = array<i64: 256, 128>}, {pipeline_mode = #tpu.pipeline_mode<synchronous>, transform_indices = @transform_5, window_bounds = array<i64: 1, 128>}, {pipeline_mode = #tpu.pipeline_mode<synchronous>, transform_indices = @transform_6, window_bounds = array<i64: 1, 128>}, {pipeline_mode = #tpu.pipeline_mode<synchronous>, transform_indices = @transform_7, window_bounds = array<i64: 1, 128>}, {pipeline_mode = #tpu.pipeline_mode<synchronous>, transform_indices = @transform_8, window_bounds = array<i64: 1, 128>}, {pipeline_mode = #tpu.pipeline_mode<synchronous>, transform_indices = @transform_9, window_bounds = array<i64: 1, 128>}, {transform_indices = @transform_10, window_bounds = array<i64: 8, 128>}]} {
    %c0 = arith.constant 0 : index
    %c0_0 = arith.constant 0 : index
    %0 = vector.load %arg2[%c0, %c0_0] : memref<128x128xf32, #tpu.memory_space<vmem>>, vector<128x128xf32>
    %c0_1 = arith.constant 0 : index
    %c0_2 = arith.constant 0 : index
    %1 = vector.load %arg1[%c0_1, %c0_2] : memref<8x128xf32, #tpu.memory_space<vmem>>, vector<8x128xf32>
    %c0_3 = arith.constant 0 : index
    %c0_4 = arith.constant 0 : index
    %2 = vector.load %arg7[%c0_3, %c0_4] : memref<1x128xf32, #tpu.memory_space<vmem>>, vector<1x128xf32>
    %c0_5 = arith.constant 0 : index
    %c0_6 = arith.constant 0 : index
    %3 = vector.load %arg8[%c0_5, %c0_6] : memref<1x128xf32, #tpu.memory_space<vmem>>, vector<1x128xf32>
    %c0_7 = arith.constant 0 : index
    %c0_8 = arith.constant 0 : index
    %4 = vector.load %arg9[%c0_7, %c0_8] : memref<1x128xf32, #tpu.memory_space<vmem>>, vector<1x128xf32>
    %c0_9 = arith.constant 0 : index
    %c0_10 = arith.constant 0 : index
    %5 = vector.load %arg10[%c0_9, %c0_10] : memref<1x128xf32, #tpu.memory_space<vmem>>, vector<1x128xf32>
    %c0_11 = arith.constant 0 : index
    %c0_12 = arith.constant 0 : index
    %6 = vector.load %arg4[%c0_11, %c0_12] : memref<1x256xf32, #tpu.memory_space<vmem>>, vector<1x256xf32>
    %c0_13 = arith.constant 0 : index
    %c0_14 = arith.constant 0 : index
    %7 = vector.load %arg6[%c0_13, %c0_14] : memref<1x128xf32, #tpu.memory_space<vmem>>, vector<1x128xf32>
    %cst = arith.constant dense<0.000000e+00> : vector<8x128xf32>
    %8 = tpu.matmul %1, %0, %cst {dimension_numbers = #tpu.dot_dimension_numbers<[1], [0], [0], [1], [0, 0, 1, 1], [], []>, precision = #tpu.contract_precision<fp32>} : vector<8x128xf32>, vector<128x128xf32>, vector<8x128xf32> -> vector<8x128xf32>
    %9 = arith.subf %1, %8 : vector<8x128xf32>
    %10 = arith.mulf %9, %9 : vector<8x128xf32>
    %cst_15 = arith.constant dense<0.000000e+00> : vector<8x128xf32>
    %11 = tpu.matmul %10, %0, %cst_15 {dimension_numbers = #tpu.dot_dimension_numbers<[1], [0], [0], [1], [0, 0, 1, 1], [], []>, precision = #tpu.contract_precision<fp32>} : vector<8x128xf32>, vector<128x128xf32>, vector<8x128xf32> -> vector<8x128xf32>
    %cst_16 = arith.constant 9.99999997E-7 : f32
    %12 = vector.broadcast %cst_16 : f32 to vector<8x128xf32>
    %13 = arith.addf %11, %12 : vector<8x128xf32>
    %14 = math.rsqrt %13 : vector<8x128xf32>
    %15 = arith.mulf %9, %14 : vector<8x128xf32>
    %16 = vector.broadcast %2 : vector<1x128xf32> to vector<8x128xf32>
    %17 = arith.mulf %15, %16 : vector<8x128xf32>
    %18 = vector.broadcast %3 : vector<1x128xf32> to vector<8x128xf32>
    %19 = arith.addf %17, %18 : vector<8x128xf32>
    %20 = arith.truncf %19 : vector<8x128xf32> to vector<8x128xbf16>
    %c0_17 = arith.constant 0 : index
    %c0_18 = arith.constant 0 : index
    %21 = vector.load %arg3[%c0_17, %c0_18] : memref<128x256xbf16, #tpu.memory_space<vmem>>, vector<128x256xbf16>
    %cst_19 = arith.constant dense<0.000000e+00> : vector<8x256xf32>
    %22 = tpu.matmul %20, %21, %cst_19 {dimension_numbers = #tpu.dot_dimension_numbers<[1], [0], [0], [1], [0, 0, 1, 1], [], []>} : vector<8x128xbf16>, vector<128x256xbf16>, vector<8x256xf32> -> vector<8x256xf32>
    %23 = vector.broadcast %6 : vector<1x256xf32> to vector<8x256xf32>
    %24 = arith.addf %22, %23 : vector<8x256xf32>
    %cst_20 = arith.constant 5.000000e-01 : f32
    %25 = vector.broadcast %cst_20 : f32 to vector<8x256xf32>
    %26 = arith.mulf %25, %24 : vector<8x256xf32>
    %cst_21 = arith.constant 0.707106769 : f32
    %27 = vector.broadcast %cst_21 : f32 to vector<8x256xf32>
    %28 = arith.mulf %24, %27 : vector<8x256xf32>
    %29 = math.erf %28 : vector<8x256xf32>
    %cst_22 = arith.constant 1.000000e+00 : f32
    %30 = vector.broadcast %cst_22 : f32 to vector<8x256xf32>
    %31 = arith.addf %30, %29 : vector<8x256xf32>
    %32 = arith.mulf %26, %31 : vector<8x256xf32>
    %33 = arith.truncf %32 : vector<8x256xf32> to vector<8x256xbf16>
    %c0_23 = arith.constant 0 : index
    %c0_24 = arith.constant 0 : index
    %34 = vector.load %arg5[%c0_23, %c0_24] : memref<256x128xbf16, #tpu.memory_space<vmem>>, vector<256x128xbf16>
    %cst_25 = arith.constant dense<0.000000e+00> : vector<8x128xf32>
    %35 = tpu.matmul %33, %34, %cst_25 {dimension_numbers = #tpu.dot_dimension_numbers<[1], [0], [0], [1], [0, 0, 1, 1], [], []>} : vector<8x256xbf16>, vector<256x128xbf16>, vector<8x128xf32> -> vector<8x128xf32>
    %36 = vector.broadcast %7 : vector<1x128xf32> to vector<8x128xf32>
    %37 = arith.addf %35, %36 : vector<8x128xf32>
    %38 = arith.addf %37, %1 : vector<8x128xf32>
    %cst_26 = arith.constant dense<0.000000e+00> : vector<8x128xf32>
    %39 = tpu.matmul %38, %0, %cst_26 {dimension_numbers = #tpu.dot_dimension_numbers<[1], [0], [0], [1], [0, 0, 1, 1], [], []>, precision = #tpu.contract_precision<fp32>} : vector<8x128xf32>, vector<128x128xf32>, vector<8x128xf32> -> vector<8x128xf32>
    %40 = arith.subf %38, %39 : vector<8x128xf32>
    %41 = arith.mulf %40, %40 : vector<8x128xf32>
    %cst_27 = arith.constant dense<0.000000e+00> : vector<8x128xf32>
    %42 = tpu.matmul %41, %0, %cst_27 {dimension_numbers = #tpu.dot_dimension_numbers<[1], [0], [0], [1], [0, 0, 1, 1], [], []>, precision = #tpu.contract_precision<fp32>} : vector<8x128xf32>, vector<128x128xf32>, vector<8x128xf32> -> vector<8x128xf32>
    %cst_28 = arith.constant 9.99999997E-7 : f32
    %43 = vector.broadcast %cst_28 : f32 to vector<8x128xf32>
    %44 = arith.addf %42, %43 : vector<8x128xf32>
    %45 = math.rsqrt %44 : vector<8x128xf32>
    %46 = arith.mulf %40, %45 : vector<8x128xf32>
    %47 = vector.broadcast %4 : vector<1x128xf32> to vector<8x128xf32>
    %48 = arith.mulf %46, %47 : vector<8x128xf32>
    %49 = vector.broadcast %5 : vector<1x128xf32> to vector<8x128xf32>
    %50 = arith.addf %48, %49 : vector<8x128xf32>
    %c0_29 = arith.constant 0 : index
    %c0_30 = arith.constant 0 : index
    %51 = vector.load %arg11[%c0_29, %c0_30] : memref<8x128xf32, #tpu.memory_space<vmem>>, vector<8x128xf32>
    tpu.vector_store %arg11[%c0_29, %c0_30], %50 {strides = array<i32>} : memref<8x128xf32, #tpu.memory_space<vmem>>, vector<8x128xf32>,
    return
  }
  func.func @transform_0(%arg0: i32) -> (i32, i32) {
    %c0_i32 = arith.constant 0 : i32
    %c0_i32_0 = arith.constant 0 : i32
    return %arg0, %c0_i32 : i32, i32
  }
  func.func @transform_1(%arg0: i32) -> (i32, i32) {
    %c0_i32 = arith.constant 0 : i32
    %c0_i32_0 = arith.constant 0 : i32
    %c0_i32_1 = arith.constant 0 : i32
    return %c0_i32, %c0_i32_0 : i32, i32
  }
  func.func @transform_2(%arg0: i32) -> (i32, i32) {
    %c0_i32 = arith.constant 0 : i32
    %c0_i32_0 = arith.constant 0 : i32
    %c0_i32_1 = arith.constant 0 : i32
    return %c0_i32, %c0_i32_0 : i32, i32
  }
  func.func @transform_3(%arg0: i32) -> (i32, i32) {
    %c0_i32 = arith.constant 0 : i32
    %c0_i32_0 = arith.constant 0 : i32
    %c0_i32_1 = arith.constant 0 : i32
    return %c0_i32, %c0_i32_0 : i32, i32
  }
  func.func @transform_4(%arg0: i32) -> (i32, i32) {
    %c0_i32 = arith.constant 0 : i32
    %c0_i32_0 = arith.constant 0 : i32
    %c0_i32_1 = arith.constant 0 : i32
    return %c0_i32, %c0_i32_0 : i32, i32
  }
  func.func @transform_5(%arg0: i32) -> (i32, i32) {
    %c0_i32 = arith.constant 0 : i32
    %c0_i32_0 = arith.constant 0 : i32
    %c0_i32_1 = arith.constant 0 : i32
    return %c0_i32, %c0_i32_0 : i32, i32
  }
  func.func @transform_6(%arg0: i32) -> (i32, i32) {
    %c0_i32 = arith.constant 0 : i32
    %c0_i32_0 = arith.constant 0 : i32
    %c0_i32_1 = arith.constant 0 : i32
    return %c0_i32, %c0_i32_0 : i32, i32
  }
  func.func @transform_7(%arg0: i32) -> (i32, i32) {
    %c0_i32 = arith.constant 0 : i32
    %c0_i32_0 = arith.constant 0 : i32
    %c0_i32_1 = arith.constant 0 : i32
    return %c0_i32, %c0_i32_0 : i32, i32
  }
  func.func @transform_8(%arg0: i32) -> (i32, i32) {
    %c0_i32 = arith.constant 0 : i32
    %c0_i32_0 = arith.constant 0 : i32
    %c0_i32_1 = arith.constant 0 : i32
    return %c0_i32, %c0_i32_0 : i32, i32
  }
  func.func @transform_9(%arg0: i32) -> (i32, i32) {
    %c0_i32 = arith.constant 0 : i32
    %c0_i32_0 = arith.constant 0 : i32
    %c0_i32_1 = arith.constant 0 : i32
    return %c0_i32, %c0_i32_0 : i32, i32
  }
  func.func @transform_10(%arg0: i32) -> (i32, i32) {
    %c0_i32 = arith.constant 0 : i32
    %c0_i32_0 = arith.constant 0 : i32
    return %arg0, %c0_i32 : i32, i32
  }
}

module attributes {stable_mosaic.version = 11 : i64} {
  func.func @kernel(%arg0: i32, %arg1: memref<8x128xf32, #tpu.memory_space<vmem>>, %arg2: memref<128x128xf32, #tpu.memory_space<vmem>>, %arg3: memref<128x256xbf16, #tpu.memory_space<vmem>>, %arg4: memref<1x256xf32, #tpu.memory_space<vmem>>, %arg5: memref<256x128xbf16, #tpu.memory_space<vmem>>, %arg6: memref<1x128xf32, #tpu.memory_space<vmem>>, %arg7: memref<1x128xf32, #tpu.memory_space<vmem>>, %arg8: memref<1x128xf32, #tpu.memory_space<vmem>>, %arg9: memref<1x128xf32, #tpu.memory_space<vmem>>, %arg10: memref<1x128xf32, #tpu.memory_space<vmem>>, %arg11: memref<8x128xf32, #tpu.memory_space<vmem>>) attributes {dimension_semantics = [#tpu.dimension_semantics<parallel>], iteration_bounds = array<i64: 1>, scalar_prefetch = 0 : i64, scratch_operands = 0 : i64, tpu.core_type = #tpu.core_type<tc>, window_params = [{transform_indices = @transform_0, window_bounds = array<i64: 8, 128>}, {pipeline_mode = #tpu.pipeline_mode<synchronous>, transform_indices = @transform_1, window_bounds = array<i64: 128, 128>}, {pipeline_mode = #tpu.pipeline_mode<synchronous>, transform_indices = @transform_2, window_bounds = array<i64: 128, 256>}, {pipeline_mode = #tpu.pipeline_mode<synchronous>, transform_indices = @transform_3, window_bounds = array<i64: 1, 256>}, {pipeline_mode = #tpu.pipeline_mode<synchronous>, transform_indices = @transform_4, window_bounds = array<i64: 256, 128>}, {pipeline_mode = #tpu.pipeline_mode<synchronous>, transform_indices = @transform_5, window_bounds = array<i64: 1, 128>}, {pipeline_mode = #tpu.pipeline_mode<synchronous>, transform_indices = @transform_6, window_bounds = array<i64: 1, 128>}, {pipeline_mode = #tpu.pipeline_mode<synchronous>, transform_indices = @transform_7, window_bounds = array<i64: 1, 128>}, {pipeline_mode = #tpu.pipeline_mode<synchronous>, transform_indices = @transform_8, window_bounds = array<i64: 1, 128>}, {pipeline_mode = #tpu.pipeline_mode<synchronous>, transform_indices = @transform_9, window_bounds = array<i64: 1, 128>}, {transform_indices = @transform_10, window_bounds = array<i64: 8, 128>}]} {
    %c0 = arith.constant 0 : index
    %c0_0 = arith.constant 0 : index
    %0 = vector.load %arg2[%c0, %c0_0] : memref<128x128xf32, #tpu.memory_space<vmem>>, vector<128x128xf32>
    %c0_1 = arith.constant 0 : index
    %c0_2 = arith.constant 0 : index
    %1 = vector.load %arg1[%c0_1, %c0_2] : memref<8x128xf32, #tpu.memory_space<vmem>>, vector<8x128xf32>
    %c0_3 = arith.constant 0 : index
    %c0_4 = arith.constant 0 : index
    %2 = vector.load %arg7[%c0_3, %c0_4] : memref<1x128xf32, #tpu.memory_space<vmem>>, vector<1x128xf32>
    %c0_5 = arith.constant 0 : index
    %c0_6 = arith.constant 0 : index
    %3 = vector.load %arg8[%c0_5, %c0_6] : memref<1x128xf32, #tpu.memory_space<vmem>>, vector<1x128xf32>
    %c0_7 = arith.constant 0 : index
    %c0_8 = arith.constant 0 : index
    %4 = vector.load %arg9[%c0_7, %c0_8] : memref<1x128xf32, #tpu.memory_space<vmem>>, vector<1x128xf32>
    %c0_9 = arith.constant 0 : index
    %c0_10 = arith.constant 0 : index
    %5 = vector.load %arg10[%c0_9, %c0_10] : memref<1x128xf32, #tpu.memory_space<vmem>>, vector<1x128xf32>
    %c0_11 = arith.constant 0 : index
    %c0_12 = arith.constant 0 : index
    %6 = vector.load %arg4[%c0_11, %c0_12] : memref<1x256xf32, #tpu.memory_space<vmem>>, vector<1x256xf32>
    %c0_13 = arith.constant 0 : index
    %c0_14 = arith.constant 0 : index
    %7 = vector.load %arg6[%c0_13, %c0_14] : memref<1x128xf32, #tpu.memory_space<vmem>>, vector<1x128xf32>
    %cst = arith.constant dense<0.000000e+00> : vector<8x128xf32>
    %8 = tpu.matmul %1, %0, %cst {dimension_numbers = #tpu.dot_dimension_numbers<[1], [0], [0], [1], [0, 0, 1, 1], [], []>, precision = #tpu.contract_precision<fp32>} : vector<8x128xf32>, vector<128x128xf32>, vector<8x128xf32> -> vector<8x128xf32>
    %9 = arith.subf %1, %8 : vector<8x128xf32>
    %10 = arith.mulf %9, %9 : vector<8x128xf32>
    %cst_15 = arith.constant dense<0.000000e+00> : vector<8x128xf32>
    %11 = tpu.matmul %10, %0, %cst_15 {dimension_numbers = #tpu.dot_dimension_numbers<[1], [0], [0], [1], [0, 0, 1, 1], [], []>, precision = #tpu.contract_precision<fp32>} : vector<8x128xf32>, vector<128x128xf32>, vector<8x128xf32> -> vector<8x128xf32>
    %cst_16 = arith.constant 9.99999997E-7 : f32
    %12 = vector.broadcast %cst_16 : f32 to vector<8x128xf32>
    %13 = arith.addf %11, %12 : vector<8x128xf32>
    %14 = math.rsqrt %13 : vector<8x128xf32>
    %15 = arith.mulf %9, %14 : vector<8x128xf32>
    %16 = vector.broadcast %2 : vector<1x128xf32> to vector<8x128xf32>
    %17 = arith.mulf %15, %16 : vector<8x128xf32>
    %18 = vector.broadcast %3 : vector<1x128xf32> to vector<8x128xf32>
    %19 = arith.addf %17, %18 : vector<8x128xf32>
    %20 = arith.truncf %19 : vector<8x128xf32> to vector<8x128xbf16>
    %c0_17 = arith.constant 0 : index
    %c0_18 = arith.constant 0 : index
    %21 = vector.load %arg3[%c0_17, %c0_18] : memref<128x256xbf16, #tpu.memory_space<vmem>>, vector<128x256xbf16>
    %cst_19 = arith.constant dense<0.000000e+00> : vector<8x256xf32>
    %22 = tpu.matmul %20, %21, %cst_19 {dimension_numbers = #tpu.dot_dimension_numbers<[1], [0], [0], [1], [0, 0, 1, 1], [], []>} : vector<8x128xbf16>, vector<128x256xbf16>, vector<8x256xf32> -> vector<8x256xf32>
    %23 = vector.broadcast %6 : vector<1x256xf32> to vector<8x256xf32>
    %24 = arith.addf %22, %23 : vector<8x256xf32>
    %cst_20 = arith.constant 5.000000e-01 : f32
    %25 = vector.broadcast %cst_20 : f32 to vector<8x256xf32>
    %26 = arith.mulf %25, %24 : vector<8x256xf32>
    %cst_21 = arith.constant 0.707106769 : f32
    %27 = vector.broadcast %cst_21 : f32 to vector<8x256xf32>
    %28 = arith.mulf %24, %27 : vector<8x256xf32>
    %29 = math.erf %28 : vector<8x256xf32>
    %cst_22 = arith.constant 1.000000e+00 : f32
    %30 = vector.broadcast %cst_22 : f32 to vector<8x256xf32>
    %31 = arith.addf %30, %29 : vector<8x256xf32>
    %32 = arith.mulf %26, %31 : vector<8x256xf32>
    %33 = arith.truncf %32 : vector<8x256xf32> to vector<8x256xbf16>
    %c0_23 = arith.constant 0 : index
    %c0_24 = arith.constant 0 : index
    %34 = vector.load %arg5[%c0_23, %c0_24] : memref<256x128xbf16, #tpu.memory_space<vmem>>, vector<256x128xbf16>
    %cst_25 = arith.constant dense<0.000000e+00> : vector<8x128xf32>
    %35 = tpu.matmul %33, %34, %cst_25 {dimension_numbers = #tpu.dot_dimension_numbers<[1], [0], [0], [1], [0, 0, 1, 1], [], []>} : vector<8x256xbf16>, vector<256x128xbf16>, vector<8x128xf32> -> vector<8x128xf32>
    %36 = vector.broadcast %7 : vector<1x128xf32> to vector<8x128xf32>
    %37 = arith.addf %35, %36 : vector<8x128xf32>
    %38 = arith.addf %37, %1 : vector<8x128xf32>
    %cst_26 = arith.constant dense<0.000000e+00> : vector<8x128xf32>
    %39 = tpu.matmul %38, %0, %cst_26 {dimension_numbers = #tpu.dot_dimension_numbers<[1], [0], [0], [1], [0, 0, 1, 1], [], []>, precision = #tpu.contract_precision<fp32>} : vector<8x128xf32>, vector<128x128xf32>, vector<8x128xf32> -> vector<8x128xf32>
    %40 = arith.subf %38, %39 : vector<8x128xf32>
    %41 = arith.mulf %40, %40 : vector<8x128xf32>
    %cst_27 = arith.constant dense<0.000000e+00> : vector<8x128xf32>
    %42 = tpu.matmul %41, %0, %cst_27 {dimension_numbers = #tpu.dot_dimension_numbers<[1], [0], [0], [1], [0, 0, 1, 1], [], []>, precision = #tpu.contract_precision<fp32>} : vector<8x128xf32>, vector<128x128xf32>, vector<8x128xf32> -> vector<8x128xf32>
    %cst_28 = arith.constant 9.99999997E-7 : f32
    %43 = vector.broadcast %cst_28 : f32 to vector<8x128xf32>
    %44 = arith.addf %42, %43 : vector<8x128xf32>
    %45 = math.rsqrt %44 : vector<8x128xf32>
    %46 = arith.mulf %40, %45 : vector<8x128xf32>
    %47 = vector.broadcast %4 : vector<1x128xf32> to vector<8x128xf32>
    %48 = arith.mulf %46, %47 : vector<8x128xf32>
    %49 = vector.broadcast %5 : vector<1x128xf32> to vector<8x128xf32>
    %50 = arith.addf %48, %49 : vector<8x128xf32>
    %c0_29 = arith.constant 0 : index
    %c0_30 = arith.constant 0 : index
    %51 = vector.load %arg11[%c0_29, %c0_30] : memref<8x128xf32, #tpu.memory_space<vmem>>, vector<8x128xf32>
    tpu.vector_store %arg11[%c0_29, %c0_30], %50 {strides = array<i32>} : memref<8x128xf32, #tpu.memory_space<vmem>>, vector<8x128xf32>,
    return
  }
  func.func @transform_0(%arg0: i32) -> (i32, i32) {
    %c0_i32 = arith.constant 0 : i32
    %c0_i32_0 = arith.constant 0 : i32
    return %arg0, %c0_i32 : i32, i32
  }
  func.func @transform_1(%arg0: i32) -> (i32, i32) {
    %c0_i32 = arith.constant 0 : i32
    %c0_i32_0 = arith.constant 0 : i32
    %c0_i32_1 = arith.constant 0 : i32
    return %c0_i32, %c0_i32_0 : i32, i32
  }
  func.func @transform_2(%arg0: i32) -> (i32, i32) {
    %c0_i32 = arith.constant 0 : i32
    %c0_i32_0 = arith.constant 0 : i32
    %c0_i32_1 = arith.constant 0 : i32
    return %c0_i32, %c0_i32_0 : i32, i32
  }
  func.func @transform_3(%arg0: i32) -> (i32, i32) {
    %c0_i32 = arith.constant 0 : i32
    %c0_i32_0 = arith.constant 0 : i32
    %c0_i32_1 = arith.constant 0 : i32
    return %c0_i32, %c0_i32_0 : i32, i32
  }
  func.func @transform_4(%arg0: i32) -> (i32, i32) {
    %c0_i32 = arith.constant 0 : i32
    %c0_i32_0 = arith.constant 0 : i32
    %c0_i32_1 = arith.constant 0 : i32
    return %c0_i32, %c0_i32_0 : i32, i32
  }
  func.func @transform_5(%arg0: i32) -> (i32, i32) {
    %c0_i32 = arith.constant 0 : i32
    %c0_i32_0 = arith.constant 0 : i32
    %c0_i32_1 = arith.constant 0 : i32
    return %c0_i32, %c0_i32_0 : i32, i32
  }
  func.func @transform_6(%arg0: i32) -> (i32, i32) {
    %c0_i32 = arith.constant 0 : i32
    %c0_i32_0 = arith.constant 0 : i32
    %c0_i32_1 = arith.constant 0 : i32
    return %c0_i32, %c0_i32_0 : i32, i32
  }
  func.func @transform_7(%arg0: i32) -> (i32, i32) {
    %c0_i32 = arith.constant 0 : i32
    %c0_i32_0 = arith.constant 0 : i32
    %c0_i32_1 = arith.constant 0 : i32
    return %c0_i32, %c0_i32_0 : i32, i32
  }
  func.func @transform_8(%arg0: i32) -> (i32, i32) {
    %c0_i32 = arith.constant 0 : i32
    %c0_i32_0 = arith.constant 0 : i32
    %c0_i32_1 = arith.constant 0 : i32
    return %c0_i32, %c0_i32_0 : i32, i32
  }
  func.func @transform_9(%arg0: i32) -> (i32, i32) {
    %c0_i32 = arith.constant 0 : i32
    %c0_i32_0 = arith.constant 0 : i32
    %c0_i32_1 = arith.constant 0 : i32
    return %c0_i32, %c0_i32_0 : i32, i32
  }
  func.func @transform_10(%arg0: i32) -> (i32, i32) {
    %c0_i32 = arith.constant 0 : i32
    %c0_i32_0 = arith.constant 0 : i32
    return %arg0, %c0_i32 : i32, i32
  }
}

</mosaic_0001>

<bundles_post_ra>
// kernel: _pwff_call.1
= control target key start
LH: loop header
LB: loop body
LE: loop exit
PB: predicated region body
PF: predicated region fallthrough
CT: control target
= control target key end

     0   :  { %15 = vsyncpa [#allocation3], 0  ;;  %s2891_s0 = inlined_call_operand.vmem [shape: f32[8,128], index: 0, kind: input, shape index: {}]   ;;  %s2892_s1 = inlined_call_operand.hbm [shape: f32[128,128], index: 1, kind: input, shape index: {}]   ;;  %s2893_s2 = inlined_call_operand.hbm [shape: bf16[128,256], index: 2, kind: input, shape index: {}]   ;;  %s2894_s3 = inlined_call_operand.vmem [shape: f32[1,256], index: 3, kind: input, shape index: {}]   ;;  %s2895_s4 = inlined_call_operand.hbm [shape: bf16[256,128], index: 4, kind: input, shape index: {}]   ;;  %s2896_s5 = inlined_call_operand.vmem [shape: f32[1,128], index: 5, kind: input, shape index: {}]   ;;  %s2897_s6 = inlined_call_operand.vmem [shape: f32[1,128], index: 6, kind: input, shape index: {}]   ;;  %s2898_s7 = inlined_call_operand.vmem [shape: f32[1,128], index: 7, kind: input, shape index: {}]   ;;  %s2899_s8 = inlined_call_operand.vmem [shape: f32[1,128], index: 8, kind: input, shape index: {}]   ;;  %s2900_s9 = inlined_call_operand.vmem [shape: f32[1,128], index: 9, kind: input, shape index: {}]   ;;  %s2901_s10 = inlined_call_operand.vmem [shape: f32[8,128], index: 10, kind: output, shape index: {}]  }
   0x1   :  { %16 = vsyncpa [#allocation5], 0  ;;  %s36_s15 = sshll.u32 %s2893_s2, 4  ;;  %s2153_s16 = smov [#allocation4]   ;;  %s37_s15 = int_to_ptr.hbm [resolvable:$true] %s36_s15 }
   0x2   :  { %s38_s17 = sshll.u32 %s2153_s16, 4  ;;  %s23_s20 = sshll.u32 %s2892_s1, 4  ;;  %s39_s17 = int_to_ptr.vmem [resolvable:$true] %s38_s17  ;;  %s24_s20 = int_to_ptr.hbm [resolvable:$true] %s23_s20 }
   0x3   :  { %s2154_s21 = smov 128   ;;  %s2155_s22 = smov 8  }
   0x4   :  { %44 = dma.hbm_to_vmem [thread:$0]  %s37_s15, 2048, %s39_s17, [#allocation5], %s2154_s21, %s2154_s21, %s2155_s22  }
   0x5   :  { %s2156_s23 = smov [#allocation2]   ;;  %s51_s27 = sshll.u32 %s2895_s4, 4  ;;  %s52_s27 = int_to_ptr.hbm [resolvable:$true] %s51_s27 }
   0x6   :  { %s25_s24 = sshll.u32 %s2156_s23, 4  ;;  %s2157_s2 = smov [#allocation6]   ;;  %s26_s24 = int_to_ptr.vmem [resolvable:$true] %s25_s24 }
   0x7   :  { %31 = dma.hbm_to_vmem [thread:$0]  %s24_s20, 2048, %s26_s24, [#allocation3], %s2154_s21, %s2154_s21, %s2155_s22  }
   0x8   :  { %s53_s28 = sshll.u32 %s2157_s2, 4  ;;  %s2158_s29 = smov 64   ;;  %s54_s28 = int_to_ptr.vmem [resolvable:$true] %s53_s28 }
   0x9   :  { %s2159_s30 = smov 4  }
   0xa   :  { %59 = dma.hbm_to_vmem [thread:$0]  %s52_s27, 2048, %s54_s28, [#allocation5], %s2158_s29, %s2158_s29, %s2159_s30  }
   0xb   :  { %2149 = dma.done.wait [#allocation3], 2048  }
   0xc   :  { %2150 = vsyncadd [#allocation3], 4294965248 }
   0xd   :  { %2151 = dma.done.wait [#allocation5], 4096  }
   0xe   :  { %2152 = vsyncadd [#allocation5], 4294963200  ;;  %v97_v0 = vld [vmem:[#allocation2 + $0x78] sm:$0xff]  ;;  %v96_v1 = vld [vmem:[#allocation2 + $0x70] sm:$0xff] }
   0xf   :  { %v95_v2 = vld [vmem:[#allocation2 + $0x68] sm:$0xff]  ;;  %v2224_v3 = vand.u32 4294901760, %v97_v0  ;;  %v2226_v4 = vand.u32 4294901760, %v96_v1  ;;  %v94_v6 = vld [vmem:[#allocation2 + $0x60] sm:$0xff]  ;;  %v93_v7 = vld [vmem:[#allocation2 + $0x58] sm:$0xff] }
  0x10   :  { %v2228_v5 = vand.u32 4294901760, %v95_v2  ;;  %v92_v8 = vld [vmem:[#allocation2 + $0x50] sm:$0xff]  ;;  %v2230_v9 = vand.u32 4294901760, %v94_v6  ;;  %v2232_v10 = vand.u32 4294901760, %v93_v7  ;;  %v91_v12 = vld [vmem:[#allocation2 + $0x48] sm:$0xff]  ;;  %v90_v13 = vld [vmem:[#allocation2 + $0x40] sm:$0xff] }
  0x11   :  { %v2234_v11 = vand.u32 4294901760, %v92_v8  ;;  %106 = vmatpush.msra.mxu0 %v2224_v3  ;;  %v2238_v14 = vsub.f32 %v97_v0, %v2224_v3  ;;  %v2241_v15 = vsub.f32 %v96_v1, %v2226_v4  ;;  %v2246_v17 = vand.u32 4294901760, %v91_v12  ;;  %v89_v18 = vld [vmem:[#allocation2 + $0x38] sm:$0xff]  ;;  %302 = vmatpush.msra.mxu3 %v2224_v3  ;;  %v88_v26 = vld [vmem:[#allocation2 + $0x30] sm:$0xff]  ;;  %v87_v34 = vld [vmem:[#allocation2 + $0x28] sm:$0xff] }
  0x12   :  { %v2244_v16 = vsub.f32 %v95_v2, %v2228_v5  ;;  %v2250_v19 = vsub.f32 %v94_v6, %v2230_v9  ;;  %v2253_v20 = vsub.f32 %v93_v7, %v2232_v10  ;;  %v2268_v25 = vand.u32 4294901760, %v90_v13  ;;  %v86_v42 = vld [vmem:[#allocation2 + $0x20] sm:$0xff]  ;;  %v85_v47 = vld [vmem:[#allocation2 + $0x18] sm:$0xff]  ;;  %v84_v55 = vld [vmem:[#allocation2 + $0x10] sm:$0xff] }
  0x13   :  { %2952 = vst [vmem:[#allocation9_spill] sm:$0xff] %v2238_v14  ;;  %v2256_v21 = vsub.f32 %v92_v8, %v2234_v11  ;;  %108 = vmatpush.msra.mxu0 %v2226_v4  ;;  %v2260_v22 = vand.u32 4294901760, %v2238_v14  ;;  %v2263_v23 = vand.u32 4294901760, %v2241_v15  ;;  %249 = vmatpush.msra.mxu2 %v2238_v14  ;;  %v2274_v28 = vand.u32 4294901760, %v89_v18  ;;  %v83_v60 = vld [vmem:[#allocation2 + $0x8] sm:$0xff]  ;;  %v82_v1 = vld [vmem:[#allocation2] sm:$0xff] }
  0x14   :  { %2953 = vst [vmem:[#allocation10_spill] sm:$0xff] %v2241_v15  ;;  %v2266_v24 = vand.u32 4294901760, %v2244_v16  ;;  %v2272_v27 = vand.u32 4294901760, %v2250_v19  ;;  %v2277_v29 = vsub.f32 %v91_v12, %v2246_v17  ;;  %304 = vmatpush.msra.mxu3 %v2226_v4  ;;  %v2288_v33 = vand.u32 4294901760, %v2253_v20  ;;  %v2381_v7 = vld [vmem:[%s2891_s0] sm:$0xff] }
  0x15   :  { %2954 = vst [vmem:[#allocation11_spill] sm:$0xff] %v2244_v16  ;;  %110 = vmatpush.msra.mxu0 %v2228_v5  ;;  %v149_v30 = vsub.f32 %v2238_v14, %v2260_v22  ;;  %v155_v31 = vsub.f32 %v2241_v15, %v2263_v23  ;;  %252 = vmatpush.msra.mxu2 %v2241_v15  ;;  %v2292_v35 = vand.u32 4294901760, %v2256_v21  ;;  %v2294_v36 = vand.u32 4294901760, %v88_v26 }
  0x16   :  { %2955 = vst [vmem:[#allocation12_spill] sm:$0xff] %v2250_v19  ;;  %v161_v32 = vsub.f32 %v2244_v16, %v2266_v24  ;;  %306 = vmatpush.msra.mxu3 %v2228_v5  ;;  %v167_v39 = vsub.f32 %v2250_v19, %v2272_v27  ;;  %v2305_v40 = vsub.f32 %v90_v13, %v2268_v25  ;;  %v2309_v41 = vand.u32 4294901760, %v2277_v29 }
  0x17   :  { %2956 = vst [vmem:[#allocation13_spill] sm:$0xff] %v2253_v20  ;;  %v2297_v37 = vand.u32 4294901760, %v149_v30  ;;  %112 = vmatpush.msra.mxu0 %v2230_v9  ;;  %v2300_v38 = vand.u32 4294901760, %v155_v31  ;;  %255 = vmatpush.msra.mxu2 %v2244_v16  ;;  %v173_v44 = vsub.f32 %v2253_v20, %v2288_v33  ;;  %v2318_v45 = vand.u32 4294901760, %v87_v34 }
  0x18   :  { %2957 = vst [vmem:[#allocation14_spill] sm:$0xff] %v2256_v21  ;;  %308 = vmatpush.msra.mxu3 %v2230_v9  ;;  %v2314_v43 = vand.u32 4294901760, %v161_v32  ;;  %v2321_v46 = vsub.f32 %v89_v18, %v2274_v28  ;;  %v179_v48 = vsub.f32 %v2256_v21, %v2292_v35  ;;  %v2329_v49 = vand.u32 4294901760, %v167_v39 }
  0x19   :  { %2958 = vst [vmem:[#allocation15_spill] sm:$0xff] %v2277_v29  ;;  %151 = vmatpush.msra.mxu1 %v2297_v37  ;;  %114 = vmatpush.msra.mxu0 %v2232_v10  ;;  %v2332_v50 = vand.u32 4294901760, %v2305_v40  ;;  %v2334_v51 = vand.u32 4294901760, %v86_v42  ;;  %v2337_v52 = vsub.f32 %v88_v26, %v2294_v36  ;;  %v185_v53 = vsub.f32 %v2277_v29, %v2309_v41 }
  0x1a   :  { %2959 = vst [vmem:[#allocation16_spill] sm:$0xff] %v2288_v33  ;;  %258 = vmatpush.msra.mxu2 %v2250_v19  ;;  %310 = vmatpush.msra.mxu3 %v2232_v10  ;;  %v2341_v54 = vand.u32 4294901760, %v85_v47  ;;  %v2347_v56 = vand.u32 4294901760, %v173_v44  ;;  %v2350_v57 = vand.u32 4294901760, %v2321_v46  ;;  %v2353_v58 = vsub.f32 %v87_v34, %v2318_v45 }
  0x1b   :  { %2960 = vst [vmem:[#allocation17_spill] sm:$0xff] %v2292_v35  ;;  %157 = vmatpush.msra.mxu1 %v2300_v38  ;;  %116 = vmatpush.msra.mxu0 %v2234_v11  ;;  %v2355_v59 = vand.u32 4294901760, %v179_v48  ;;  %v191_v61 = vsub.f32 %v2305_v40, %v2332_v50  ;;  %v2364_v62 = vand.u32 4294901760, %v2337_v52  ;;  %v2366_v63 = vand.u32 4294901760, %v84_v55 }
  0x1c   :  { %2961 = vst [vmem:[#allocation18_spill] sm:$0xff] %v2305_v40  ;;  %261 = vmatpush.msra.mxu2 %v2253_v20  ;;  %312 = vmatpush.msra.mxu3 %v2234_v11  ;;  %v2369_v0 = vsub.f32 %v86_v42, %v2334_v51  ;;  %v2371_v2 = vand.u32 4294901760, %v185_v53  ;;  %v2374_v6 = vsub.f32 %v85_v47, %v2341_v54  ;;  %v2388_v12 = vand.u32 4294901760, %v2353_v58 }
  0x1d   :  { %2962 = vst [vmem:[#allocation19_spill] sm:$0xff] %v2309_v41  ;;  %163 = vmatpush.msra.mxu1 %v2314_v43  ;;  %118 = vmatpush.msra.mxu0 %v2246_v17  ;;  %v197_v8 = vsub.f32 %v2321_v46, %v2350_v57  ;;  %v2390_v13 = vand.u32 4294901760, %v83_v60  ;;  %v2393_v18 = vand.u32 4294901760, %v2381_v7  ;;  %v2395_v26 = vand.u32 4294901760, %v82_v1 }
  0x1e   :  { %2963 = vst [vmem:[#allocation20_spill] sm:$0xff] %v2321_v46  ;;  %264 = vmatpush.msra.mxu2 %v2256_v21  ;;  %314 = vmatpush.msra.mxu3 %v2246_v17  ;;  %v2401_v30 = vand.u32 4294901760, %v191_v61  ;;  %v203_v31 = vsub.f32 %v2337_v52, %v2364_v62  ;;  %v2406_v32 = vand.u32 4294901760, %v2369_v0  ;;  %v2409_v34 = vsub.f32 %v84_v55, %v2366_v63 }
  0x1f   :  { %2964 = vst [vmem:[#allocation21_spill] sm:$0xff] %v2332_v50  ;;  %169 = vmatpush.msra.mxu1 %v2329_v49  ;;  %120 = vmatpush.msra.mxu0 %v2268_v25  ;;  %v2412_v39 = vand.u32 4294901760, %v2374_v6  ;;  %v2418_v42 = vand.u32 4294901760, %v197_v8  ;;  %v209_v44 = vsub.f32 %v2353_v58, %v2388_v12  ;;  %v2423_v47 = vsub.f32 %v83_v60, %v2390_v13 }
  0x20   :  { %2965 = vst [vmem:[#allocation22_spill] sm:$0xff] %v2337_v52  ;;  %267 = vmatpush.msra.mxu2 %v2277_v29  ;;  %316 = vmatpush.msra.mxu3 %v2268_v25  ;;  %v138_v48 = vsub.f32 %v2381_v7, %v2393_v18  ;;  %v2431_v53 = vand.u32 4294901760, %v203_v31  ;;  %v215_v55 = vsub.f32 %v2369_v0, %v2406_v32  ;;  %v2436_v61 = vand.u32 4294901760, %v2409_v34 }
  0x21   :  { %2966 = vst [vmem:[#allocation23_spill] sm:$0xff] %v2350_v57  ;;  %175 = vmatpush.msra.mxu1 %v2347_v56  ;;  %122 = vmatpush.msra.mxu0 %v2274_v28  ;;  %v2439_v60 = vsub.f32 %v82_v1, %v2395_v26  ;;  %v2445_v8 = vand.u32 4294901760, %v209_v44  ;;  %v221_v31 = vsub.f32 %v2374_v6, %v2412_v39 }
  0x22   :  { %2967 = vst [vmem:[#allocation24_spill] sm:$0xff] %v2353_v58  ;;  %270 = vmatpush.msra.mxu2 %v2305_v40  ;;  %318 = vmatpush.msra.mxu3 %v2274_v28  ;;  %v2456_v1 = vand.u32 4294901760, %v215_v55  ;;  %v227_v44 = vsub.f32 %v2409_v34, %v2436_v61 }
  0x23   :  { %2968 = vst [vmem:[#allocation25_spill] sm:$0xff] %v2364_v62  ;;  %181 = vmatpush.msra.mxu1 %v2355_v59  ;;  %124 = vmatpush.msra.mxu0 %v2294_v36 }
  0x24   :  { %2969 = vst [vmem:[#allocation26_spill] sm:$0xff] %v2369_v0  ;;  %273 = vmatpush.msra.mxu2 %v2321_v46  ;;  %320 = vmatpush.msra.mxu3 %v2294_v36 }
  0x25   :  { %2970 = vst [vmem:[#allocation27_spill] sm:$0xff] %v2374_v6  ;;  %187 = vmatpush.msra.mxu1 %v2371_v2  ;;  %126 = vmatpush.msra.mxu0 %v2318_v45 }
  0x26   :  { %2971 = vst [vmem:[#allocation28_spill] sm:$0xff] %v2381_v7  ;;  %276 = vmatpush.msra.mxu2 %v2337_v52  ;;  %322 = vmatpush.msra.mxu3 %v2318_v45  ;;  %v2450_v7 = vand.u32 4294901760, %v2423_v47  ;;  %v139_v52 = vand.u32 4294901760, %v138_v48 }
  0x27   :  { %2972 = vst [vmem:[#allocation29_spill] sm:$0xff] %v2388_v12  ;;  %193 = vmatpush.msra.mxu1 %v2401_v30  ;;  %128 = vmatpush.msra.mxu0 %v2334_v51 }
  0x28   :  { %2973 = vst [vmem:[#allocation30_spill] sm:$0xff] %v2406_v32  ;;  %279 = vmatpush.msra.mxu2 %v2353_v58  ;;  %324 = vmatpush.msra.mxu3 %v2334_v51  ;;  %v2461_v58 = vand.u32 4294901760, %v2439_v60  ;;  %v233_v55 = vsub.f32 %v2423_v47, %v2450_v7  ;;  %v140_v46 = vsub.f32 %v138_v48, %v139_v52 }
  0x29   :  { %2974 = vst [vmem:[#allocation31_spill] sm:$0xff] %v2409_v34  ;;  %199 = vmatpush.msra.mxu1 %v2418_v42  ;;  %130 = vmatpush.msra.mxu0 %v2341_v54 }
  0x2a   :  { %2975 = vst [vmem:[#allocation32_spill] sm:$0xff] %v2412_v39  ;;  %282 = vmatpush.msra.mxu2 %v2369_v0  ;;  %326 = vmatpush.msra.mxu3 %v2341_v54  ;;  %v2467_v0 = vand.u32 4294901760, %v221_v31  ;;  %v239_v40 = vsub.f32 %v2439_v60, %v2461_v58  ;;  %v2482_v31 = vand.u32 4294901760, %v233_v55 }
  0x2b   :  { %2976 = vst [vmem:[#allocation33_spill] sm:$0xff] %v2423_v47  ;;  %205 = vmatpush.msra.mxu1 %v2431_v53  ;;  %132 = vmatpush.msra.mxu0 %v2366_v63 }
  0x2c   :  { %2977 = vst [vmem:[#allocation34_spill] sm:$0xff] %v2436_v61  ;;  %285 = vmatpush.msra.mxu2 %v2374_v6  ;;  %328 = vmatpush.msra.mxu3 %v2366_v63  ;;  %v2475_v6 = vand.u32 4294901760, %v227_v44  ;;  %v2488_v44 = vand.u32 4294901760, %v239_v40  ;;  %v2981_v40 = vld [vmem:[#allocation18_spill] sm:$0xff] }
  0x2d   :  { %2978 = vst [vmem:[#allocation35_spill] sm:$0xff] %v2439_v60  ;;  %211 = vmatpush.msra.mxu1 %v2445_v8  ;;  %134 = vmatpush.msra.mxu0 %v2390_v13 }
  0x2e   :  { %2979 = vst [vmem:[#allocation36_spill] sm:$0xff] %v2450_v7  ;;  %288 = vmatpush.msra.mxu2 %v2409_v34  ;;  %330 = vmatpush.msra.mxu3 %v2390_v13  ;;  %v141_v34 = vand.u32 4294901760, %v140_v46  ;;  %v2982_v46 = vld [vmem:[#allocation20_spill] sm:$0xff] }
  0x2f   :  { %2980 = vst [vmem:[#allocation37_spill] sm:$0xff] %v2461_v58  ;;  %217 = vmatpush.msra.mxu1 %v2456_v1  ;;  %136 = vmatpush.msra.mxu0 %v2395_v26 }
  0x30   :  { %291 = vmatpush.msra.mxu2 %v2423_v47  ;;  %332 = vmatpush.msra.mxu3 %v2395_v26  ;;  %v2987_v55 = vld [vmem:[#allocation31_spill] sm:$0xff] }
  0x31   :  { %343 = vmatpush.msrb.mxu0 %v2260_v22  ;;  %223 = vmatpush.msra.mxu1 %v2467_v0 }
  0x32   :  { %294 = vmatpush.msra.mxu2 %v2439_v60  ;;  %336 = vmatmul.f32.vlgmr.msra.gmra.mxu3 %v139_v52  ;;  %v2983_v52 = vld [vmem:[#allocation22_spill] sm:$0xff] }
  0x33   :  { %347 = vmatpush.msrb.mxu0 %v2263_v23  ;;  %229 = vmatpush.msra.mxu1 %v2475_v6 }
  0x34   :  { %297 = vmatmul.f32.vlgmr.msra.gmra.mxu2 %v138_v48  ;;  %142 = vmatmul.f32.vlgmr.msra.gmra.mxu0 %v141_v34  ;;  %v2985_v34 = vld [vmem:[#allocation26_spill] sm:$0xff]  ;;  %v2986_v48 = vld [vmem:[#allocation27_spill] sm:$0xff] }
  0x35   :  { %351 = vmatpush.msrb.mxu0 %v2266_v24  ;;  %235 = vmatpush.msra.mxu1 %v2482_v31 }
  0x36   :  { %494 = vmatpush.msrb.mxu3 %v2297_v37  ;;  %449 = vmatpush.msrb.mxu2 %v2224_v3 }
  0x37   :  { %355 = vmatpush.msrb.mxu0 %v2272_v27  ;;  %241 = vmatpush.msra.mxu1 %v2488_v44 }
  0x38   :  { %243 = vmatmul.f32.vlgmr.msra.gmra.mxu1 %v2393_v18  ;;  %500 = vmatpush.msrb.mxu3 %v2300_v38 }
  0x39   :  { %410 = vmatpush.msrb.mxu1 %v2224_v3  ;;  %359 = vmatpush.msrb.mxu0 %v2288_v33 }
  0x3a   :  { %506 = vmatpush.msrb.mxu3 %v2314_v43  ;;  %451 = vmatpush.msrb.mxu2 %v2226_v4 }
  0x3b   :  { %412 = vmatpush.msrb.mxu1 %v2226_v4  ;;  %363 = vmatpush.msrb.mxu0 %v2292_v35 }
  0x3c   :  { %512 = vmatpush.msrb.mxu3 %v2329_v49  ;;  %453 = vmatpush.msrb.mxu2 %v2228_v5 }
  0x3d   :  { %414 = vmatpush.msrb.mxu1 %v2228_v5  ;;  %367 = vmatpush.msrb.mxu0 %v2309_v41 }
  0x3e   :  { %518 = vmatpush.msrb.mxu3 %v2347_v56  ;;  %455 = vmatpush.msrb.mxu2 %v2230_v9 }
  0x3f   :  { %416 = vmatpush.msrb.mxu1 %v2230_v9  ;;  %371 = vmatpush.msrb.mxu0 %v2332_v50 }
  0x40   :  { %524 = vmatpush.msrb.mxu3 %v2355_v59  ;;  %457 = vmatpush.msrb.mxu2 %v2232_v10 }
  0x41   :  { %418 = vmatpush.msrb.mxu1 %v2232_v10  ;;  %375 = vmatpush.msrb.mxu0 %v2350_v57 }
  0x42   :  { %530 = vmatpush.msrb.mxu3 %v2371_v2  ;;  %459 = vmatpush.msrb.mxu2 %v2234_v11 }
  0x43   :  { %420 = vmatpush.msrb.mxu1 %v2234_v11  ;;  %379 = vmatpush.msrb.mxu0 %v2364_v62 }
  0x44   :  { %536 = vmatpush.msrb.mxu3 %v2401_v30  ;;  %461 = vmatpush.msrb.mxu2 %v2246_v17 }
  0x45   :  { %422 = vmatpush.msrb.mxu1 %v2246_v17  ;;  %383 = vmatpush.msrb.mxu0 %v2388_v12 }
  0x46   :  { %542 = vmatpush.msrb.mxu3 %v2418_v42  ;;  %463 = vmatpush.msrb.mxu2 %v2268_v25 }
  0x47   :  { %424 = vmatpush.msrb.mxu1 %v2268_v25  ;;  %387 = vmatpush.msrb.mxu0 %v2406_v32 }
  0x48   :  { %548 = vmatpush.msrb.mxu3 %v2431_v53  ;;  %465 = vmatpush.msrb.mxu2 %v2274_v28 }
  0x49   :  { %426 = vmatpush.msrb.mxu1 %v2274_v28  ;;  %391 = vmatpush.msrb.mxu0 %v2412_v39 }
  0x4a   :  { %554 = vmatpush.msrb.mxu3 %v2445_v8  ;;  %467 = vmatpush.msrb.mxu2 %v2294_v36 }
  0x4b   :  { %428 = vmatpush.msrb.mxu1 %v2294_v36  ;;  %395 = vmatpush.msrb.mxu0 %v2436_v61 }
  0x4c   :  { %560 = vmatpush.msrb.mxu3 %v2456_v1  ;;  %469 = vmatpush.msrb.mxu2 %v2318_v45 }
  0x4d   :  { %430 = vmatpush.msrb.mxu1 %v2318_v45  ;;  %399 = vmatpush.msrb.mxu0 %v2450_v7 }
  0x4e   :  { %566 = vmatpush.msrb.mxu3 %v2467_v0  ;;  %471 = vmatpush.msrb.mxu2 %v2334_v51 }
  0x4f   :  { %432 = vmatpush.msrb.mxu1 %v2334_v51  ;;  %403 = vmatpush.msrb.mxu0 %v2461_v58 }
  0x50   :  { %405 = vmatmul.f32.vlgmr.msrb.gmra.mxu0 %v2393_v18  ;;  %572 = vmatpush.msrb.mxu3 %v2475_v6 }
  0x51   :  { %434 = vmatpush.msrb.mxu1 %v2341_v54  ;;  %592 = vmatpush.msra.mxu0 %v2238_v14 }
  0x52   :  { %578 = vmatpush.msrb.mxu3 %v2482_v31  ;;  %473 = vmatpush.msrb.mxu2 %v2341_v54 }
  0x53   :  { %436 = vmatpush.msrb.mxu1 %v2366_v63  ;;  %595 = vmatpush.msra.mxu0 %v2241_v15 }
  0x54   :  { %584 = vmatpush.msrb.mxu3 %v2488_v44  ;;  %475 = vmatpush.msrb.mxu2 %v2366_v63 }
  0x55   :  { %438 = vmatpush.msrb.mxu1 %v2390_v13  ;;  %598 = vmatpush.msra.mxu0 %v2244_v16 }
  0x56   :  { %753 = vmatpush.msra.mxu3 %v2224_v3  ;;  %477 = vmatpush.msrb.mxu2 %v2390_v13 }
  0x57   :  { %440 = vmatpush.msrb.mxu1 %v2395_v26  ;;  %601 = vmatpush.msra.mxu0 %v2250_v19 }
  0x58   :  { %442 = vmatmul.f32.vlgmr.msrb.gmra.mxu1 %v2393_v18  ;;  %755 = vmatpush.msra.mxu3 %v2226_v4  ;;  %v2984_v18 = vld [vmem:[#allocation24_spill] sm:$0xff] }
  0x59   :  { %645 = vmatpush.msra.mxu1 %v2224_v3  ;;  %604 = vmatpush.msra.mxu0 %v2253_v20  ;;  %v2988_v20 = vld [vmem:[#allocation28_spill] sm:$0xff] }
  0x5a   :  { %757 = vmatpush.msra.mxu3 %v2228_v5  ;;  %479 = vmatpush.msrb.mxu2 %v2395_v26 }
  0x5b   :  { %647 = vmatpush.msra.mxu1 %v2226_v4  ;;  %607 = vmatpush.msra.mxu0 %v2256_v21 }
  0x5c   :  { %759 = vmatpush.msra.mxu3 %v2230_v9  ;;  %686 = vmatpush.msra.mxu2 %v2260_v22 }
  0x5d   :  { %649 = vmatpush.msra.mxu1 %v2228_v5  ;;  %610 = vmatpush.msra.mxu0 %v2277_v29 }
  0x5e   :  { %761 = vmatpush.msra.mxu3 %v2232_v10  ;;  %690 = vmatpush.msra.mxu2 %v2263_v23 }
  0x5f   :  { %651 = vmatpush.msra.mxu1 %v2230_v9  ;;  %613 = vmatpush.msra.mxu0 %v2981_v40 }
  0x60   :  { %763 = vmatpush.msra.mxu3 %v2234_v11  ;;  %694 = vmatpush.msra.mxu2 %v2266_v24 }
  0x61   :  { %653 = vmatpush.msra.mxu1 %v2232_v10  ;;  %616 = vmatpush.msra.mxu0 %v2982_v46 }
  0x62   :  { %765 = vmatpush.msra.mxu3 %v2246_v17  ;;  %698 = vmatpush.msra.mxu2 %v2272_v27 }
  0x63   :  { %655 = vmatpush.msra.mxu1 %v2234_v11  ;;  %619 = vmatpush.msra.mxu0 %v2983_v52 }
  0x64   :  { %767 = vmatpush.msra.mxu3 %v2268_v25  ;;  %702 = vmatpush.msra.mxu2 %v2288_v33 }
  0x65   :  { %657 = vmatpush.msra.mxu1 %v2246_v17  ;;  %622 = vmatpush.msra.mxu0 %v2984_v18 }
  0x66   :  { %769 = vmatpush.msra.mxu3 %v2274_v28  ;;  %706 = vmatpush.msra.mxu2 %v2292_v35 }
  0x67   :  { %659 = vmatpush.msra.mxu1 %v2268_v25  ;;  %625 = vmatpush.msra.mxu0 %v2985_v34 }
  0x68   :  { %771 = vmatpush.msra.mxu3 %v2294_v36  ;;  %710 = vmatpush.msra.mxu2 %v2309_v41 }
  0x69   :  { %661 = vmatpush.msra.mxu1 %v2274_v28  ;;  %628 = vmatpush.msra.mxu0 %v2986_v48 }
  0x6a   :  { %773 = vmatpush.msra.mxu3 %v2318_v45  ;;  %714 = vmatpush.msra.mxu2 %v2332_v50 }
  0x6b   :  { %663 = vmatpush.msra.mxu1 %v2294_v36  ;;  %631 = vmatpush.msra.mxu0 %v2987_v55 }
  0x6c   :  { %775 = vmatpush.msra.mxu3 %v2334_v51  ;;  %718 = vmatpush.msra.mxu2 %v2350_v57 }
  0x6d   :  { %665 = vmatpush.msra.mxu1 %v2318_v45  ;;  %634 = vmatpush.msra.mxu0 %v2423_v47 }
  0x6e   :  { %777 = vmatpush.msra.mxu3 %v2341_v54  ;;  %722 = vmatpush.msra.mxu2 %v2364_v62 }
  0x6f   :  { %667 = vmatpush.msra.mxu1 %v2334_v51  ;;  %637 = vmatpush.msra.mxu0 %v2439_v60 }
  0x70   :  { %779 = vmatpush.msra.mxu3 %v2366_v63  ;;  %726 = vmatpush.msra.mxu2 %v2388_v12 }
  0x71   :  { %669 = vmatpush.msra.mxu1 %v2341_v54 }
  0x72   :  { %781 = vmatpush.msra.mxu3 %v2390_v13  ;;  %730 = vmatpush.msra.mxu2 %v2406_v32 }
  0x73   :  { %671 = vmatpush.msra.mxu1 %v2366_v63 }
  0x74   :  { %783 = vmatpush.msra.mxu3 %v2395_v26  ;;  %734 = vmatpush.msra.mxu2 %v2412_v39  ;;  %v1896_v39 = vld [vmem:[#allocation4] sm:$0xf] }
  0x75   :  { %673 = vmatpush.msra.mxu1 %v2390_v13 }
  0x76   :  { %738 = vmatpush.msra.mxu2 %v2436_v61 }
  0x77   :  { %675 = vmatpush.msra.mxu1 %v2395_v26 }
  0x78   :  { %742 = vmatpush.msra.mxu2 %v2450_v7 }
  0x7a   :  { %746 = vmatpush.msra.mxu2 %v2461_v58 }
  0xb1   :  { %v143_v47 = vpop.f32.mrf.mxu0 }
  0xb5   :  { %v244_v60 = vpop.f32.mrf.mxu1  ;;  %v337_v18 = vpop.f32.mrf.mxu3 }
  0xb6   :  { %v245_v55 = vadd.f32 %v244_v60, %v143_v47 }
  0xb7   :  { %v298_v48 = vpop.f32.mrf.mxu2 }
  0xb8   :  { %v299_v34 = vadd.f32 %v298_v48, %v245_v55  ;;  %v1946_v55 = vld [vmem:[#allocation4 + $0x68] sm:$0xf0] }
  0xba   :  { %v338_v52 = vadd.f32 %v337_v18, %v299_v34  ;;  %v1944_v18 = vld [vmem:[#allocation4 + $0x60] sm:$0xf]  ;;  %v2037_v34 = vld [vmem:[#allocation4 + $0x64] sm:$0xf0] }
  0xbb   :  { %v1945_v48 = vor.u32 %v2037_v34, %v1944_v18  ;;  %v1920_v18 = vld [vmem:[#allocation4 + $0x30] sm:$0xf]  ;;  %v2031_v34 = vld [vmem:[#allocation4 + $0x34] sm:$0xf0] }
  0xcd   :  { %v406_v46 = vpop.f32.mrf.mxu0 }
  0xce   :  { %v407_v40 = vadd.f32 %v406_v46, %v338_v52  ;;  %v1952_v46 = vld [vmem:[#allocation4 + $0x70] sm:$0xf]  ;;  %v2039_v52 = vld [vmem:[#allocation4 + $0x74] sm:$0xf0] }
  0xd5   :  { %v443_v29 = vpop.f32.mrf.mxu1 }
  0xd6   :  { %v444_v21 = vadd.f32 %v443_v29, %v407_v40  ;;  %v2038_v29 = vld [vmem:[#allocation4 + $0x74] sm:$0xf]  ;;  %v1953_v40 = vor.u32 %v2039_v52, %v1952_v46  ;;  %v1928_v46 = vld [vmem:[#allocation4 + $0x40] sm:$0xf]  ;;  %v2033_v52 = vld [vmem:[#allocation4 + $0x44] sm:$0xf0] }
  0xd8   :  { %v2622_v19 = vsub.f32 %v2988_v20, %v444_v21  ;;  %v1954_v20 = vld [vmem:[#allocation4 + $0x78] sm:$0xf0]  ;;  %910 = vmatpush.bf16.msrb.mxu0 %v1953_v40  ;;  %v1929_v40 = vor.u32 %v2033_v52, %v1928_v46  ;;  %v1904_v46 = vld [vmem:[#allocation4 + $0x10] sm:$0xf]  ;;  %v2027_v52 = vld [vmem:[#allocation4 + $0x14] sm:$0xf0] }
  0xd9   :  { %v1957_v21 = vor.u32 %v2038_v29, %v1954_v20  ;;  %v2032_v29 = vld [vmem:[#allocation4 + $0x44] sm:$0xf]  ;;  %v1930_v20 = vld [vmem:[#allocation4 + $0x48] sm:$0xf0] }
  0xda   :  { %v447_v16 = vmul.f32 %v2622_v19, %v2622_v19 }
  0xdb   :  { %923 = vmatpush.bf16.msrb.mxu1 %v1957_v21  ;;  %v1933_v21 = vor.u32 %v2032_v29, %v1930_v20  ;;  %v2026_v29 = vld [vmem:[#allocation4 + $0x14] sm:$0xf]  ;;  %v1906_v20 = vld [vmem:[#allocation4 + $0x18] sm:$0xf0] }
  0xdc   :  { %v480_v15 = vand.u32 4294901760, %v447_v16  ;;  %911 = vmatpush.bf16.msrb.mxu0 %v1945_v48  ;;  %v1922_v48 = vld [vmem:[#allocation4 + $0x38] sm:$0xf0] }
  0xde   :  { %v481_v14 = vsub.f32 %v447_v16, %v480_v15  ;;  %586 = vmatmul.f32.vlgmr.msrb.gmra.mxu3 %v480_v15  ;;  %v2036_v16 = vld [vmem:[#allocation4 + $0x64] sm:$0xf] }
  0xdf   :  { %v1949_v7 = vor.u32 %v2036_v16, %v1946_v55  ;;  %v2030_v16 = vld [vmem:[#allocation4 + $0x34] sm:$0xf] }
  0xe0   :  { %640 = vmatmul.f32.vlgmr.msra.gmra.mxu0 %v481_v14  ;;  %v482_v58 = vand.u32 4294901760, %v481_v14  ;;  %v1925_v55 = vor.u32 %v2030_v16, %v1922_v48 }
  0xe1   :  { %924 = vmatpush.bf16.msrb.mxu1 %v1949_v7  ;;  %v1921_v7 = vor.u32 %v2031_v34, %v1920_v18  ;;  %v2025_v18 = vld [vmem:[#allocation4 + $0x4] sm:$0xf0]  ;;  %v2024_v34 = vld [vmem:[#allocation4 + $0x4] sm:$0xf] }
  0xe2   :  { %679 = vmatmul.f32.vlgmr.msra.gmra.mxu1 %v482_v58  ;;  %v483_v47 = vsub.f32 %v481_v14, %v482_v58  ;;  %v1936_v14 = vld [vmem:[#allocation4 + $0x50] sm:$0xf]  ;;  %v2035_v58 = vld [vmem:[#allocation4 + $0x54] sm:$0xf0]  ;;  %v1897_v48 = vor.u32 %v2025_v18, %v1896_v39 }
  0xe4   :  { %v484_v60 = vand.u32 4294901760, %v483_v47  ;;  %v2034_v47 = vld [vmem:[#allocation4 + $0x54] sm:$0xf] }
  0xe6   :  { %485 = vmatmul.f32.vlgmr.msrb.gmra.mxu2 %v484_v60  ;;  %785 = vmatmul.f32.vlgmr.msra.gmra.mxu3 %v480_v15  ;;  %v1938_v60 = vld [vmem:[#allocation4 + $0x58] sm:$0xf0] }
  0xe7   :  { %v1941_v61 = vor.u32 %v2034_v47, %v1938_v60  ;;  %v2028_v47 = vld [vmem:[#allocation4 + $0x24] sm:$0xf] }
  0xe9   :  { %925 = vmatpush.bf16.msrb.mxu1 %v1941_v61 }
  0xed   :  { %926 = vmatpush.bf16.msrb.mxu1 %v1933_v21  ;;  %v1909_v21 = vor.u32 %v2026_v29, %v1906_v20 }
  0xee   :  { %748 = vmatmul.f32.vlgmr.msra.gmra.mxu2 %v480_v15  ;;  %v1937_v15 = vor.u32 %v2035_v58, %v1936_v14  ;;  %v1912_v14 = vld [vmem:[#allocation4 + $0x20] sm:$0xf]  ;;  %v2029_v58 = vld [vmem:[#allocation4 + $0x24] sm:$0xf0] }
  0xef   :  { %v1913_v61 = vor.u32 %v2029_v58, %v1912_v14 }
  0xf0   :  { %912 = vmatpush.bf16.msrb.mxu0 %v1937_v15  ;;  %v1914_v15 = vld [vmem:[#allocation4 + $0x28] sm:$0xf0] }
  0xf1   :  { %927 = vmatpush.bf16.msrb.mxu1 %v1925_v55  ;;  %v1917_v60 = vor.u32 %v2028_v47, %v1914_v15  ;;  %v1898_v55 = vld [vmem:[#allocation4 + $0x8] sm:$0xf0] }
  0xf2   :  { %v1901_v14 = vor.u32 %v2024_v34, %v1898_v55  ;;  %v2064_v55 = vld [vmem:[%s2898_s7] ss:$0 sm:$0xff] }
  0xf4   :  { %913 = vmatpush.bf16.msrb.mxu0 %v1929_v40  ;;  %v1905_v40 = vor.u32 %v2027_v52, %v1904_v46 }
  0xf5   :  { %928 = vmatpush.bf16.msrb.mxu1 %v1917_v60 }
  0xf8   :  { %914 = vmatpush.bf16.msrb.mxu0 %v1921_v7 }
  0xf9   :  { %929 = vmatpush.bf16.msrb.mxu1 %v1909_v21 }
  0xfc   :  { %915 = vmatpush.bf16.msrb.mxu0 %v1913_v61 }
  0xfd   :  { %930 = vmatpush.bf16.msrb.mxu1 %v1901_v14 }
 0x100   :  { %916 = vmatpush.bf16.msrb.mxu0 %v1905_v40 }
 0x101   :  { %1230 = vmatpush.msra.mxu1 %v2297_v37 }
 0x103   :  { %1236 = vmatpush.msra.mxu1 %v2300_v38 }
 0x104   :  { %917 = vmatpush.bf16.msrb.mxu0 %v1897_v48 }
 0x105   :  { %1242 = vmatpush.msra.mxu1 %v2314_v43 }
 0x107   :  { %1248 = vmatpush.msra.mxu1 %v2329_v49 }
 0x108   :  { %1185 = vmatpush.msra.mxu0 %v2224_v3 }
 0x109   :  { %1254 = vmatpush.msra.mxu1 %v2347_v56 }
 0x10a   :  { %1187 = vmatpush.msra.mxu0 %v2226_v4 }
 0x10b   :  { %1260 = vmatpush.msra.mxu1 %v2355_v59 }
 0x10c   :  { %1189 = vmatpush.msra.mxu0 %v2228_v5 }
 0x10d   :  { %1266 = vmatpush.msra.mxu1 %v2371_v2 }
 0x10e   :  { %1191 = vmatpush.msra.mxu0 %v2230_v9 }
 0x10f   :  { %1272 = vmatpush.msra.mxu1 %v2401_v30 }
 0x110   :  { %1193 = vmatpush.msra.mxu0 %v2232_v10 }
 0x111   :  { %1278 = vmatpush.msra.mxu1 %v2418_v42 }
 0x112   :  { %1195 = vmatpush.msra.mxu0 %v2234_v11 }
 0x113   :  { %1284 = vmatpush.msra.mxu1 %v2431_v53 }
 0x114   :  { %1197 = vmatpush.msra.mxu0 %v2246_v17 }
 0x115   :  { %1290 = vmatpush.msra.mxu1 %v2445_v8 }
 0x116   :  { %1199 = vmatpush.msra.mxu0 %v2268_v25 }
 0x117   :  { %1296 = vmatpush.msra.mxu1 %v2456_v1 }
 0x118   :  { %1201 = vmatpush.msra.mxu0 %v2274_v28 }
 0x119   :  { %1302 = vmatpush.msra.mxu1 %v2467_v0 }
 0x11a   :  { %1203 = vmatpush.msra.mxu0 %v2294_v36 }
 0x11b   :  { %1308 = vmatpush.msra.mxu1 %v2475_v6 }
 0x11c   :  { %1205 = vmatpush.msra.mxu0 %v2318_v45 }
 0x11d   :  { %1314 = vmatpush.msra.mxu1 %v2482_v31 }
 0x11e   :  { %1207 = vmatpush.msra.mxu0 %v2334_v51 }
 0x11f   :  { %1320 = vmatpush.msra.mxu1 %v2488_v44 }
 0x120   :  { %1209 = vmatpush.msra.mxu0 %v2341_v54 }
 0x122   :  { %1211 = vmatpush.msra.mxu0 %v2366_v63 }
 0x124   :  { %1213 = vmatpush.msra.mxu0 %v2390_v13 }
 0x126   :  { %1215 = vmatpush.msra.mxu0 %v2395_v26 }
 0x15d   :  { %v641_v47 = vpop.f32.mrf.mxu0 }
 0x15f   :  { %v680_v15 = vpop.f32.mrf.mxu1 }
 0x161   :  { %v587_v16 = vpop.f32.mrf.mxu3 }
 0x169   :  { %v486_v7 = vpop.f32.mrf.mxu2  ;;  %v786_v52 = vpop.f32.mrf.mxu3 }
 0x16a   :  { %v487_v32 = vadd.f32 1e-06, %v486_v7 }
 0x16c   :  { %v588_v58 = vadd.f32 %v587_v16, %v487_v32  ;;  %v2063_v16 = vld [vmem:[%s2897_s6] ss:$0 sm:$0xff] }
 0x16e   :  { %v642_v61 = vadd.f32 %v641_v47, %v588_v58 }
 0x170   :  { %v681_v60 = vadd.f32 %v680_v15, %v642_v61  ;;  %v2990_v61 = vld [vmem:[#allocation32_spill] sm:$0xff]  ;;  %v2991_v15 = vld [vmem:[#allocation34_spill] sm:$0xff] }
 0x171   :  { %v749_v46 = vpop.f32.mrf.mxu2 }
 0x172   :  { %v750_v39 = vadd.f32 %v749_v46, %v681_v60  ;;  %v2992_v60 = vld [vmem:[#allocation36_spill] sm:$0xff]  ;;  %v2993_v46 = vld [vmem:[#allocation37_spill] sm:$0xff] }
 0x174   :  { %v787_v32 = vadd.f32 %v786_v52, %v750_v39  ;;  %v2047_v39 = vld [vmem:[#allocation6 + $0x38] sm:$0xff] }
 0x175   :  { %v2055_v52 = vld [vmem:[#allocation6 + $0x78] sm:$0xff]  ;;  %1157 = vmatpush.bf16.msrb.mxu2 %v2047_v39 }
 0x176   :  { %2068 = vrsqrt.f32 %v787_v32  ;;  %vm795_vm1 = vweird.f32 %v787_v32  ;;  %1170 = vmatpush.bf16.msrb.mxu3 %v2055_v52  ;;  %v2044_v52 = vld [vmem:[#allocation6 + $0x20] sm:$0xff] }
 0x17c   :  { %v2069_v29 = vpop.eup %2068 }
 0x17d   :  { %v790_v40 = vmul.f32 %v2069_v29, %v787_v32  ;;  %vm796_vm0 = vweird.f32 %v2069_v29  ;;  %v103_v32 = vld [vmem:[%s2894_s3] sm:$0x3] }
 0x17e   :  { %vm797_vm2 = vmor %vm795_vm1, %vm796_vm0 }
 0x17f   :  { %v791_v20 = vmul.f32 %v2069_v29, %v790_v40  ;;  %v827_v40 = vperm.slane %v103_v32, 1 }
 0x181   :  { %v792_v21 = vmul.f32 0.5, %v791_v20  ;;  %v2046_v20 = vld [vmem:[#allocation6 + $0x30] sm:$0xff] }
 0x182   :  { %1158 = vmatpush.bf16.msrb.mxu2 %v2046_v20 }
 0x183   :  { %v793_v18 = vsub.f32 1.5, %v792_v21  ;;  %v2054_v21 = vld [vmem:[#allocation6 + $0x70] sm:$0xff] }
 0x184   :  { %1171 = vmatpush.bf16.msrb.mxu3 %v2054_v21 }
 0x185   :  { %v794_v34 = vmul.f32 %v2069_v29, %v793_v18 }
 0x187   :  { %v798_v7 = vsel %vm797_vm2, %v2069_v29, %v794_v34  ;;  %v826_v29 = vperm.slane %v103_v32, 0  ;;  %v2052_v32 = vld [vmem:[#allocation6 + $0x60] sm:$0xff] }
 0x188   :  { %v799_v48 = vmul.f32 %v798_v7, %v2622_v19  ;;  %v2989_v19 = vld [vmem:[#allocation30_spill] sm:$0xff] }
 0x18a   :  { %v803_v14 = vmul.f32 %v2063_v16, %v799_v48  ;;  %v2045_v48 = vld [vmem:[#allocation6 + $0x28] sm:$0xff] }
 0x18b   :  { %1159 = vmatpush.bf16.msrb.mxu2 %v2045_v48 }
 0x18c   :  { %v807_v58 = vadd.f32 %v2064_v55, %v803_v14  ;;  %v2053_v55 = vld [vmem:[#allocation6 + $0x68] sm:$0xff] }
 0x18d   :  { %1172 = vmatpush.bf16.msrb.mxu3 %v2053_v55 }
 0x18e   :  { %v808_v47 = vpack.c.bf16 %v807_v58, %v807_v58 }
 0x18f   :  { %1160 = vmatpush.bf16.msrb.mxu2 %v2044_v52 }
 0x190   :  { %918 = vmatmul.bf16.vlgmr.msrb.gmra.mxu0 %v808_v47  ;;  %931 = vmatmul.bf16.vlgmr.msrb.gmra.mxu1 %v808_v47 }
 0x191   :  { %1489 = vmatpush.msrb.mxu1 %v2224_v3  ;;  %1422 = vmatpush.msrb.mxu0 %v2260_v22 }
 0x192   :  { %1173 = vmatpush.bf16.msrb.mxu3 %v2052_v32 }
 0x193   :  { %1491 = vmatpush.msrb.mxu1 %v2226_v4  ;;  %1426 = vmatpush.msrb.mxu0 %v2263_v23 }
 0x195   :  { %1493 = vmatpush.msrb.mxu1 %v2228_v5  ;;  %1430 = vmatpush.msrb.mxu0 %v2266_v24 }
 0x197   :  { %1495 = vmatpush.msrb.mxu1 %v2230_v9  ;;  %1434 = vmatpush.msrb.mxu0 %v2272_v27 }
 0x199   :  { %1497 = vmatpush.msrb.mxu1 %v2232_v10  ;;  %1438 = vmatpush.msrb.mxu0 %v2288_v33 }
 0x19b   :  { %1499 = vmatpush.msrb.mxu1 %v2234_v11  ;;  %1442 = vmatpush.msrb.mxu0 %v2292_v35 }
 0x19d   :  { %1501 = vmatpush.msrb.mxu1 %v2246_v17  ;;  %1446 = vmatpush.msrb.mxu0 %v2309_v41 }
 0x19f   :  { %1503 = vmatpush.msrb.mxu1 %v2268_v25  ;;  %1450 = vmatpush.msrb.mxu0 %v2332_v50 }
 0x1a1   :  { %1505 = vmatpush.msrb.mxu1 %v2274_v28  ;;  %1454 = vmatpush.msrb.mxu0 %v2350_v57 }
 0x1a3   :  { %1507 = vmatpush.msrb.mxu1 %v2294_v36  ;;  %1458 = vmatpush.msrb.mxu0 %v2364_v62 }
 0x1a5   :  { %1509 = vmatpush.msrb.mxu1 %v2318_v45  ;;  %1462 = vmatpush.msrb.mxu0 %v2388_v12 }
 0x1a7   :  { %1511 = vmatpush.msrb.mxu1 %v2334_v51  ;;  %1466 = vmatpush.msrb.mxu0 %v2989_v19 }
 0x1a9   :  { %1513 = vmatpush.msrb.mxu1 %v2341_v54  ;;  %1470 = vmatpush.msrb.mxu0 %v2990_v61 }
 0x1ab   :  { %1515 = vmatpush.msrb.mxu1 %v2366_v63  ;;  %1474 = vmatpush.msrb.mxu0 %v2991_v15 }
 0x1ad   :  { %1517 = vmatpush.msrb.mxu1 %v2390_v13  ;;  %1478 = vmatpush.msrb.mxu0 %v2992_v60  ;;  %v2051_v60 = vld [vmem:[#allocation6 + $0x58] sm:$0xff] }
 0x1ae   :  { %1174 = vmatpush.bf16.msrb.mxu3 %v2051_v60  ;;  %v2049_v60 = vld [vmem:[#allocation6 + $0x48] sm:$0xff] }
 0x1af   :  { %1519 = vmatpush.msrb.mxu1 %v2395_v26  ;;  %1482 = vmatpush.msrb.mxu0 %v2993_v46  ;;  %v2043_v46 = vld [vmem:[#allocation6 + $0x18] sm:$0xff] }
 0x1b0   :  { %1161 = vmatpush.bf16.msrb.mxu2 %v2043_v46  ;;  %v2041_v46 = vld [vmem:[#allocation6 + $0x8] sm:$0xff] }
 0x20d   :  { %v919_v18 = vpop.f32.mrf.mxu0  ;;  %v932_v34 = vpop.f32.mrf.mxu1 }
 0x20e   :  { %v2700_v16 = vadd.f32 %v919_v18, %v826_v29  ;;  %v2702_v7 = vadd.f32 %v932_v34, %v827_v40 }
 0x210   :  { %v2705_v14 = vmul.f32 0.70710677, %v2700_v16  ;;  %v2708_v58 = vmul.f32 0.70710677, %v2702_v7 }
 0x212   :  { %v940_v47 = vmul.f32 %v2705_v14, %v2705_v14  ;;  %v980_v39 = vmul.f32 %v2708_v58, %v2708_v58 }
 0x214   :  { %v2714_v29 = vmin.f32 %v940_v47, 16.0  ;;  %v2716_v40 = vmin.f32 %v980_v39, 16.0 }
 0x215   :  { %v921_v20 = vpop.f32.mrf.mxu0  ;;  %v934_v21 = vpop.f32.mrf.mxu1 }
 0x216   :  { %v942_v18 = vmul.f32 2.1237322e-06, %v2714_v29  ;;  %v953_v34 = vmul.f32 3.8918573e-05, %v2714_v29  ;;  %v982_v48 = vmul.f32 2.1237322e-06, %v2716_v40 }
 0x217   :  { %v993_v55 = vmul.f32 3.8918573e-05, %v2716_v40  ;;  %v2042_v20 = vld [vmem:[#allocation6 + $0x10] sm:$0xff] }
 0x218   :  { %v943_v15 = vadd.f32 0.00028619796, %v942_v18  ;;  %v954_v61 = vadd.f32 0.001143296, %v953_v34  ;;  %v983_v47 = vadd.f32 0.00028619796, %v982_v48  ;;  %1162 = vmatpush.bf16.msrb.mxu2 %v2042_v20 }
 0x219   :  { %v994_v19 = vadd.f32 0.001143296, %v993_v55  ;;  %v2050_v21 = vld [vmem:[#allocation6 + $0x50] sm:$0xff] }
 0x21a   :  { %v944_v39 = vmul.f32 %v943_v15, %v2714_v29  ;;  %v955_v52 = vmul.f32 %v954_v61, %v2714_v29  ;;  %v984_v32 = vmul.f32 %v983_v47, %v2716_v40  ;;  %1175 = vmatpush.bf16.msrb.mxu3 %v2050_v21  ;;  %v2994_v21 = vld [vmem:[#allocation9_spill] sm:$0xff] }
 0x21b   :  { %v995_v12 = vmul.f32 %v994_v19, %v2716_v40 }
 0x21c   :  { %v945_v62 = vadd.f32 0.0036580483, %v944_v39  ;;  %v956_v57 = vadd.f32 0.014752088, %v955_v52  ;;  %v985_v34 = vadd.f32 0.0036580483, %v984_v32  ;;  %1163 = vmatpush.bf16.msrb.mxu2 %v2041_v46 }
 0x21d   :  { %v996_v50 = vadd.f32 0.014752088, %v995_v12  ;;  %v2040_v12 = vld [vmem:[#allocation6] sm:$0xff] }
 0x21e   :  { %v957_v18 = vmul.f32 %v956_v57, %v2714_v29  ;;  %v946_v61 = vmul.f32 %v945_v62, %v2714_v29  ;;  %1176 = vmatpush.bf16.msrb.mxu3 %v2049_v60  ;;  %v986_v47 = vmul.f32 %v985_v34, %v2716_v40  ;;  %v2048_v39 = vld [vmem:[#allocation6 + $0x40] sm:$0xff]  ;;  %v2995_v60 = vld [vmem:[#allocation10_spill] sm:$0xff] }
 0x21f   :  { %v997_v15 = vmul.f32 %v996_v50, %v2716_v40 }
 0x220   :  { %v958_v48 = vadd.f32 0.112945676, %v957_v18  ;;  %v947_v57 = vadd.f32 0.05243302, %v946_v61  ;;  %1164 = vmatpush.bf16.msrb.mxu2 %v2040_v12  ;;  %v987_v62 = vadd.f32 0.05243302, %v986_v47 }
 0x221   :  { %v998_v55 = vadd.f32 0.112945676, %v997_v15  ;;  %v2998_v12 = vld [vmem:[#allocation13_spill] sm:$0xff] }
 0x222   :  { %v959_v19 = vmul.f32 %v958_v48, %v2714_v29  ;;  %1177 = vmatpush.bf16.msrb.mxu3 %v2048_v39  ;;  %v948_v34 = vmul.f32 %v947_v57, %v2714_v29  ;;  %v988_v61 = vmul.f32 %v987_v62, %v2716_v40  ;;  %v2996_v48 = vld [vmem:[#allocation11_spill] sm:$0xff]  ;;  %v2999_v57 = vld [vmem:[#allocation14_spill] sm:$0xff] }
 0x223   :  { %v999_v52 = vmul.f32 %v998_v55, %v2716_v40 }
 0x224   :  { %v960_v32 = vadd.f32 0.4994258, %v959_v19  ;;  %1328 = vmatpush.msra.mxu2 %v2994_v21  ;;  %v949_v55 = vadd.f32 0.18741608, %v948_v34  ;;  %v2997_v19 = vld [vmem:[#allocation12_spill] sm:$0xff] }
 0x225   :  { %v1000_v20 = vadd.f32 0.4994258, %v999_v52  ;;  %v989_v47 = vadd.f32 0.18741608, %v988_v61 }
 0x226   :  { %v961_v50 = vmul.f32 %v960_v32, %v2714_v29  ;;  %1381 = vmatpush.msra.mxu3 %v2224_v3  ;;  %1331 = vmatpush.msra.mxu2 %v2995_v60  ;;  %v950_v52 = vmul.f32 %v949_v55, %v2714_v29 }
 0x227   :  { %v1001_v18 = vmul.f32 %v1000_v20, %v2716_v40 }
 0x228   :  { %v962_v46 = vadd.f32 1.0, %v961_v50  ;;  %1383 = vmatpush.msra.mxu3 %v2226_v4  ;;  %1334 = vmatpush.msra.mxu2 %v2996_v48  ;;  %v990_v50 = vmul.f32 %v989_v47, %v2716_v40  ;;  %v951_v61 = vadd.f32 1.1283791, %v950_v52  ;;  %v3002_v47 = vld [vmem:[#allocation20_spill] sm:$0xff] }
 0x229   :  { %v1002_v15 = vadd.f32 1.0, %v1001_v18  ;;  %v3000_v18 = vld [vmem:[#allocation15_spill] sm:$0xff] }
 0x22a   :  { %2070 = vrcp.f32 %v962_v46  ;;  %1385 = vmatpush.msra.mxu3 %v2228_v5  ;;  %1337 = vmatpush.msra.mxu2 %v2997_v19  ;;  %v974_v41 = vand.u32 2147483648, %v962_v46  ;;  %v972_v55 = vand.u32 2147483647, %v962_v46  ;;  %v991_v19 = vadd.f32 1.1283791, %v990_v50 }
 0x22b   :  { %2072 = vrcp.f32 %v1002_v15  ;;  %v1012_v40 = vand.u32 2147483647, %v1002_v15  ;;  %vm968_vm5 = vweird.f32 %v962_v46  ;;  %vm1008_vm7 = vweird.f32 %v1002_v15 }
 0x22c   :  { %1387 = vmatpush.msra.mxu3 %v2230_v9  ;;  %1340 = vmatpush.msra.mxu2 %v2998_v12  ;;  %v3001_v12 = vld [vmem:[#allocation18_spill] sm:$0xff]  ;;  %v975_v52 = vor.u32 1.1754944e-38, %v974_v41  ;;  %vm973_vm8 = vcmp.eq.f32.partialorder %v972_v55, 8.507059e+37  ;;  %v3007_v55 = vld [vmem:[#allocation31_spill] sm:$0xff] }
 0x22d   :  { %vm1013_vm10 = vcmp.eq.f32.partialorder %v1012_v40, 8.507059e+37 }
 0x22e   :  { %1389 = vmatpush.msra.mxu3 %v2232_v10  ;;  %1343 = vmatpush.msra.mxu2 %v2999_v57  ;;  %v1014_v57 = vand.u32 2147483648, %v1002_v15 }
 0x230   :  { %v2071_v39 = vpop.eup %2070  ;;  %1391 = vmatpush.msra.mxu3 %v2234_v11  ;;  %1346 = vmatpush.msra.mxu2 %v3000_v18  ;;  %v992_v18 = vmul.f32 %v991_v19, %v2708_v58  ;;  %v936_v58 = vmul.f32 0.5, %v2700_v16 }
 0x231   :  { %v2073_v32 = vpop.eup %2072  ;;  %v964_v20 = vmul.f32 %v2071_v39, %v962_v46  ;;  %vm969_vm3 = vweird.f32 %v2071_v39  ;;  %v3004_v46 = vld [vmem:[#allocation24_spill] sm:$0xff] }
 0x232   :  { %v1004_v62 = vmul.f32 %v2073_v32, %v1002_v15  ;;  %1393 = vmatpush.msra.mxu3 %v2246_v17  ;;  %1349 = vmatpush.msra.mxu2 %v3001_v12  ;;  %vm1009_vm4 = vweird.f32 %v2073_v32  ;;  %vm970_vm6 = vmor %vm968_vm5, %vm969_vm3  ;;  %v3003_v12 = vld [vmem:[#allocation22_spill] sm:$0xff] }
 0x233   :  { %v965_v34 = vsub.f32 1.0, %v964_v20  ;;  %vm1010_vm9 = vmor %vm1008_vm7, %vm1009_vm4 }
 0x234   :  { %v1005_v35 = vsub.f32 1.0, %v1004_v62  ;;  %1395 = vmatpush.msra.mxu3 %v2268_v25  ;;  %1352 = vmatpush.msra.mxu2 %v3002_v47 }
 0x235   :  { %v966_v29 = vmul.f32 %v2071_v39, %v965_v34  ;;  %v952_v34 = vmul.f32 %v951_v61, %v2705_v14  ;;  %v3006_v61 = vld [vmem:[#allocation27_spill] sm:$0xff] }
 0x236   :  { %v1006_v33 = vmul.f32 %v2073_v32, %v1005_v35  ;;  %1397 = vmatpush.msra.mxu3 %v2274_v28  ;;  %1355 = vmatpush.msra.mxu2 %v3003_v12  ;;  %v1015_v35 = vor.u32 1.1754944e-38, %v1014_v57  ;;  %v3005_v12 = vld [vmem:[#allocation26_spill] sm:$0xff]  ;;  %v937_v57 = vmul.f32 0.5, %v2702_v7 }
 0x237   :  { %v967_v20 = vadd.f32 %v2071_v39, %v966_v29 }
 0x238   :  { %v1007_v62 = vadd.f32 %v2073_v32, %v1006_v33  ;;  %1399 = vmatpush.msra.mxu3 %v2294_v36  ;;  %1358 = vmatpush.msra.mxu2 %v3004_v46 }
 0x239   :  { %v971_v50 = vsel %vm970_vm6, %v2071_v39, %v967_v20 }
 0x23a   :  { %v976_v47 = vsel %vm973_vm8, %v975_v52, %v971_v50  ;;  %v1011_v29 = vsel %vm1010_vm9, %v2073_v32, %v1007_v62  ;;  %1401 = vmatpush.msra.mxu3 %v2318_v45  ;;  %1361 = vmatpush.msra.mxu2 %v3005_v12  ;;  %v3009_v62 = vld [vmem:[#allocation35_spill] sm:$0xff] }
 0x23b   :  { %v977_v33 = vmul.f32 %v976_v47, %v952_v34  ;;  %v1016_v41 = vsel %vm1013_vm10, %v1015_v35, %v1011_v29  ;;  %v3008_v47 = vld [vmem:[#allocation33_spill] sm:$0xff] }
 0x23c   :  { %v1017_v15 = vmul.f32 %v1016_v41, %v992_v18  ;;  %1403 = vmatpush.msra.mxu3 %v2334_v51  ;;  %1364 = vmatpush.msra.mxu2 %v3006_v61 }
 0x23d   :  { %v1958_v14 = vclamps-f32 %v977_v33, 1.0 }
 0x23e   :  { %v1959_v39 = vclamps-f32 %v1017_v15, 1.0  ;;  %1405 = vmatpush.msra.mxu3 %v2341_v54  ;;  %1367 = vmatpush.msra.mxu2 %v3007_v55 }
 0x23f   :  { %v1020_v19 = vadd.f32 1.0, %v1958_v14 }
 0x240   :  { %v1021_v32 = vadd.f32 1.0, %v1959_v39  ;;  %1407 = vmatpush.msra.mxu3 %v2366_v63  ;;  %1370 = vmatpush.msra.mxu2 %v3008_v47 }
 0x241   :  { %v1022_v18 = vmul.f32 %v1020_v19, %v936_v58 }
 0x242   :  { %v1023_v40 = vmul.f32 %v1021_v32, %v937_v57  ;;  %1409 = vmatpush.msra.mxu3 %v2390_v13  ;;  %1373 = vmatpush.msra.mxu2 %v3009_v62 }
 0x243   :  { %v1024_v20 = vpack.c.bf16 %v1022_v18, %v1022_v18 }
 0x244   :  { %v1025_v52 = vpack.c.bf16 %v1023_v40, %v1023_v40  ;;  %1411 = vmatpush.msra.mxu3 %v2395_v26 }
 0x245   :  { %1165 = vmatmul.bf16.vlgmr.msrb.gmra.mxu2 %v1024_v20 }
 0x246   :  { %1178 = vmatmul.bf16.vlgmr.msrb.gmra.mxu3 %v1025_v52  ;;  %1528 = vmatpush.msrb.mxu2 %v2224_v3 }
 0x247   :  { %1573 = vmatpush.msrb.mxu3 %v2297_v37  ;;  %v2065_v37 = vld [vmem:[%s2896_s5] ss:$0 sm:$0xff] }
 0x248   :  { %1530 = vmatpush.msrb.mxu2 %v2226_v4 }
 0x249   :  { %1579 = vmatpush.msrb.mxu3 %v2300_v38 }
 0x24a   :  { %1532 = vmatpush.msrb.mxu2 %v2228_v5 }
 0x24b   :  { %1585 = vmatpush.msrb.mxu3 %v2314_v43 }
 0x24c   :  { %1534 = vmatpush.msrb.mxu2 %v2230_v9 }
 0x24d   :  { %1591 = vmatpush.msrb.mxu3 %v2329_v49 }
 0x24e   :  { %1536 = vmatpush.msrb.mxu2 %v2232_v10 }
 0x24f   :  { %1597 = vmatpush.msrb.mxu3 %v2347_v56 }
 0x250   :  { %1538 = vmatpush.msrb.mxu2 %v2234_v11 }
 0x251   :  { %1603 = vmatpush.msrb.mxu3 %v2355_v59  ;;  %v2076_v59 = vld [vmem:[%s2891_s0] sm:$0xff] }
 0x252   :  { %1540 = vmatpush.msrb.mxu2 %v2246_v17 }
 0x253   :  { %1609 = vmatpush.msrb.mxu3 %v2371_v2 }
 0x254   :  { %1542 = vmatpush.msrb.mxu2 %v2268_v25 }
 0x255   :  { %1615 = vmatpush.msrb.mxu3 %v2401_v30 }
 0x256   :  { %1544 = vmatpush.msrb.mxu2 %v2274_v28 }
 0x257   :  { %1621 = vmatpush.msrb.mxu3 %v2418_v42 }
 0x258   :  { %1546 = vmatpush.msrb.mxu2 %v2294_v36 }
 0x259   :  { %1627 = vmatpush.msrb.mxu3 %v2431_v53 }
 0x25a   :  { %1548 = vmatpush.msrb.mxu2 %v2318_v45 }
 0x25b   :  { %1633 = vmatpush.msrb.mxu3 %v2445_v8 }
 0x25c   :  { %1550 = vmatpush.msrb.mxu2 %v2334_v51 }
 0x25d   :  { %1639 = vmatpush.msrb.mxu3 %v2456_v1 }
 0x25e   :  { %1552 = vmatpush.msrb.mxu2 %v2341_v54 }
 0x25f   :  { %1645 = vmatpush.msrb.mxu3 %v2467_v0 }
 0x260   :  { %1554 = vmatpush.msrb.mxu2 %v2366_v63 }
 0x261   :  { %1651 = vmatpush.msrb.mxu3 %v2475_v6 }
 0x262   :  { %1556 = vmatpush.msrb.mxu2 %v2390_v13 }
 0x263   :  { %1657 = vmatpush.msrb.mxu3 %v2482_v31  ;;  %v3022_v31 = vld [vmem:[#allocation22_spill] sm:$0xff] }
 0x264   :  { %1558 = vmatpush.msrb.mxu2 %v2395_v26 }
 0x265   :  { %1663 = vmatpush.msrb.mxu3 %v2488_v44  ;;  %v3028_v44 = vld [vmem:[#allocation37_spill] sm:$0xff] }
 0x2c8   :  { %v1166_v38 = vpop.f32.mrf.mxu2 }
 0x2c9   :  { %v1167_v43 = vadd.f32 %v2065_v37, %v1166_v38  ;;  %v1179_v49 = vpop.f32.mrf.mxu3 }
 0x2cb   :  { %v1180_v56 = vadd.f32 %v1179_v49, %v1167_v43 }
 0x2cd   :  { %v2813_v0 = vadd.f32 %v2076_v59, %v1180_v56  ;;  %v2066_v59 = vld [vmem:[%s2899_s8] ss:$0 sm:$0xff] }
 0x2cf   :  { %v1216_v2 = vand.u32 4294901760, %v2813_v0 }
 0x2d0   :  { %v1168_v6 = vpop.f32.mrf.mxu2 }
 0x2d1   :  { %v1217_v30 = vsub.f32 %v2813_v0, %v1216_v2  ;;  %v1181_v42 = vpop.f32.mrf.mxu3  ;;  %1322 = vmatmul.f32.vlgmr.msra.gmra.mxu1 %v1216_v2  ;;  %v2067_v6 = vld [vmem:[%s2900_s9] ss:$0 sm:$0xff] }
 0x2d2   :  { %1724 = vmatpush.msra.mxu1 %v2224_v3 }
 0x2d3   :  { %1376 = vmatmul.f32.vlgmr.msra.gmra.mxu2 %v1217_v30  ;;  %v1218_v53 = vand.u32 4294901760, %v1217_v30 }
 0x2d4   :  { %1726 = vmatpush.msra.mxu1 %v2226_v4  ;;  %1765 = vmatpush.msra.mxu2 %v2260_v22  ;;  %v3014_v22 = vld [vmem:[#allocation14_spill] sm:$0xff] }
 0x2d5   :  { %1415 = vmatmul.f32.vlgmr.msra.gmra.mxu3 %v1218_v53  ;;  %v1219_v8 = vsub.f32 %v1217_v30, %v1218_v53 }
 0x2d6   :  { %1728 = vmatpush.msra.mxu1 %v2228_v5  ;;  %1832 = vmatpush.msra.mxu3 %v2224_v3  ;;  %v3010_v3 = vld [vmem:[#allocation16_spill] sm:$0xff] }
 0x2d7   :  { %v1220_v1 = vand.u32 4294901760, %v1219_v8  ;;  %1769 = vmatpush.msra.mxu2 %v2263_v23  ;;  %v3016_v23 = vld [vmem:[#allocation15_spill] sm:$0xff] }
 0x2d8   :  { %1730 = vmatpush.msra.mxu1 %v2230_v9  ;;  %1834 = vmatpush.msra.mxu3 %v2226_v4  ;;  %v3011_v4 = vld [vmem:[#allocation12_spill] sm:$0xff] }
 0x2d9   :  { %1221 = vmatmul.f32.vlgmr.msra.gmra.mxu0 %v1220_v1  ;;  %1521 = vmatmul.f32.vlgmr.msrb.gmra.mxu1 %v1216_v2 }
 0x2da   :  { %1671 = vmatpush.msra.mxu0 %v2994_v21  ;;  %1732 = vmatpush.msra.mxu1 %v2232_v10 }
 0x2db   :  { %1836 = vmatpush.msra.mxu3 %v2228_v5  ;;  %1773 = vmatpush.msra.mxu2 %v2266_v24  ;;  %v3012_v5 = vld [vmem:[#allocation13_spill] sm:$0xff]  ;;  %v3018_v24 = vld [vmem:[#allocation18_spill] sm:$0xff] }
 0x2dc   :  { %1674 = vmatpush.msra.mxu0 %v2995_v60  ;;  %1734 = vmatpush.msra.mxu1 %v2234_v11 }
 0x2dd   :  { %1838 = vmatpush.msra.mxu3 %v2230_v9  ;;  %1777 = vmatpush.msra.mxu2 %v2272_v27  ;;  %v3013_v9 = vld [vmem:[#allocation17_spill] sm:$0xff]  ;;  %v3020_v27 = vld [vmem:[#allocation20_spill] sm:$0xff] }
 0x2de   :  { %1677 = vmatpush.msra.mxu0 %v2996_v48  ;;  %1736 = vmatpush.msra.mxu1 %v2246_v17 }
 0x2df   :  { %1840 = vmatpush.msra.mxu3 %v2232_v10  ;;  %1781 = vmatpush.msra.mxu2 %v3010_v3  ;;  %v3015_v10 = vld [vmem:[#allocation19_spill] sm:$0xff] }
 0x2e0   :  { %1680 = vmatpush.msra.mxu0 %v3011_v4  ;;  %1738 = vmatpush.msra.mxu1 %v2268_v25 }
 0x2e1   :  { %1484 = vmatmul.f32.vlgmr.msrb.gmra.mxu0 %v1216_v2  ;;  %1842 = vmatpush.msra.mxu3 %v2234_v11  ;;  %v3017_v11 = vld [vmem:[#allocation21_spill] sm:$0xff] }
 0x2e2   :  { %1683 = vmatpush.msra.mxu0 %v3012_v5  ;;  %1740 = vmatpush.msra.mxu1 %v2274_v28 }
 0x2e3   :  { %1844 = vmatpush.msra.mxu3 %v2246_v17  ;;  %1785 = vmatpush.msra.mxu2 %v3013_v9  ;;  %v3019_v17 = vld [vmem:[#allocation23_spill] sm:$0xff] }
 0x2e4   :  { %1686 = vmatpush.msra.mxu0 %v3014_v22  ;;  %1742 = vmatpush.msra.mxu1 %v2294_v36 }
 0x2e5   :  { %1846 = vmatpush.msra.mxu3 %v2268_v25  ;;  %1789 = vmatpush.msra.mxu2 %v3015_v10  ;;  %v3021_v25 = vld [vmem:[#allocation25_spill] sm:$0xff] }
 0x2e6   :  { %1689 = vmatpush.msra.mxu0 %v3016_v23  ;;  %1744 = vmatpush.msra.mxu1 %v2318_v45 }
 0x2e7   :  { %1848 = vmatpush.msra.mxu3 %v2274_v28  ;;  %1793 = vmatpush.msra.mxu2 %v3017_v11  ;;  %v3023_v28 = vld [vmem:[#allocation29_spill] sm:$0xff] }
 0x2e8   :  { %1692 = vmatpush.msra.mxu0 %v3018_v24  ;;  %1746 = vmatpush.msra.mxu1 %v2334_v51 }
 0x2e9   :  { %1850 = vmatpush.msra.mxu3 %v2294_v36  ;;  %1797 = vmatpush.msra.mxu2 %v3019_v17  ;;  %v3024_v36 = vld [vmem:[#allocation30_spill] sm:$0xff] }
 0x2ea   :  { %1695 = vmatpush.msra.mxu0 %v3020_v27  ;;  %1748 = vmatpush.msra.mxu1 %v2341_v54 }
 0x2eb   :  { %1852 = vmatpush.msra.mxu3 %v2318_v45  ;;  %1801 = vmatpush.msra.mxu2 %v3021_v25  ;;  %v3025_v45 = vld [vmem:[#allocation32_spill] sm:$0xff] }
 0x2ec   :  { %1698 = vmatpush.msra.mxu0 %v3022_v31  ;;  %1750 = vmatpush.msra.mxu1 %v2366_v63 }
 0x2ed   :  { %1854 = vmatpush.msra.mxu3 %v2334_v51  ;;  %1805 = vmatpush.msra.mxu2 %v3023_v28  ;;  %v3026_v51 = vld [vmem:[#allocation34_spill] sm:$0xff] }
 0x2ee   :  { %1701 = vmatpush.msra.mxu0 %v3004_v46  ;;  %1752 = vmatpush.msra.mxu1 %v2390_v13 }
 0x2ef   :  { %1856 = vmatpush.msra.mxu3 %v2341_v54  ;;  %1809 = vmatpush.msra.mxu2 %v3024_v36  ;;  %v3027_v54 = vld [vmem:[#allocation36_spill] sm:$0xff] }
 0x2f0   :  { %1704 = vmatpush.msra.mxu0 %v3005_v12  ;;  %1754 = vmatpush.msra.mxu1 %v2395_v26 }
 0x2f1   :  { %1858 = vmatpush.msra.mxu3 %v2366_v63  ;;  %1813 = vmatpush.msra.mxu2 %v3025_v45 }
 0x2f2   :  { %1707 = vmatpush.msra.mxu0 %v3006_v61 }
 0x2f3   :  { %1860 = vmatpush.msra.mxu3 %v2390_v13  ;;  %1817 = vmatpush.msra.mxu2 %v3026_v51 }
 0x2f4   :  { %1710 = vmatpush.msra.mxu0 %v3007_v55 }
 0x2f5   :  { %1862 = vmatpush.msra.mxu3 %v2395_v26  ;;  %1821 = vmatpush.msra.mxu2 %v3027_v54 }
 0x2f6   :  { %1713 = vmatpush.msra.mxu0 %v3008_v47 }
 0x2f7   :  { %1825 = vmatpush.msra.mxu2 %v3028_v44 }
 0x2f8   :  { %1716 = vmatpush.msra.mxu0 %v3009_v62 }
 0x34e   :  { %v1323_v63 = vpop.f32.mrf.mxu1 }
 0x356   :  { %v1222_v16 = vpop.f32.mrf.mxu0  ;;  %v1377_v21 = vpop.f32.mrf.mxu2 }
 0x357   :  { %v1324_v7 = vadd.f32 %v1323_v63, %v1222_v16  ;;  %v1522_v50 = vpop.f32.mrf.mxu1 }
 0x358   :  { %v1416_v13 = vpop.f32.mrf.mxu3 }
 0x359   :  { %v1378_v60 = vadd.f32 %v1377_v21, %v1324_v7 }
 0x35b   :  { %v1417_v48 = vadd.f32 %v1416_v13, %v1378_v60 }
 0x35e   :  { %v1485_v12 = vpop.f32.mrf.mxu0 }
 0x35f   :  { %v1486_v34 = vadd.f32 %v1485_v12, %v1417_v48 }
 0x361   :  { %v1523_v35 = vadd.f32 %v1522_v50, %v1486_v34 }
 0x363   :  { %v1525_v26 = vsub.f32 %v2813_v0, %v1523_v35 }
 0x365   :  { %v1526_v29 = vmul.f32 %v1525_v26, %v1525_v26 }
 0x367   :  { %v1559_v46 = vand.u32 4294901760, %v1526_v29 }
 0x369   :  { %1665 = vmatmul.f32.vlgmr.msrb.gmra.mxu3 %v1559_v46  ;;  %v1560_v33 = vsub.f32 %v1526_v29, %v1559_v46 }
 0x36b   :  { %1719 = vmatmul.f32.vlgmr.msra.gmra.mxu0 %v1560_v33  ;;  %v1561_v41 = vand.u32 4294901760, %v1560_v33 }
 0x36d   :  { %1758 = vmatmul.f32.vlgmr.msra.gmra.mxu1 %v1561_v41  ;;  %v1562_v15 = vsub.f32 %v1560_v33, %v1561_v41 }
 0x36f   :  { %v1563_v14 = vand.u32 4294901760, %v1562_v15 }
 0x371   :  { %1564 = vmatmul.f32.vlgmr.msrb.gmra.mxu2 %v1563_v14  ;;  %1864 = vmatmul.f32.vlgmr.msra.gmra.mxu3 %v1559_v46 }
 0x379   :  { %1827 = vmatmul.f32.vlgmr.msra.gmra.mxu2 %v1559_v46 }
 0x3e8   :  { %v1720_v57 = vpop.f32.mrf.mxu0 }
 0x3ea   :  { %v1759_v55 = vpop.f32.mrf.mxu1 }
 0x3ec   :  { %v1666_v39 = vpop.f32.mrf.mxu3 }
 0x3f4   :  { %v1565_v61 = vpop.f32.mrf.mxu2  ;;  %v1865_v20 = vpop.f32.mrf.mxu3 }
 0x3f5   :  { %v1566_v58 = vadd.f32 1e-06, %v1565_v61 }
 0x3f7   :  { %v1667_v19 = vadd.f32 %v1666_v39, %v1566_v58 }
 0x3f9   :  { %v1721_v32 = vadd.f32 %v1720_v57, %v1667_v19 }
 0x3fb   :  { %v1760_v18 = vadd.f32 %v1759_v55, %v1721_v32 }
 0x3fc   :  { %v1828_v40 = vpop.f32.mrf.mxu2 }
 0x3fd   :  { %v1829_v47 = vadd.f32 %v1828_v40, %v1760_v18 }
 0x3ff   :  { %v1866_v52 = vadd.f32 %v1865_v20, %v1829_v47 }
 0x401   :  { %2074 = vrsqrt.f32 %v1866_v52  ;;  %vm1874_vm12 = vweird.f32 %v1866_v52 }
 0x407   :  { %v2075_v62 = vpop.eup %2074 }
 0x408   :  { %v1869_v37 = vmul.f32 %v2075_v62, %v1866_v52  ;;  %vm1875_vm11 = vweird.f32 %v2075_v62 }
 0x409   :  { %vm1876_vm13 = vmor %vm1874_vm12, %vm1875_vm11 }
 0x40a   :  { %v1870_v38 = vmul.f32 %v2075_v62, %v1869_v37 }
 0x40c   :  { %v1871_v43 = vmul.f32 0.5, %v1870_v38 }
 0x40e   :  { %v1872_v49 = vsub.f32 1.5, %v1871_v43 }
 0x410   :  { %v1873_v56 = vmul.f32 %v2075_v62, %v1872_v49 }
 0x412   :  { %v1877_v0 = vsel %vm1876_vm13, %v2075_v62, %v1873_v56 }
 0x413   :  { %v1878_v2 = vmul.f32 %v1877_v0, %v1525_v26 }
 0x415   :  { %v1882_v30 = vmul.f32 %v2066_v59, %v1878_v2 }
 0x417   :  { %v1886_v42 = vadd.f32 %v2067_v6, %v1882_v30 }
 0x419   :  { %1887 = vst [vmem:[%s2901_s10] sm:$0xff] %v1886_v42 }
 0x41a   :  { %1892 = vsyncpa [#allocation3], 1 }
 0x41b   :  { %1893 = vsyncpa [#allocation5], 1 }

// kernel: _pwff_call.1
= control target key start
LH: loop header
LB: loop body
LE: loop exit
PB: predicated region body
PF: predicated region fallthrough
CT: control target
= control target key end

     0   :  { %15 = vsyncpa [#allocation3], 0  ;;  %s2891_s0 = inlined_call_operand.vmem [shape: f32[8,128], index: 0, kind: input, shape index: {}]   ;;  %s2892_s1 = inlined_call_operand.hbm [shape: f32[128,128], index: 1, kind: input, shape index: {}]   ;;  %s2893_s2 = inlined_call_operand.hbm [shape: bf16[128,256], index: 2, kind: input, shape index: {}]   ;;  %s2894_s3 = inlined_call_operand.vmem [shape: f32[1,256], index: 3, kind: input, shape index: {}]   ;;  %s2895_s4 = inlined_call_operand.hbm [shape: bf16[256,128], index: 4, kind: input, shape index: {}]   ;;  %s2896_s5 = inlined_call_operand.vmem [shape: f32[1,128], index: 5, kind: input, shape index: {}]   ;;  %s2897_s6 = inlined_call_operand.vmem [shape: f32[1,128], index: 6, kind: input, shape index: {}]   ;;  %s2898_s7 = inlined_call_operand.vmem [shape: f32[1,128], index: 7, kind: input, shape index: {}]   ;;  %s2899_s8 = inlined_call_operand.vmem [shape: f32[1,128], index: 8, kind: input, shape index: {}]   ;;  %s2900_s9 = inlined_call_operand.vmem [shape: f32[1,128], index: 9, kind: input, shape index: {}]   ;;  %s2901_s10 = inlined_call_operand.vmem [shape: f32[8,128], index: 10, kind: output, shape index: {}]  }
   0x1   :  { %16 = vsyncpa [#allocation5], 0  ;;  %s36_s15 = sshll.u32 %s2893_s2, 4  ;;  %s2153_s16 = smov [#allocation4]   ;;  %s37_s15 = int_to_ptr.hbm [resolvable:$true] %s36_s15 }
   0x2   :  { %s38_s17 = sshll.u32 %s2153_s16, 4  ;;  %s23_s20 = sshll.u32 %s2892_s1, 4  ;;  %s39_s17 = int_to_ptr.vmem [resolvable:$true] %s38_s17  ;;  %s24_s20 = int_to_ptr.hbm [resolvable:$true] %s23_s20 }
   0x3   :  { %s2154_s21 = smov 128   ;;  %s2155_s22 = smov 8  }
   0x4   :  { %44 = dma.hbm_to_vmem [thread:$0]  %s37_s15, 2048, %s39_s17, [#allocation5], %s2154_s21, %s2154_s21, %s2155_s22  }
   0x5   :  { %s2156_s23 = smov [#allocation2]   ;;  %s51_s27 = sshll.u32 %s2895_s4, 4  ;;  %s52_s27 = int_to_ptr.hbm [resolvable:$true] %s51_s27 }
   0x6   :  { %s25_s24 = sshll.u32 %s2156_s23, 4  ;;  %s2157_s2 = smov [#allocation6]   ;;  %s26_s24 = int_to_ptr.vmem [resolvable:$true] %s25_s24 }
   0x7   :  { %31 = dma.hbm_to_vmem [thread:$0]  %s24_s20, 2048, %s26_s24, [#allocation3], %s2154_s21, %s2154_s21, %s2155_s22  }
   0x8   :  { %s53_s28 = sshll.u32 %s2157_s2, 4  ;;  %s2158_s29 = smov 64   ;;  %s54_s28 = int_to_ptr.vmem [resolvable:$true] %s53_s28 }
   0x9   :  { %s2159_s30 = smov 4  }
   0xa   :  { %59 = dma.hbm_to_vmem [thread:$0]  %s52_s27, 2048, %s54_s28, [#allocation5], %s2158_s29, %s2158_s29, %s2159_s30  }
   0xb   :  { %2149 = dma.done.wait [#allocation3], 2048  }
   0xc   :  { %2150 = vsyncadd [#allocation3], 4294965248 }
   0xd   :  { %2151 = dma.done.wait [#allocation5], 4096  }
   0xe   :  { %2152 = vsyncadd [#allocation5], 4294963200  ;;  %v97_v0 = vld [vmem:[#allocation2 + $0x78] sm:$0xff]  ;;  %v96_v1 = vld [vmem:[#allocation2 + $0x70] sm:$0xff] }
   0xf   :  { %v95_v2 = vld [vmem:[#allocation2 + $0x68] sm:$0xff]  ;;  %v2224_v3 = vand.u32 4294901760, %v97_v0  ;;  %v2226_v4 = vand.u32 4294901760, %v96_v1  ;;  %v94_v6 = vld [vmem:[#allocation2 + $0x60] sm:$0xff]  ;;  %v93_v7 = vld [vmem:[#allocation2 + $0x58] sm:$0xff] }
  0x10   :  { %v2228_v5 = vand.u32 4294901760, %v95_v2  ;;  %v92_v8 = vld [vmem:[#allocation2 + $0x50] sm:$0xff]  ;;  %v2230_v9 = vand.u32 4294901760, %v94_v6  ;;  %v2232_v10 = vand.u32 4294901760, %v93_v7  ;;  %v91_v12 = vld [vmem:[#allocation2 + $0x48] sm:$0xff]  ;;  %v90_v13 = vld [vmem:[#allocation2 + $0x40] sm:$0xff] }
  0x11   :  { %v2234_v11 = vand.u32 4294901760, %v92_v8  ;;  %106 = vmatpush.msra.mxu0 %v2224_v3  ;;  %v2238_v14 = vsub.f32 %v97_v0, %v2224_v3  ;;  %v2241_v15 = vsub.f32 %v96_v1, %v2226_v4  ;;  %v2246_v17 = vand.u32 4294901760, %v91_v12  ;;  %v89_v18 = vld [vmem:[#allocation2 + $0x38] sm:$0xff]  ;;  %302 = vmatpush.msra.mxu3 %v2224_v3  ;;  %v88_v26 = vld [vmem:[#allocation2 + $0x30] sm:$0xff]  ;;  %v87_v34 = vld [vmem:[#allocation2 + $0x28] sm:$0xff] }
  0x12   :  { %v2244_v16 = vsub.f32 %v95_v2, %v2228_v5  ;;  %v2250_v19 = vsub.f32 %v94_v6, %v2230_v9  ;;  %v2253_v20 = vsub.f32 %v93_v7, %v2232_v10  ;;  %v2268_v25 = vand.u32 4294901760, %v90_v13  ;;  %v86_v42 = vld [vmem:[#allocation2 + $0x20] sm:$0xff]  ;;  %v85_v47 = vld [vmem:[#allocation2 + $0x18] sm:$0xff]  ;;  %v84_v55 = vld [vmem:[#allocation2 + $0x10] sm:$0xff] }
  0x13   :  { %2952 = vst [vmem:[#allocation9_spill] sm:$0xff] %v2238_v14  ;;  %v2256_v21 = vsub.f32 %v92_v8, %v2234_v11  ;;  %108 = vmatpush.msra.mxu0 %v2226_v4  ;;  %v2260_v22 = vand.u32 4294901760, %v2238_v14  ;;  %v2263_v23 = vand.u32 4294901760, %v2241_v15  ;;  %249 = vmatpush.msra.mxu2 %v2238_v14  ;;  %v2274_v28 = vand.u32 4294901760, %v89_v18  ;;  %v83_v60 = vld [vmem:[#allocation2 + $0x8] sm:$0xff]  ;;  %v82_v1 = vld [vmem:[#allocation2] sm:$0xff] }
  0x14   :  { %2953 = vst [vmem:[#allocation10_spill] sm:$0xff] %v2241_v15  ;;  %v2266_v24 = vand.u32 4294901760, %v2244_v16  ;;  %v2272_v27 = vand.u32 4294901760, %v2250_v19  ;;  %v2277_v29 = vsub.f32 %v91_v12, %v2246_v17  ;;  %304 = vmatpush.msra.mxu3 %v2226_v4  ;;  %v2288_v33 = vand.u32 4294901760, %v2253_v20  ;;  %v2381_v7 = vld [vmem:[%s2891_s0] sm:$0xff] }
  0x15   :  { %2954 = vst [vmem:[#allocation11_spill] sm:$0xff] %v2244_v16  ;;  %110 = vmatpush.msra.mxu0 %v2228_v5  ;;  %v149_v30 = vsub.f32 %v2238_v14, %v2260_v22  ;;  %v155_v31 = vsub.f32 %v2241_v15, %v2263_v23  ;;  %252 = vmatpush.msra.mxu2 %v2241_v15  ;;  %v2292_v35 = vand.u32 4294901760, %v2256_v21  ;;  %v2294_v36 = vand.u32 4294901760, %v88_v26 }
  0x16   :  { %2955 = vst [vmem:[#allocation12_spill] sm:$0xff] %v2250_v19  ;;  %v161_v32 = vsub.f32 %v2244_v16, %v2266_v24  ;;  %306 = vmatpush.msra.mxu3 %v2228_v5  ;;  %v167_v39 = vsub.f32 %v2250_v19, %v2272_v27  ;;  %v2305_v40 = vsub.f32 %v90_v13, %v2268_v25  ;;  %v2309_v41 = vand.u32 4294901760, %v2277_v29 }
  0x17   :  { %2956 = vst [vmem:[#allocation13_spill] sm:$0xff] %v2253_v20  ;;  %v2297_v37 = vand.u32 4294901760, %v149_v30  ;;  %112 = vmatpush.msra.mxu0 %v2230_v9  ;;  %v2300_v38 = vand.u32 4294901760, %v155_v31  ;;  %255 = vmatpush.msra.mxu2 %v2244_v16  ;;  %v173_v44 = vsub.f32 %v2253_v20, %v2288_v33  ;;  %v2318_v45 = vand.u32 4294901760, %v87_v34 }
  0x18   :  { %2957 = vst [vmem:[#allocation14_spill] sm:$0xff] %v2256_v21  ;;  %308 = vmatpush.msra.mxu3 %v2230_v9  ;;  %v2314_v43 = vand.u32 4294901760, %v161_v32  ;;  %v2321_v46 = vsub.f32 %v89_v18, %v2274_v28  ;;  %v179_v48 = vsub.f32 %v2256_v21, %v2292_v35  ;;  %v2329_v49 = vand.u32 4294901760, %v167_v39 }
  0x19   :  { %2958 = vst [vmem:[#allocation15_spill] sm:$0xff] %v2277_v29  ;;  %151 = vmatpush.msra.mxu1 %v2297_v37  ;;  %114 = vmatpush.msra.mxu0 %v2232_v10  ;;  %v2332_v50 = vand.u32 4294901760, %v2305_v40  ;;  %v2334_v51 = vand.u32 4294901760, %v86_v42  ;;  %v2337_v52 = vsub.f32 %v88_v26, %v2294_v36  ;;  %v185_v53 = vsub.f32 %v2277_v29, %v2309_v41 }
  0x1a   :  { %2959 = vst [vmem:[#allocation16_spill] sm:$0xff] %v2288_v33  ;;  %258 = vmatpush.msra.mxu2 %v2250_v19  ;;  %310 = vmatpush.msra.mxu3 %v2232_v10  ;;  %v2341_v54 = vand.u32 4294901760, %v85_v47  ;;  %v2347_v56 = vand.u32 4294901760, %v173_v44  ;;  %v2350_v57 = vand.u32 4294901760, %v2321_v46  ;;  %v2353_v58 = vsub.f32 %v87_v34, %v2318_v45 }
  0x1b   :  { %2960 = vst [vmem:[#allocation17_spill] sm:$0xff] %v2292_v35  ;;  %157 = vmatpush.msra.mxu1 %v2300_v38  ;;  %116 = vmatpush.msra.mxu0 %v2234_v11  ;;  %v2355_v59 = vand.u32 4294901760, %v179_v48  ;;  %v191_v61 = vsub.f32 %v2305_v40, %v2332_v50  ;;  %v2364_v62 = vand.u32 4294901760, %v2337_v52  ;;  %v2366_v63 = vand.u32 4294901760, %v84_v55 }
  0x1c   :  { %2961 = vst [vmem:[#allocation18_spill] sm:$0xff] %v2305_v40  ;;  %261 = vmatpush.msra.mxu2 %v2253_v20  ;;  %312 = vmatpush.msra.mxu3 %v2234_v11  ;;  %v2369_v0 = vsub.f32 %v86_v42, %v2334_v51  ;;  %v2371_v2 = vand.u32 4294901760, %v185_v53  ;;  %v2374_v6 = vsub.f32 %v85_v47, %v2341_v54  ;;  %v2388_v12 = vand.u32 4294901760, %v2353_v58 }
  0x1d   :  { %2962 = vst [vmem:[#allocation19_spill] sm:$0xff] %v2309_v41  ;;  %163 = vmatpush.msra.mxu1 %v2314_v43  ;;  %118 = vmatpush.msra.mxu0 %v2246_v17  ;;  %v197_v8 = vsub.f32 %v2321_v46, %v2350_v57  ;;  %v2390_v13 = vand.u32 4294901760, %v83_v60  ;;  %v2393_v18 = vand.u32 4294901760, %v2381_v7  ;;  %v2395_v26 = vand.u32 4294901760, %v82_v1 }
  0x1e   :  { %2963 = vst [vmem:[#allocation20_spill] sm:$0xff] %v2321_v46  ;;  %264 = vmatpush.msra.mxu2 %v2256_v21  ;;  %314 = vmatpush.msra.mxu3 %v2246_v17  ;;  %v2401_v30 = vand.u32 4294901760, %v191_v61  ;;  %v203_v31 = vsub.f32 %v2337_v52, %v2364_v62  ;;  %v2406_v32 = vand.u32 4294901760, %v2369_v0  ;;  %v2409_v34 = vsub.f32 %v84_v55, %v2366_v63 }
  0x1f   :  { %2964 = vst [vmem:[#allocation21_spill] sm:$0xff] %v2332_v50  ;;  %169 = vmatpush.msra.mxu1 %v2329_v49  ;;  %120 = vmatpush.msra.mxu0 %v2268_v25  ;;  %v2412_v39 = vand.u32 4294901760, %v2374_v6  ;;  %v2418_v42 = vand.u32 4294901760, %v197_v8  ;;  %v209_v44 = vsub.f32 %v2353_v58, %v2388_v12  ;;  %v2423_v47 = vsub.f32 %v83_v60, %v2390_v13 }
  0x20   :  { %2965 = vst [vmem:[#allocation22_spill] sm:$0xff] %v2337_v52  ;;  %267 = vmatpush.msra.mxu2 %v2277_v29  ;;  %316 = vmatpush.msra.mxu3 %v2268_v25  ;;  %v138_v48 = vsub.f32 %v2381_v7, %v2393_v18  ;;  %v2431_v53 = vand.u32 4294901760, %v203_v31  ;;  %v215_v55 = vsub.f32 %v2369_v0, %v2406_v32  ;;  %v2436_v61 = vand.u32 4294901760, %v2409_v34 }
  0x21   :  { %2966 = vst [vmem:[#allocation23_spill] sm:$0xff] %v2350_v57  ;;  %175 = vmatpush.msra.mxu1 %v2347_v56  ;;  %122 = vmatpush.msra.mxu0 %v2274_v28  ;;  %v2439_v60 = vsub.f32 %v82_v1, %v2395_v26  ;;  %v2445_v8 = vand.u32 4294901760, %v209_v44  ;;  %v221_v31 = vsub.f32 %v2374_v6, %v2412_v39 }
  0x22   :  { %2967 = vst [vmem:[#allocation24_spill] sm:$0xff] %v2353_v58  ;;  %270 = vmatpush.msra.mxu2 %v2305_v40  ;;  %318 = vmatpush.msra.mxu3 %v2274_v28  ;;  %v2456_v1 = vand.u32 4294901760, %v215_v55  ;;  %v227_v44 = vsub.f32 %v2409_v34, %v2436_v61 }
  0x23   :  { %2968 = vst [vmem:[#allocation25_spill] sm:$0xff] %v2364_v62  ;;  %181 = vmatpush.msra.mxu1 %v2355_v59  ;;  %124 = vmatpush.msra.mxu0 %v2294_v36 }
  0x24   :  { %2969 = vst [vmem:[#allocation26_spill] sm:$0xff] %v2369_v0  ;;  %273 = vmatpush.msra.mxu2 %v2321_v46  ;;  %320 = vmatpush.msra.mxu3 %v2294_v36 }
  0x25   :  { %2970 = vst [vmem:[#allocation27_spill] sm:$0xff] %v2374_v6  ;;  %187 = vmatpush.msra.mxu1 %v2371_v2  ;;  %126 = vmatpush.msra.mxu0 %v2318_v45 }
  0x26   :  { %2971 = vst [vmem:[#allocation28_spill] sm:$0xff] %v2381_v7  ;;  %276 = vmatpush.msra.mxu2 %v2337_v52  ;;  %322 = vmatpush.msra.mxu3 %v2318_v45  ;;  %v2450_v7 = vand.u32 4294901760, %v2423_v47  ;;  %v139_v52 = vand.u32 4294901760, %v138_v48 }
  0x27   :  { %2972 = vst [vmem:[#allocation29_spill] sm:$0xff] %v2388_v12  ;;  %193 = vmatpush.msra.mxu1 %v2401_v30  ;;  %128 = vmatpush.msra.mxu0 %v2334_v51 }
  0x28   :  { %2973 = vst [vmem:[#allocation30_spill] sm:$0xff] %v2406_v32  ;;  %279 = vmatpush.msra.mxu2 %v2353_v58  ;;  %324 = vmatpush.msra.mxu3 %v2334_v51  ;;  %v2461_v58 = vand.u32 4294901760, %v2439_v60  ;;  %v233_v55 = vsub.f32 %v2423_v47, %v2450_v7  ;;  %v140_v46 = vsub.f32 %v138_v48, %v139_v52 }
  0x29   :  { %2974 = vst [vmem:[#allocation31_spill] sm:$0xff] %v2409_v34  ;;  %199 = vmatpush.msra.mxu1 %v2418_v42  ;;  %130 = vmatpush.msra.mxu0 %v2341_v54 }
  0x2a   :  { %2975 = vst [vmem:[#allocation32_spill] sm:$0xff] %v2412_v39  ;;  %282 = vmatpush.msra.mxu2 %v2369_v0  ;;  %326 = vmatpush.msra.mxu3 %v2341_v54  ;;  %v2467_v0 = vand.u32 4294901760, %v221_v31  ;;  %v239_v40 = vsub.f32 %v2439_v60, %v2461_v58  ;;  %v2482_v31 = vand.u32 4294901760, %v233_v55 }
  0x2b   :  { %2976 = vst [vmem:[#allocation33_spill] sm:$0xff] %v2423_v47  ;;  %205 = vmatpush.msra.mxu1 %v2431_v53  ;;  %132 = vmatpush.msra.mxu0 %v2366_v63 }
  0x2c   :  { %2977 = vst [vmem:[#allocation34_spill] sm:$0xff] %v2436_v61  ;;  %285 = vmatpush.msra.mxu2 %v2374_v6  ;;  %328 = vmatpush.msra.mxu3 %v2366_v63  ;;  %v2475_v6 = vand.u32 4294901760, %v227_v44  ;;  %v2488_v44 = vand.u32 4294901760, %v239_v40  ;;  %v2981_v40 = vld [vmem:[#allocation18_spill] sm:$0xff] }
  0x2d   :  { %2978 = vst [vmem:[#allocation35_spill] sm:$0xff] %v2439_v60  ;;  %211 = vmatpush.msra.mxu1 %v2445_v8  ;;  %134 = vmatpush.msra.mxu0 %v2390_v13 }
  0x2e   :  { %2979 = vst [vmem:[#allocation36_spill] sm:$0xff] %v2450_v7  ;;  %288 = vmatpush.msra.mxu2 %v2409_v34  ;;  %330 = vmatpush.msra.mxu3 %v2390_v13  ;;  %v141_v34 = vand.u32 4294901760, %v140_v46  ;;  %v2982_v46 = vld [vmem:[#allocation20_spill] sm:$0xff] }
  0x2f   :  { %2980 = vst [vmem:[#allocation37_spill] sm:$0xff] %v2461_v58  ;;  %217 = vmatpush.msra.mxu1 %v2456_v1  ;;  %136 = vmatpush.msra.mxu0 %v2395_v26 }
  0x30   :  { %291 = vmatpush.msra.mxu2 %v2423_v47  ;;  %332 = vmatpush.msra.mxu3 %v2395_v26  ;;  %v2987_v55 = vld [vmem:[#allocation31_spill] sm:$0xff] }
  0x31   :  { %343 = vmatpush.msrb.mxu0 %v2260_v22  ;;  %223 = vmatpush.msra.mxu1 %v2467_v0 }
  0x32   :  { %294 = vmatpush.msra.mxu2 %v2439_v60  ;;  %336 = vmatmul.f32.vlgmr.msra.gmra.mxu3 %v139_v52  ;;  %v2983_v52 = vld [vmem:[#allocation22_spill] sm:$0xff] }
  0x33   :  { %347 = vmatpush.msrb.mxu0 %v2263_v23  ;;  %229 = vmatpush.msra.mxu1 %v2475_v6 }
  0x34   :  { %297 = vmatmul.f32.vlgmr.msra.gmra.mxu2 %v138_v48  ;;  %142 = vmatmul.f32.vlgmr.msra.gmra.mxu0 %v141_v34  ;;  %v2985_v34 = vld [vmem:[#allocation26_spill] sm:$0xff]  ;;  %v2986_v48 = vld [vmem:[#allocation27_spill] sm:$0xff] }
  0x35   :  { %351 = vmatpush.msrb.mxu0 %v2266_v24  ;;  %235 = vmatpush.msra.mxu1 %v2482_v31 }
  0x36   :  { %494 = vmatpush.msrb.mxu3 %v2297_v37  ;;  %449 = vmatpush.msrb.mxu2 %v2224_v3 }
  0x37   :  { %355 = vmatpush.msrb.mxu0 %v2272_v27  ;;  %241 = vmatpush.msra.mxu1 %v2488_v44 }
  0x38   :  { %243 = vmatmul.f32.vlgmr.msra.gmra.mxu1 %v2393_v18  ;;  %500 = vmatpush.msrb.mxu3 %v2300_v38 }
  0x39   :  { %410 = vmatpush.msrb.mxu1 %v2224_v3  ;;  %359 = vmatpush.msrb.mxu0 %v2288_v33 }
  0x3a   :  { %506 = vmatpush.msrb.mxu3 %v2314_v43  ;;  %451 = vmatpush.msrb.mxu2 %v2226_v4 }
  0x3b   :  { %412 = vmatpush.msrb.mxu1 %v2226_v4  ;;  %363 = vmatpush.msrb.mxu0 %v2292_v35 }
  0x3c   :  { %512 = vmatpush.msrb.mxu3 %v2329_v49  ;;  %453 = vmatpush.msrb.mxu2 %v2228_v5 }
  0x3d   :  { %414 = vmatpush.msrb.mxu1 %v2228_v5  ;;  %367 = vmatpush.msrb.mxu0 %v2309_v41 }
  0x3e   :  { %518 = vmatpush.msrb.mxu3 %v2347_v56  ;;  %455 = vmatpush.msrb.mxu2 %v2230_v9 }
  0x3f   :  { %416 = vmatpush.msrb.mxu1 %v2230_v9  ;;  %371 = vmatpush.msrb.mxu0 %v2332_v50 }
  0x40   :  { %524 = vmatpush.msrb.mxu3 %v2355_v59  ;;  %457 = vmatpush.msrb.mxu2 %v2232_v10 }
  0x41   :  { %418 = vmatpush.msrb.mxu1 %v2232_v10  ;;  %375 = vmatpush.msrb.mxu0 %v2350_v57 }
  0x42   :  { %530 = vmatpush.msrb.mxu3 %v2371_v2  ;;  %459 = vmatpush.msrb.mxu2 %v2234_v11 }
  0x43   :  { %420 = vmatpush.msrb.mxu1 %v2234_v11  ;;  %379 = vmatpush.msrb.mxu0 %v2364_v62 }
  0x44   :  { %536 = vmatpush.msrb.mxu3 %v2401_v30  ;;  %461 = vmatpush.msrb.mxu2 %v2246_v17 }
  0x45   :  { %422 = vmatpush.msrb.mxu1 %v2246_v17  ;;  %383 = vmatpush.msrb.mxu0 %v2388_v12 }
  0x46   :  { %542 = vmatpush.msrb.mxu3 %v2418_v42  ;;  %463 = vmatpush.msrb.mxu2 %v2268_v25 }
  0x47   :  { %424 = vmatpush.msrb.mxu1 %v2268_v25  ;;  %387 = vmatpush.msrb.mxu0 %v2406_v32 }
  0x48   :  { %548 = vmatpush.msrb.mxu3 %v2431_v53  ;;  %465 = vmatpush.msrb.mxu2 %v2274_v28 }
  0x49   :  { %426 = vmatpush.msrb.mxu1 %v2274_v28  ;;  %391 = vmatpush.msrb.mxu0 %v2412_v39 }
  0x4a   :  { %554 = vmatpush.msrb.mxu3 %v2445_v8  ;;  %467 = vmatpush.msrb.mxu2 %v2294_v36 }
  0x4b   :  { %428 = vmatpush.msrb.mxu1 %v2294_v36  ;;  %395 = vmatpush.msrb.mxu0 %v2436_v61 }
  0x4c   :  { %560 = vmatpush.msrb.mxu3 %v2456_v1  ;;  %469 = vmatpush.msrb.mxu2 %v2318_v45 }
  0x4d   :  { %430 = vmatpush.msrb.mxu1 %v2318_v45  ;;  %399 = vmatpush.msrb.mxu0 %v2450_v7 }
  0x4e   :  { %566 = vmatpush.msrb.mxu3 %v2467_v0  ;;  %471 = vmatpush.msrb.mxu2 %v2334_v51 }
  0x4f   :  { %432 = vmatpush.msrb.mxu1 %v2334_v51  ;;  %403 = vmatpush.msrb.mxu0 %v2461_v58 }
  0x50   :  { %405 = vmatmul.f32.vlgmr.msrb.gmra.mxu0 %v2393_v18  ;;  %572 = vmatpush.msrb.mxu3 %v2475_v6 }
  0x51   :  { %434 = vmatpush.msrb.mxu1 %v2341_v54  ;;  %592 = vmatpush.msra.mxu0 %v2238_v14 }
  0x52   :  { %578 = vmatpush.msrb.mxu3 %v2482_v31  ;;  %473 = vmatpush.msrb.mxu2 %v2341_v54 }
  0x53   :  { %436 = vmatpush.msrb.mxu1 %v2366_v63  ;;  %595 = vmatpush.msra.mxu0 %v2241_v15 }
  0x54   :  { %584 = vmatpush.msrb.mxu3 %v2488_v44  ;;  %475 = vmatpush.msrb.mxu2 %v2366_v63 }
  0x55   :  { %438 = vmatpush.msrb.mxu1 %v2390_v13  ;;  %598 = vmatpush.msra.mxu0 %v2244_v16 }
  0x56   :  { %753 = vmatpush.msra.mxu3 %v2224_v3  ;;  %477 = vmatpush.msrb.mxu2 %v2390_v13 }
  0x57   :  { %440 = vmatpush.msrb.mxu1 %v2395_v26  ;;  %601 = vmatpush.msra.mxu0 %v2250_v19 }
  0x58   :  { %442 = vmatmul.f32.vlgmr.msrb.gmra.mxu1 %v2393_v18  ;;  %755 = vmatpush.msra.mxu3 %v2226_v4  ;;  %v2984_v18 = vld [vmem:[#allocation24_spill] sm:$0xff] }
  0x59   :  { %645 = vmatpush.msra.mxu1 %v2224_v3  ;;  %604 = vmatpush.msra.mxu0 %v2253_v20  ;;  %v2988_v20 = vld [vmem:[#allocation28_spill] sm:$0xff] }
  0x5a   :  { %757 = vmatpush.msra.mxu3 %v2228_v5  ;;  %479 = vmatpush.msrb.mxu2 %v2395_v26 }
  0x5b   :  { %647 = vmatpush.msra.mxu1 %v2226_v4  ;;  %607 = vmatpush.msra.mxu0 %v2256_v21 }
  0x5c   :  { %759 = vmatpush.msra.mxu3 %v2230_v9  ;;  %686 = vmatpush.msra.mxu2 %v2260_v22 }
  0x5d   :  { %649 = vmatpush.msra.mxu1 %v2228_v5  ;;  %610 = vmatpush.msra.mxu0 %v2277_v29 }
  0x5e   :  { %761 = vmatpush.msra.mxu3 %v2232_v10  ;;  %690 = vmatpush.msra.mxu2 %v2263_v23 }
  0x5f   :  { %651 = vmatpush.msra.mxu1 %v2230_v9  ;;  %613 = vmatpush.msra.mxu0 %v2981_v40 }
  0x60   :  { %763 = vmatpush.msra.mxu3 %v2234_v11  ;;  %694 = vmatpush.msra.mxu2 %v2266_v24 }
  0x61   :  { %653 = vmatpush.msra.mxu1 %v2232_v10  ;;  %616 = vmatpush.msra.mxu0 %v2982_v46 }
  0x62   :  { %765 = vmatpush.msra.mxu3 %v2246_v17  ;;  %698 = vmatpush.msra.mxu2 %v2272_v27 }
  0x63   :  { %655 = vmatpush.msra.mxu1 %v2234_v11  ;;  %619 = vmatpush.msra.mxu0 %v2983_v52 }
  0x64   :  { %767 = vmatpush.msra.mxu3 %v2268_v25  ;;  %702 = vmatpush.msra.mxu2 %v2288_v33 }
  0x65   :  { %657 = vmatpush.msra.mxu1 %v2246_v17  ;;  %622 = vmatpush.msra.mxu0 %v2984_v18 }
  0x66   :  { %769 = vmatpush.msra.mxu3 %v2274_v28  ;;  %706 = vmatpush.msra.mxu2 %v2292_v35 }
  0x67   :  { %659 = vmatpush.msra.mxu1 %v2268_v25  ;;  %625 = vmatpush.msra.mxu0 %v2985_v34 }
  0x68   :  { %771 = vmatpush.msra.mxu3 %v2294_v36  ;;  %710 = vmatpush.msra.mxu2 %v2309_v41 }
  0x69   :  { %661 = vmatpush.msra.mxu1 %v2274_v28  ;;  %628 = vmatpush.msra.mxu0 %v2986_v48 }
  0x6a   :  { %773 = vmatpush.msra.mxu3 %v2318_v45  ;;  %714 = vmatpush.msra.mxu2 %v2332_v50 }
  0x6b   :  { %663 = vmatpush.msra.mxu1 %v2294_v36  ;;  %631 = vmatpush.msra.mxu0 %v2987_v55 }
  0x6c   :  { %775 = vmatpush.msra.mxu3 %v2334_v51  ;;  %718 = vmatpush.msra.mxu2 %v2350_v57 }
  0x6d   :  { %665 = vmatpush.msra.mxu1 %v2318_v45  ;;  %634 = vmatpush.msra.mxu0 %v2423_v47 }
  0x6e   :  { %777 = vmatpush.msra.mxu3 %v2341_v54  ;;  %722 = vmatpush.msra.mxu2 %v2364_v62 }
  0x6f   :  { %667 = vmatpush.msra.mxu1 %v2334_v51  ;;  %637 = vmatpush.msra.mxu0 %v2439_v60 }
  0x70   :  { %779 = vmatpush.msra.mxu3 %v2366_v63  ;;  %726 = vmatpush.msra.mxu2 %v2388_v12 }
  0x71   :  { %669 = vmatpush.msra.mxu1 %v2341_v54 }
  0x72   :  { %781 = vmatpush.msra.mxu3 %v2390_v13  ;;  %730 = vmatpush.msra.mxu2 %v2406_v32 }
  0x73   :  { %671 = vmatpush.msra.mxu1 %v2366_v63 }
  0x74   :  { %783 = vmatpush.msra.mxu3 %v2395_v26  ;;  %734 = vmatpush.msra.mxu2 %v2412_v39  ;;  %v1896_v39 = vld [vmem:[#allocation4] sm:$0xf] }
  0x75   :  { %673 = vmatpush.msra.mxu1 %v2390_v13 }
  0x76   :  { %738 = vmatpush.msra.mxu2 %v2436_v61 }
  0x77   :  { %675 = vmatpush.msra.mxu1 %v2395_v26 }
  0x78   :  { %742 = vmatpush.msra.mxu2 %v2450_v7 }
  0x7a   :  { %746 = vmatpush.msra.mxu2 %v2461_v58 }
  0xb1   :  { %v143_v47 = vpop.f32.mrf.mxu0 }
  0xb5   :  { %v244_v60 = vpop.f32.mrf.mxu1  ;;  %v337_v18 = vpop.f32.mrf.mxu3 }
  0xb6   :  { %v245_v55 = vadd.f32 %v244_v60, %v143_v47 }
  0xb7   :  { %v298_v48 = vpop.f32.mrf.mxu2 }
  0xb8   :  { %v299_v34 = vadd.f32 %v298_v48, %v245_v55  ;;  %v1946_v55 = vld [vmem:[#allocation4 + $0x68] sm:$0xf0] }
  0xba   :  { %v338_v52 = vadd.f32 %v337_v18, %v299_v34  ;;  %v1944_v18 = vld [vmem:[#allocation4 + $0x60] sm:$0xf]  ;;  %v2037_v34 = vld [vmem:[#allocation4 + $0x64] sm:$0xf0] }
  0xbb   :  { %v1945_v48 = vor.u32 %v2037_v34, %v1944_v18  ;;  %v1920_v18 = vld [vmem:[#allocation4 + $0x30] sm:$0xf]  ;;  %v2031_v34 = vld [vmem:[#allocation4 + $0x34] sm:$0xf0] }
  0xcd   :  { %v406_v46 = vpop.f32.mrf.mxu0 }
  0xce   :  { %v407_v40 = vadd.f32 %v406_v46, %v338_v52  ;;  %v1952_v46 = vld [vmem:[#allocation4 + $0x70] sm:$0xf]  ;;  %v2039_v52 = vld [vmem:[#allocation4 + $0x74] sm:$0xf0] }
  0xd5   :  { %v443_v29 = vpop.f32.mrf.mxu1 }
  0xd6   :  { %v444_v21 = vadd.f32 %v443_v29, %v407_v40  ;;  %v2038_v29 = vld [vmem:[#allocation4 + $0x74] sm:$0xf]  ;;  %v1953_v40 = vor.u32 %v2039_v52, %v1952_v46  ;;  %v1928_v46 = vld [vmem:[#allocation4 + $0x40] sm:$0xf]  ;;  %v2033_v52 = vld [vmem:[#allocation4 + $0x44] sm:$0xf0] }
  0xd8   :  { %v2622_v19 = vsub.f32 %v2988_v20, %v444_v21  ;;  %v1954_v20 = vld [vmem:[#allocation4 + $0x78] sm:$0xf0]  ;;  %910 = vmatpush.bf16.msrb.mxu0 %v1953_v40  ;;  %v1929_v40 = vor.u32 %v2033_v52, %v1928_v46  ;;  %v1904_v46 = vld [vmem:[#allocation4 + $0x10] sm:$0xf]  ;;  %v2027_v52 = vld [vmem:[#allocation4 + $0x14] sm:$0xf0] }
  0xd9   :  { %v1957_v21 = vor.u32 %v2038_v29, %v1954_v20  ;;  %v2032_v29 = vld [vmem:[#allocation4 + $0x44] sm:$0xf]  ;;  %v1930_v20 = vld [vmem:[#allocation4 + $0x48] sm:$0xf0] }
  0xda   :  { %v447_v16 = vmul.f32 %v2622_v19, %v2622_v19 }
  0xdb   :  { %923 = vmatpush.bf16.msrb.mxu1 %v1957_v21  ;;  %v1933_v21 = vor.u32 %v2032_v29, %v1930_v20  ;;  %v2026_v29 = vld [vmem:[#allocation4 + $0x14] sm:$0xf]  ;;  %v1906_v20 = vld [vmem:[#allocation4 + $0x18] sm:$0xf0] }
  0xdc   :  { %v480_v15 = vand.u32 4294901760, %v447_v16  ;;  %911 = vmatpush.bf16.msrb.mxu0 %v1945_v48  ;;  %v1922_v48 = vld [vmem:[#allocation4 + $0x38] sm:$0xf0] }
  0xde   :  { %v481_v14 = vsub.f32 %v447_v16, %v480_v15  ;;  %586 = vmatmul.f32.vlgmr.msrb.gmra.mxu3 %v480_v15  ;;  %v2036_v16 = vld [vmem:[#allocation4 + $0x64] sm:$0xf] }
  0xdf   :  { %v1949_v7 = vor.u32 %v2036_v16, %v1946_v55  ;;  %v2030_v16 = vld [vmem:[#allocation4 + $0x34] sm:$0xf] }
  0xe0   :  { %640 = vmatmul.f32.vlgmr.msra.gmra.mxu0 %v481_v14  ;;  %v482_v58 = vand.u32 4294901760, %v481_v14  ;;  %v1925_v55 = vor.u32 %v2030_v16, %v1922_v48 }
  0xe1   :  { %924 = vmatpush.bf16.msrb.mxu1 %v1949_v7  ;;  %v1921_v7 = vor.u32 %v2031_v34, %v1920_v18  ;;  %v2025_v18 = vld [vmem:[#allocation4 + $0x4] sm:$0xf0]  ;;  %v2024_v34 = vld [vmem:[#allocation4 + $0x4] sm:$0xf] }
  0xe2   :  { %679 = vmatmul.f32.vlgmr.msra.gmra.mxu1 %v482_v58  ;;  %v483_v47 = vsub.f32 %v481_v14, %v482_v58  ;;  %v1936_v14 = vld [vmem:[#allocation4 + $0x50] sm:$0xf]  ;;  %v2035_v58 = vld [vmem:[#allocation4 + $0x54] sm:$0xf0]  ;;  %v1897_v48 = vor.u32 %v2025_v18, %v1896_v39 }
  0xe4   :  { %v484_v60 = vand.u32 4294901760, %v483_v47  ;;  %v2034_v47 = vld [vmem:[#allocation4 + $0x54] sm:$0xf] }
  0xe6   :  { %485 = vmatmul.f32.vlgmr.msrb.gmra.mxu2 %v484_v60  ;;  %785 = vmatmul.f32.vlgmr.msra.gmra.mxu3 %v480_v15  ;;  %v1938_v60 = vld [vmem:[#allocation4 + $0x58] sm:$0xf0] }
  0xe7   :  { %v1941_v61 = vor.u32 %v2034_v47, %v1938_v60  ;;  %v2028_v47 = vld [vmem:[#allocation4 + $0x24] sm:$0xf] }
  0xe9   :  { %925 = vmatpush.bf16.msrb.mxu1 %v1941_v61 }
  0xed   :  { %926 = vmatpush.bf16.msrb.mxu1 %v1933_v21  ;;  %v1909_v21 = vor.u32 %v2026_v29, %v1906_v20 }
  0xee   :  { %748 = vmatmul.f32.vlgmr.msra.gmra.mxu2 %v480_v15  ;;  %v1937_v15 = vor.u32 %v2035_v58, %v1936_v14  ;;  %v1912_v14 = vld [vmem:[#allocation4 + $0x20] sm:$0xf]  ;;  %v2029_v58 = vld [vmem:[#allocation4 + $0x24] sm:$0xf0] }
  0xef   :  { %v1913_v61 = vor.u32 %v2029_v58, %v1912_v14 }
  0xf0   :  { %912 = vmatpush.bf16.msrb.mxu0 %v1937_v15  ;;  %v1914_v15 = vld [vmem:[#allocation4 + $0x28] sm:$0xf0] }
  0xf1   :  { %927 = vmatpush.bf16.msrb.mxu1 %v1925_v55  ;;  %v1917_v60 = vor.u32 %v2028_v47, %v1914_v15  ;;  %v1898_v55 = vld [vmem:[#allocation4 + $0x8] sm:$0xf0] }
  0xf2   :  { %v1901_v14 = vor.u32 %v2024_v34, %v1898_v55  ;;  %v2064_v55 = vld [vmem:[%s2898_s7] ss:$0 sm:$0xff] }
  0xf4   :  { %913 = vmatpush.bf16.msrb.mxu0 %v1929_v40  ;;  %v1905_v40 = vor.u32 %v2027_v52, %v1904_v46 }
  0xf5   :  { %928 = vmatpush.bf16.msrb.mxu1 %v1917_v60 }
  0xf8   :  { %914 = vmatpush.bf16.msrb.mxu0 %v1921_v7 }
  0xf9   :  { %929 = vmatpush.bf16.msrb.mxu1 %v1909_v21 }
  0xfc   :  { %915 = vmatpush.bf16.msrb.mxu0 %v1913_v61 }
  0xfd   :  { %930 = vmatpush.bf16.msrb.mxu1 %v1901_v14 }
 0x100   :  { %916 = vmatpush.bf16.msrb.mxu0 %v1905_v40 }
 0x101   :  { %1230 = vmatpush.msra.mxu1 %v2297_v37 }
 0x103   :  { %1236 = vmatpush.msra.mxu1 %v2300_v38 }
 0x104   :  { %917 = vmatpush.bf16.msrb.mxu0 %v1897_v48 }
 0x105   :  { %1242 = vmatpush.msra.mxu1 %v2314_v43 }
 0x107   :  { %1248 = vmatpush.msra.mxu1 %v2329_v49 }
 0x108   :  { %1185 = vmatpush.msra.mxu0 %v2224_v3 }
 0x109   :  { %1254 = vmatpush.msra.mxu1 %v2347_v56 }
 0x10a   :  { %1187 = vmatpush.msra.mxu0 %v2226_v4 }
 0x10b   :  { %1260 = vmatpush.msra.mxu1 %v2355_v59 }
 0x10c   :  { %1189 = vmatpush.msra.mxu0 %v2228_v5 }
 0x10d   :  { %1266 = vmatpush.msra.mxu1 %v2371_v2 }
 0x10e   :  { %1191 = vmatpush.msra.mxu0 %v2230_v9 }
 0x10f   :  { %1272 = vmatpush.msra.mxu1 %v2401_v30 }
 0x110   :  { %1193 = vmatpush.msra.mxu0 %v2232_v10 }
 0x111   :  { %1278 = vmatpush.msra.mxu1 %v2418_v42 }
 0x112   :  { %1195 = vmatpush.msra.mxu0 %v2234_v11 }
 0x113   :  { %1284 = vmatpush.msra.mxu1 %v2431_v53 }
 0x114   :  { %1197 = vmatpush.msra.mxu0 %v2246_v17 }
 0x115   :  { %1290 = vmatpush.msra.mxu1 %v2445_v8 }
 0x116   :  { %1199 = vmatpush.msra.mxu0 %v2268_v25 }
 0x117   :  { %1296 = vmatpush.msra.mxu1 %v2456_v1 }
 0x118   :  { %1201 = vmatpush.msra.mxu0 %v2274_v28 }
 0x119   :  { %1302 = vmatpush.msra.mxu1 %v2467_v0 }
 0x11a   :  { %1203 = vmatpush.msra.mxu0 %v2294_v36 }
 0x11b   :  { %1308 = vmatpush.msra.mxu1 %v2475_v6 }
 0x11c   :  { %1205 = vmatpush.msra.mxu0 %v2318_v45 }
 0x11d   :  { %1314 = vmatpush.msra.mxu1 %v2482_v31 }
 0x11e   :  { %1207 = vmatpush.msra.mxu0 %v2334_v51 }
 0x11f   :  { %1320 = vmatpush.msra.mxu1 %v2488_v44 }
 0x120   :  { %1209 = vmatpush.msra.mxu0 %v2341_v54 }
 0x122   :  { %1211 = vmatpush.msra.mxu0 %v2366_v63 }
 0x124   :  { %1213 = vmatpush.msra.mxu0 %v2390_v13 }
 0x126   :  { %1215 = vmatpush.msra.mxu0 %v2395_v26 }
 0x15d   :  { %v641_v47 = vpop.f32.mrf.mxu0 }
 0x15f   :  { %v680_v15 = vpop.f32.mrf.mxu1 }
 0x161   :  { %v587_v16 = vpop.f32.mrf.mxu3 }
 0x169   :  { %v486_v7 = vpop.f32.mrf.mxu2  ;;  %v786_v52 = vpop.f32.mrf.mxu3 }
 0x16a   :  { %v487_v32 = vadd.f32 1e-06, %v486_v7 }
 0x16c   :  { %v588_v58 = vadd.f32 %v587_v16, %v487_v32  ;;  %v2063_v16 = vld [vmem:[%s2897_s6] ss:$0 sm:$0xff] }
 0x16e   :  { %v642_v61 = vadd.f32 %v641_v47, %v588_v58 }
 0x170   :  { %v681_v60 = vadd.f32 %v680_v15, %v642_v61  ;;  %v2990_v61 = vld [vmem:[#allocation32_spill] sm:$0xff]  ;;  %v2991_v15 = vld [vmem:[#allocation34_spill] sm:$0xff] }
 0x171   :  { %v749_v46 = vpop.f32.mrf.mxu2 }
 0x172   :  { %v750_v39 = vadd.f32 %v749_v46, %v681_v60  ;;  %v2992_v60 = vld [vmem:[#allocation36_spill] sm:$0xff]  ;;  %v2993_v46 = vld [vmem:[#allocation37_spill] sm:$0xff] }
 0x174   :  { %v787_v32 = vadd.f32 %v786_v52, %v750_v39  ;;  %v2047_v39 = vld [vmem:[#allocation6 + $0x38] sm:$0xff] }
 0x175   :  { %v2055_v52 = vld [vmem:[#allocation6 + $0x78] sm:$0xff]  ;;  %1157 = vmatpush.bf16.msrb.mxu2 %v2047_v39 }
 0x176   :  { %2068 = vrsqrt.f32 %v787_v32  ;;  %vm795_vm1 = vweird.f32 %v787_v32  ;;  %1170 = vmatpush.bf16.msrb.mxu3 %v2055_v52  ;;  %v2044_v52 = vld [vmem:[#allocation6 + $0x20] sm:$0xff] }
 0x17c   :  { %v2069_v29 = vpop.eup %2068 }
 0x17d   :  { %v790_v40 = vmul.f32 %v2069_v29, %v787_v32  ;;  %vm796_vm0 = vweird.f32 %v2069_v29  ;;  %v103_v32 = vld [vmem:[%s2894_s3] sm:$0x3] }
 0x17e   :  { %vm797_vm2 = vmor %vm795_vm1, %vm796_vm0 }
 0x17f   :  { %v791_v20 = vmul.f32 %v2069_v29, %v790_v40  ;;  %v827_v40 = vperm.slane %v103_v32, 1 }
 0x181   :  { %v792_v21 = vmul.f32 0.5, %v791_v20  ;;  %v2046_v20 = vld [vmem:[#allocation6 + $0x30] sm:$0xff] }
 0x182   :  { %1158 = vmatpush.bf16.msrb.mxu2 %v2046_v20 }
 0x183   :  { %v793_v18 = vsub.f32 1.5, %v792_v21  ;;  %v2054_v21 = vld [vmem:[#allocation6 + $0x70] sm:$0xff] }
 0x184   :  { %1171 = vmatpush.bf16.msrb.mxu3 %v2054_v21 }
 0x185   :  { %v794_v34 = vmul.f32 %v2069_v29, %v793_v18 }
 0x187   :  { %v798_v7 = vsel %vm797_vm2, %v2069_v29, %v794_v34  ;;  %v826_v29 = vperm.slane %v103_v32, 0  ;;  %v2052_v32 = vld [vmem:[#allocation6 + $0x60] sm:$0xff] }
 0x188   :  { %v799_v48 = vmul.f32 %v798_v7, %v2622_v19  ;;  %v2989_v19 = vld [vmem:[#allocation30_spill] sm:$0xff] }
 0x18a   :  { %v803_v14 = vmul.f32 %v2063_v16, %v799_v48  ;;  %v2045_v48 = vld [vmem:[#allocation6 + $0x28] sm:$0xff] }
 0x18b   :  { %1159 = vmatpush.bf16.msrb.mxu2 %v2045_v48 }
 0x18c   :  { %v807_v58 = vadd.f32 %v2064_v55, %v803_v14  ;;  %v2053_v55 = vld [vmem:[#allocation6 + $0x68] sm:$0xff] }
 0x18d   :  { %1172 = vmatpush.bf16.msrb.mxu3 %v2053_v55 }
 0x18e   :  { %v808_v47 = vpack.c.bf16 %v807_v58, %v807_v58 }
 0x18f   :  { %1160 = vmatpush.bf16.msrb.mxu2 %v2044_v52 }
 0x190   :  { %918 = vmatmul.bf16.vlgmr.msrb.gmra.mxu0 %v808_v47  ;;  %931 = vmatmul.bf16.vlgmr.msrb.gmra.mxu1 %v808_v47 }
 0x191   :  { %1489 = vmatpush.msrb.mxu1 %v2224_v3  ;;  %1422 = vmatpush.msrb.mxu0 %v2260_v22 }
 0x192   :  { %1173 = vmatpush.bf16.msrb.mxu3 %v2052_v32 }
 0x193   :  { %1491 = vmatpush.msrb.mxu1 %v2226_v4  ;;  %1426 = vmatpush.msrb.mxu0 %v2263_v23 }
 0x195   :  { %1493 = vmatpush.msrb.mxu1 %v2228_v5  ;;  %1430 = vmatpush.msrb.mxu0 %v2266_v24 }
 0x197   :  { %1495 = vmatpush.msrb.mxu1 %v2230_v9  ;;  %1434 = vmatpush.msrb.mxu0 %v2272_v27 }
 0x199   :  { %1497 = vmatpush.msrb.mxu1 %v2232_v10  ;;  %1438 = vmatpush.msrb.mxu0 %v2288_v33 }
 0x19b   :  { %1499 = vmatpush.msrb.mxu1 %v2234_v11  ;;  %1442 = vmatpush.msrb.mxu0 %v2292_v35 }
 0x19d   :  { %1501 = vmatpush.msrb.mxu1 %v2246_v17  ;;  %1446 = vmatpush.msrb.mxu0 %v2309_v41 }
 0x19f   :  { %1503 = vmatpush.msrb.mxu1 %v2268_v25  ;;  %1450 = vmatpush.msrb.mxu0 %v2332_v50 }
 0x1a1   :  { %1505 = vmatpush.msrb.mxu1 %v2274_v28  ;;  %1454 = vmatpush.msrb.mxu0 %v2350_v57 }
 0x1a3   :  { %1507 = vmatpush.msrb.mxu1 %v2294_v36  ;;  %1458 = vmatpush.msrb.mxu0 %v2364_v62 }
 0x1a5   :  { %1509 = vmatpush.msrb.mxu1 %v2318_v45  ;;  %1462 = vmatpush.msrb.mxu0 %v2388_v12 }
 0x1a7   :  { %1511 = vmatpush.msrb.mxu1 %v2334_v51  ;;  %1466 = vmatpush.msrb.mxu0 %v2989_v19 }
 0x1a9   :  { %1513 = vmatpush.msrb.mxu1 %v2341_v54  ;;  %1470 = vmatpush.msrb.mxu0 %v2990_v61 }
 0x1ab   :  { %1515 = vmatpush.msrb.mxu1 %v2366_v63  ;;  %1474 = vmatpush.msrb.mxu0 %v2991_v15 }
 0x1ad   :  { %1517 = vmatpush.msrb.mxu1 %v2390_v13  ;;  %1478 = vmatpush.msrb.mxu0 %v2992_v60  ;;  %v2051_v60 = vld [vmem:[#allocation6 + $0x58] sm:$0xff] }
 0x1ae   :  { %1174 = vmatpush.bf16.msrb.mxu3 %v2051_v60  ;;  %v2049_v60 = vld [vmem:[#allocation6 + $0x48] sm:$0xff] }
 0x1af   :  { %1519 = vmatpush.msrb.mxu1 %v2395_v26  ;;  %1482 = vmatpush.msrb.mxu0 %v2993_v46  ;;  %v2043_v46 = vld [vmem:[#allocation6 + $0x18] sm:$0xff] }
 0x1b0   :  { %1161 = vmatpush.bf16.msrb.mxu2 %v2043_v46  ;;  %v2041_v46 = vld [vmem:[#allocation6 + $0x8] sm:$0xff] }
 0x20d   :  { %v919_v18 = vpop.f32.mrf.mxu0  ;;  %v932_v34 = vpop.f32.mrf.mxu1 }
 0x20e   :  { %v2700_v16 = vadd.f32 %v919_v18, %v826_v29  ;;  %v2702_v7 = vadd.f32 %v932_v34, %v827_v40 }
 0x210   :  { %v2705_v14 = vmul.f32 0.70710677, %v2700_v16  ;;  %v2708_v58 = vmul.f32 0.70710677, %v2702_v7 }
 0x212   :  { %v940_v47 = vmul.f32 %v2705_v14, %v2705_v14  ;;  %v980_v39 = vmul.f32 %v2708_v58, %v2708_v58 }
 0x214   :  { %v2714_v29 = vmin.f32 %v940_v47, 16.0  ;;  %v2716_v40 = vmin.f32 %v980_v39, 16.0 }
 0x215   :  { %v921_v20 = vpop.f32.mrf.mxu0  ;;  %v934_v21 = vpop.f32.mrf.mxu1 }
 0x216   :  { %v942_v18 = vmul.f32 2.1237322e-06, %v2714_v29  ;;  %v953_v34 = vmul.f32 3.8918573e-05, %v2714_v29  ;;  %v982_v48 = vmul.f32 2.1237322e-06, %v2716_v40 }
 0x217   :  { %v993_v55 = vmul.f32 3.8918573e-05, %v2716_v40  ;;  %v2042_v20 = vld [vmem:[#allocation6 + $0x10] sm:$0xff] }
 0x218   :  { %v943_v15 = vadd.f32 0.00028619796, %v942_v18  ;;  %v954_v61 = vadd.f32 0.001143296, %v953_v34  ;;  %v983_v47 = vadd.f32 0.00028619796, %v982_v48  ;;  %1162 = vmatpush.bf16.msrb.mxu2 %v2042_v20 }
 0x219   :  { %v994_v19 = vadd.f32 0.001143296, %v993_v55  ;;  %v2050_v21 = vld [vmem:[#allocation6 + $0x50] sm:$0xff] }
 0x21a   :  { %v944_v39 = vmul.f32 %v943_v15, %v2714_v29  ;;  %v955_v52 = vmul.f32 %v954_v61, %v2714_v29  ;;  %v984_v32 = vmul.f32 %v983_v47, %v2716_v40  ;;  %1175 = vmatpush.bf16.msrb.mxu3 %v2050_v21  ;;  %v2994_v21 = vld [vmem:[#allocation9_spill] sm:$0xff] }
 0x21b   :  { %v995_v12 = vmul.f32 %v994_v19, %v2716_v40 }
 0x21c   :  { %v945_v62 = vadd.f32 0.0036580483, %v944_v39  ;;  %v956_v57 = vadd.f32 0.014752088, %v955_v52  ;;  %v985_v34 = vadd.f32 0.0036580483, %v984_v32  ;;  %1163 = vmatpush.bf16.msrb.mxu2 %v2041_v46 }
 0x21d   :  { %v996_v50 = vadd.f32 0.014752088, %v995_v12  ;;  %v2040_v12 = vld [vmem:[#allocation6] sm:$0xff] }
 0x21e   :  { %v957_v18 = vmul.f32 %v956_v57, %v2714_v29  ;;  %v946_v61 = vmul.f32 %v945_v62, %v2714_v29  ;;  %1176 = vmatpush.bf16.msrb.mxu3 %v2049_v60  ;;  %v986_v47 = vmul.f32 %v985_v34, %v2716_v40  ;;  %v2048_v39 = vld [vmem:[#allocation6 + $0x40] sm:$0xff]  ;;  %v2995_v60 = vld [vmem:[#allocation10_spill] sm:$0xff] }
 0x21f   :  { %v997_v15 = vmul.f32 %v996_v50, %v2716_v40 }
 0x220   :  { %v958_v48 = vadd.f32 0.112945676, %v957_v18  ;;  %v947_v57 = vadd.f32 0.05243302, %v946_v61  ;;  %1164 = vmatpush.bf16.msrb.mxu2 %v2040_v12  ;;  %v987_v62 = vadd.f32 0.05243302, %v986_v47 }
 0x221   :  { %v998_v55 = vadd.f32 0.112945676, %v997_v15  ;;  %v2998_v12 = vld [vmem:[#allocation13_spill] sm:$0xff] }
 0x222   :  { %v959_v19 = vmul.f32 %v958_v48, %v2714_v29  ;;  %1177 = vmatpush.bf16.msrb.mxu3 %v2048_v39  ;;  %v948_v34 = vmul.f32 %v947_v57, %v2714_v29  ;;  %v988_v61 = vmul.f32 %v987_v62, %v2716_v40  ;;  %v2996_v48 = vld [vmem:[#allocation11_spill] sm:$0xff]  ;;  %v2999_v57 = vld [vmem:[#allocation14_spill] sm:$0xff] }
 0x223   :  { %v999_v52 = vmul.f32 %v998_v55, %v2716_v40 }
 0x224   :  { %v960_v32 = vadd.f32 0.4994258, %v959_v19  ;;  %1328 = vmatpush.msra.mxu2 %v2994_v21  ;;  %v949_v55 = vadd.f32 0.18741608, %v948_v34  ;;  %v2997_v19 = vld [vmem:[#allocation12_spill] sm:$0xff] }
 0x225   :  { %v1000_v20 = vadd.f32 0.4994258, %v999_v52  ;;  %v989_v47 = vadd.f32 0.18741608, %v988_v61 }
 0x226   :  { %v961_v50 = vmul.f32 %v960_v32, %v2714_v29  ;;  %1381 = vmatpush.msra.mxu3 %v2224_v3  ;;  %1331 = vmatpush.msra.mxu2 %v2995_v60  ;;  %v950_v52 = vmul.f32 %v949_v55, %v2714_v29 }
 0x227   :  { %v1001_v18 = vmul.f32 %v1000_v20, %v2716_v40 }
 0x228   :  { %v962_v46 = vadd.f32 1.0, %v961_v50  ;;  %1383 = vmatpush.msra.mxu3 %v2226_v4  ;;  %1334 = vmatpush.msra.mxu2 %v2996_v48  ;;  %v990_v50 = vmul.f32 %v989_v47, %v2716_v40  ;;  %v951_v61 = vadd.f32 1.1283791, %v950_v52  ;;  %v3002_v47 = vld [vmem:[#allocation20_spill] sm:$0xff] }
 0x229   :  { %v1002_v15 = vadd.f32 1.0, %v1001_v18  ;;  %v3000_v18 = vld [vmem:[#allocation15_spill] sm:$0xff] }
 0x22a   :  { %2070 = vrcp.f32 %v962_v46  ;;  %1385 = vmatpush.msra.mxu3 %v2228_v5  ;;  %1337 = vmatpush.msra.mxu2 %v2997_v19  ;;  %v974_v41 = vand.u32 2147483648, %v962_v46  ;;  %v972_v55 = vand.u32 2147483647, %v962_v46  ;;  %v991_v19 = vadd.f32 1.1283791, %v990_v50 }
 0x22b   :  { %2072 = vrcp.f32 %v1002_v15  ;;  %v1012_v40 = vand.u32 2147483647, %v1002_v15  ;;  %vm968_vm5 = vweird.f32 %v962_v46  ;;  %vm1008_vm7 = vweird.f32 %v1002_v15 }
 0x22c   :  { %1387 = vmatpush.msra.mxu3 %v2230_v9  ;;  %1340 = vmatpush.msra.mxu2 %v2998_v12  ;;  %v3001_v12 = vld [vmem:[#allocation18_spill] sm:$0xff]  ;;  %v975_v52 = vor.u32 1.1754944e-38, %v974_v41  ;;  %vm973_vm8 = vcmp.eq.f32.partialorder %v972_v55, 8.507059e+37  ;;  %v3007_v55 = vld [vmem:[#allocation31_spill] sm:$0xff] }
 0x22d   :  { %vm1013_vm10 = vcmp.eq.f32.partialorder %v1012_v40, 8.507059e+37 }
 0x22e   :  { %1389 = vmatpush.msra.mxu3 %v2232_v10  ;;  %1343 = vmatpush.msra.mxu2 %v2999_v57  ;;  %v1014_v57 = vand.u32 2147483648, %v1002_v15 }
 0x230   :  { %v2071_v39 = vpop.eup %2070  ;;  %1391 = vmatpush.msra.mxu3 %v2234_v11  ;;  %1346 = vmatpush.msra.mxu2 %v3000_v18  ;;  %v992_v18 = vmul.f32 %v991_v19, %v2708_v58  ;;  %v936_v58 = vmul.f32 0.5, %v2700_v16 }
 0x231   :  { %v2073_v32 = vpop.eup %2072  ;;  %v964_v20 = vmul.f32 %v2071_v39, %v962_v46  ;;  %vm969_vm3 = vweird.f32 %v2071_v39  ;;  %v3004_v46 = vld [vmem:[#allocation24_spill] sm:$0xff] }
 0x232   :  { %v1004_v62 = vmul.f32 %v2073_v32, %v1002_v15  ;;  %1393 = vmatpush.msra.mxu3 %v2246_v17  ;;  %1349 = vmatpush.msra.mxu2 %v3001_v12  ;;  %vm1009_vm4 = vweird.f32 %v2073_v32  ;;  %vm970_vm6 = vmor %vm968_vm5, %vm969_vm3  ;;  %v3003_v12 = vld [vmem:[#allocation22_spill] sm:$0xff] }
 0x233   :  { %v965_v34 = vsub.f32 1.0, %v964_v20  ;;  %vm1010_vm9 = vmor %vm1008_vm7, %vm1009_vm4 }
 0x234   :  { %v1005_v35 = vsub.f32 1.0, %v1004_v62  ;;  %1395 = vmatpush.msra.mxu3 %v2268_v25  ;;  %1352 = vmatpush.msra.mxu2 %v3002_v47 }
 0x235   :  { %v966_v29 = vmul.f32 %v2071_v39, %v965_v34  ;;  %v952_v34 = vmul.f32 %v951_v61, %v2705_v14  ;;  %v3006_v61 = vld [vmem:[#allocation27_spill] sm:$0xff] }
 0x236   :  { %v1006_v33 = vmul.f32 %v2073_v32, %v1005_v35  ;;  %1397 = vmatpush.msra.mxu3 %v2274_v28  ;;  %1355 = vmatpush.msra.mxu2 %v3003_v12  ;;  %v1015_v35 = vor.u32 1.1754944e-38, %v1014_v57  ;;  %v3005_v12 = vld [vmem:[#allocation26_spill] sm:$0xff]  ;;  %v937_v57 = vmul.f32 0.5, %v2702_v7 }
 0x237   :  { %v967_v20 = vadd.f32 %v2071_v39, %v966_v29 }
 0x238   :  { %v1007_v62 = vadd.f32 %v2073_v32, %v1006_v33  ;;  %1399 = vmatpush.msra.mxu3 %v2294_v36  ;;  %1358 = vmatpush.msra.mxu2 %v3004_v46 }
 0x239   :  { %v971_v50 = vsel %vm970_vm6, %v2071_v39, %v967_v20 }
 0x23a   :  { %v976_v47 = vsel %vm973_vm8, %v975_v52, %v971_v50  ;;  %v1011_v29 = vsel %vm1010_vm9, %v2073_v32, %v1007_v62  ;;  %1401 = vmatpush.msra.mxu3 %v2318_v45  ;;  %1361 = vmatpush.msra.mxu2 %v3005_v12  ;;  %v3009_v62 = vld [vmem:[#allocation35_spill] sm:$0xff] }
 0x23b   :  { %v977_v33 = vmul.f32 %v976_v47, %v952_v34  ;;  %v1016_v41 = vsel %vm1013_vm10, %v1015_v35, %v1011_v29  ;;  %v3008_v47 = vld [vmem:[#allocation33_spill] sm:$0xff] }
 0x23c   :  { %v1017_v15 = vmul.f32 %v1016_v41, %v992_v18  ;;  %1403 = vmatpush.msra.mxu3 %v2334_v51  ;;  %1364 = vmatpush.msra.mxu2 %v3006_v61 }
 0x23d   :  { %v1958_v14 = vclamps-f32 %v977_v33, 1.0 }
 0x23e   :  { %v1959_v39 = vclamps-f32 %v1017_v15, 1.0  ;;  %1405 = vmatpush.msra.mxu3 %v2341_v54  ;;  %1367 = vmatpush.msra.mxu2 %v3007_v55 }
 0x23f   :  { %v1020_v19 = vadd.f32 1.0, %v1958_v14 }
 0x240   :  { %v1021_v32 = vadd.f32 1.0, %v1959_v39  ;;  %1407 = vmatpush.msra.mxu3 %v2366_v63  ;;  %1370 = vmatpush.msra.mxu2 %v3008_v47 }
 0x241   :  { %v1022_v18 = vmul.f32 %v1020_v19, %v936_v58 }
 0x242   :  { %v1023_v40 = vmul.f32 %v1021_v32, %v937_v57  ;;  %1409 = vmatpush.msra.mxu3 %v2390_v13  ;;  %1373 = vmatpush.msra.mxu2 %v3009_v62 }
 0x243   :  { %v1024_v20 = vpack.c.bf16 %v1022_v18, %v1022_v18 }
 0x244   :  { %v1025_v52 = vpack.c.bf16 %v1023_v40, %v1023_v40  ;;  %1411 = vmatpush.msra.mxu3 %v2395_v26 }
 0x245   :  { %1165 = vmatmul.bf16.vlgmr.msrb.gmra.mxu2 %v1024_v20 }
 0x246   :  { %1178 = vmatmul.bf16.vlgmr.msrb.gmra.mxu3 %v1025_v52  ;;  %1528 = vmatpush.msrb.mxu2 %v2224_v3 }
 0x247   :  { %1573 = vmatpush.msrb.mxu3 %v2297_v37  ;;  %v2065_v37 = vld [vmem:[%s2896_s5] ss:$0 sm:$0xff] }
 0x248   :  { %1530 = vmatpush.msrb.mxu2 %v2226_v4 }
 0x249   :  { %1579 = vmatpush.msrb.mxu3 %v2300_v38 }
 0x24a   :  { %1532 = vmatpush.msrb.mxu2 %v2228_v5 }
 0x24b   :  { %1585 = vmatpush.msrb.mxu3 %v2314_v43 }
 0x24c   :  { %1534 = vmatpush.msrb.mxu2 %v2230_v9 }
 0x24d   :  { %1591 = vmatpush.msrb.mxu3 %v2329_v49 }
 0x24e   :  { %1536 = vmatpush.msrb.mxu2 %v2232_v10 }
 0x24f   :  { %1597 = vmatpush.msrb.mxu3 %v2347_v56 }
 0x250   :  { %1538 = vmatpush.msrb.mxu2 %v2234_v11 }
 0x251   :  { %1603 = vmatpush.msrb.mxu3 %v2355_v59  ;;  %v2076_v59 = vld [vmem:[%s2891_s0] sm:$0xff] }
 0x252   :  { %1540 = vmatpush.msrb.mxu2 %v2246_v17 }
 0x253   :  { %1609 = vmatpush.msrb.mxu3 %v2371_v2 }
 0x254   :  { %1542 = vmatpush.msrb.mxu2 %v2268_v25 }
 0x255   :  { %1615 = vmatpush.msrb.mxu3 %v2401_v30 }
 0x256   :  { %1544 = vmatpush.msrb.mxu2 %v2274_v28 }
 0x257   :  { %1621 = vmatpush.msrb.mxu3 %v2418_v42 }
 0x258   :  { %1546 = vmatpush.msrb.mxu2 %v2294_v36 }
 0x259   :  { %1627 = vmatpush.msrb.mxu3 %v2431_v53 }
 0x25a   :  { %1548 = vmatpush.msrb.mxu2 %v2318_v45 }
 0x25b   :  { %1633 = vmatpush.msrb.mxu3 %v2445_v8 }
 0x25c   :  { %1550 = vmatpush.msrb.mxu2 %v2334_v51 }
 0x25d   :  { %1639 = vmatpush.msrb.mxu3 %v2456_v1 }
 0x25e   :  { %1552 = vmatpush.msrb.mxu2 %v2341_v54 }
 0x25f   :  { %1645 = vmatpush.msrb.mxu3 %v2467_v0 }
 0x260   :  { %1554 = vmatpush.msrb.mxu2 %v2366_v63 }
 0x261   :  { %1651 = vmatpush.msrb.mxu3 %v2475_v6 }
 0x262   :  { %1556 = vmatpush.msrb.mxu2 %v2390_v13 }
 0x263   :  { %1657 = vmatpush.msrb.mxu3 %v2482_v31  ;;  %v3022_v31 = vld [vmem:[#allocation22_spill] sm:$0xff] }
 0x264   :  { %1558 = vmatpush.msrb.mxu2 %v2395_v26 }
 0x265   :  { %1663 = vmatpush.msrb.mxu3 %v2488_v44  ;;  %v3028_v44 = vld [vmem:[#allocation37_spill] sm:$0xff] }
 0x2c8   :  { %v1166_v38 = vpop.f32.mrf.mxu2 }
 0x2c9   :  { %v1167_v43 = vadd.f32 %v2065_v37, %v1166_v38  ;;  %v1179_v49 = vpop.f32.mrf.mxu3 }
 0x2cb   :  { %v1180_v56 = vadd.f32 %v1179_v49, %v1167_v43 }
 0x2cd   :  { %v2813_v0 = vadd.f32 %v2076_v59, %v1180_v56  ;;  %v2066_v59 = vld [vmem:[%s2899_s8] ss:$0 sm:$0xff] }
 0x2cf   :  { %v1216_v2 = vand.u32 4294901760, %v2813_v0 }
 0x2d0   :  { %v1168_v6 = vpop.f32.mrf.mxu2 }
 0x2d1   :  { %v1217_v30 = vsub.f32 %v2813_v0, %v1216_v2  ;;  %v1181_v42 = vpop.f32.mrf.mxu3  ;;  %1322 = vmatmul.f32.vlgmr.msra.gmra.mxu1 %v1216_v2  ;;  %v2067_v6 = vld [vmem:[%s2900_s9] ss:$0 sm:$0xff] }
 0x2d2   :  { %1724 = vmatpush.msra.mxu1 %v2224_v3 }
 0x2d3   :  { %1376 = vmatmul.f32.vlgmr.msra.gmra.mxu2 %v1217_v30  ;;  %v1218_v53 = vand.u32 4294901760, %v1217_v30 }
 0x2d4   :  { %1726 = vmatpush.msra.mxu1 %v2226_v4  ;;  %1765 = vmatpush.msra.mxu2 %v2260_v22  ;;  %v3014_v22 = vld [vmem:[#allocation14_spill] sm:$0xff] }
 0x2d5   :  { %1415 = vmatmul.f32.vlgmr.msra.gmra.mxu3 %v1218_v53  ;;  %v1219_v8 = vsub.f32 %v1217_v30, %v1218_v53 }
 0x2d6   :  { %1728 = vmatpush.msra.mxu1 %v2228_v5  ;;  %1832 = vmatpush.msra.mxu3 %v2224_v3  ;;  %v3010_v3 = vld [vmem:[#allocation16_spill] sm:$0xff] }
 0x2d7   :  { %v1220_v1 = vand.u32 4294901760, %v1219_v8  ;;  %1769 = vmatpush.msra.mxu2 %v2263_v23  ;;  %v3016_v23 = vld [vmem:[#allocation15_spill] sm:$0xff] }
 0x2d8   :  { %1730 = vmatpush.msra.mxu1 %v2230_v9  ;;  %1834 = vmatpush.msra.mxu3 %v2226_v4  ;;  %v3011_v4 = vld [vmem:[#allocation12_spill] sm:$0xff] }
 0x2d9   :  { %1221 = vmatmul.f32.vlgmr.msra.gmra.mxu0 %v1220_v1  ;;  %1521 = vmatmul.f32.vlgmr.msrb.gmra.mxu1 %v1216_v2 }
 0x2da   :  { %1671 = vmatpush.msra.mxu0 %v2994_v21  ;;  %1732 = vmatpush.msra.mxu1 %v2232_v10 }
 0x2db   :  { %1836 = vmatpush.msra.mxu3 %v2228_v5  ;;  %1773 = vmatpush.msra.mxu2 %v2266_v24  ;;  %v3012_v5 = vld [vmem:[#allocation13_spill] sm:$0xff]  ;;  %v3018_v24 = vld [vmem:[#allocation18_spill] sm:$0xff] }
 0x2dc   :  { %1674 = vmatpush.msra.mxu0 %v2995_v60  ;;  %1734 = vmatpush.msra.mxu1 %v2234_v11 }
 0x2dd   :  { %1838 = vmatpush.msra.mxu3 %v2230_v9  ;;  %1777 = vmatpush.msra.mxu2 %v2272_v27  ;;  %v3013_v9 = vld [vmem:[#allocation17_spill] sm:$0xff]  ;;  %v3020_v27 = vld [vmem:[#allocation20_spill] sm:$0xff] }
 0x2de   :  { %1677 = vmatpush.msra.mxu0 %v2996_v48  ;;  %1736 = vmatpush.msra.mxu1 %v2246_v17 }
 0x2df   :  { %1840 = vmatpush.msra.mxu3 %v2232_v10  ;;  %1781 = vmatpush.msra.mxu2 %v3010_v3  ;;  %v3015_v10 = vld [vmem:[#allocation19_spill] sm:$0xff] }
 0x2e0   :  { %1680 = vmatpush.msra.mxu0 %v3011_v4  ;;  %1738 = vmatpush.msra.mxu1 %v2268_v25 }
 0x2e1   :  { %1484 = vmatmul.f32.vlgmr.msrb.gmra.mxu0 %v1216_v2  ;;  %1842 = vmatpush.msra.mxu3 %v2234_v11  ;;  %v3017_v11 = vld [vmem:[#allocation21_spill] sm:$0xff] }
 0x2e2   :  { %1683 = vmatpush.msra.mxu0 %v3012_v5  ;;  %1740 = vmatpush.msra.mxu1 %v2274_v28 }
 0x2e3   :  { %1844 = vmatpush.msra.mxu3 %v2246_v17  ;;  %1785 = vmatpush.msra.mxu2 %v3013_v9  ;;  %v3019_v17 = vld [vmem:[#allocation23_spill] sm:$0xff] }
 0x2e4   :  { %1686 = vmatpush.msra.mxu0 %v3014_v22  ;;  %1742 = vmatpush.msra.mxu1 %v2294_v36 }
 0x2e5   :  { %1846 = vmatpush.msra.mxu3 %v2268_v25  ;;  %1789 = vmatpush.msra.mxu2 %v3015_v10  ;;  %v3021_v25 = vld [vmem:[#allocation25_spill] sm:$0xff] }
 0x2e6   :  { %1689 = vmatpush.msra.mxu0 %v3016_v23  ;;  %1744 = vmatpush.msra.mxu1 %v2318_v45 }
 0x2e7   :  { %1848 = vmatpush.msra.mxu3 %v2274_v28  ;;  %1793 = vmatpush.msra.mxu2 %v3017_v11  ;;  %v3023_v28 = vld [vmem:[#allocation29_spill] sm:$0xff] }
 0x2e8   :  { %1692 = vmatpush.msra.mxu0 %v3018_v24  ;;  %1746 = vmatpush.msra.mxu1 %v2334_v51 }
 0x2e9   :  { %1850 = vmatpush.msra.mxu3 %v2294_v36  ;;  %1797 = vmatpush.msra.mxu2 %v3019_v17  ;;  %v3024_v36 = vld [vmem:[#allocation30_spill] sm:$0xff] }
 0x2ea   :  { %1695 = vmatpush.msra.mxu0 %v3020_v27  ;;  %1748 = vmatpush.msra.mxu1 %v2341_v54 }
 0x2eb   :  { %1852 = vmatpush.msra.mxu3 %v2318_v45  ;;  %1801 = vmatpush.msra.mxu2 %v3021_v25  ;;  %v3025_v45 = vld [vmem:[#allocation32_spill] sm:$0xff] }
 0x2ec   :  { %1698 = vmatpush.msra.mxu0 %v3022_v31  ;;  %1750 = vmatpush.msra.mxu1 %v2366_v63 }
 0x2ed   :  { %1854 = vmatpush.msra.mxu3 %v2334_v51  ;;  %1805 = vmatpush.msra.mxu2 %v3023_v28  ;;  %v3026_v51 = vld [vmem:[#allocation34_spill] sm:$0xff] }
 0x2ee   :  { %1701 = vmatpush.msra.mxu0 %v3004_v46  ;;  %1752 = vmatpush.msra.mxu1 %v2390_v13 }
 0x2ef   :  { %1856 = vmatpush.msra.mxu3 %v2341_v54  ;;  %1809 = vmatpush.msra.mxu2 %v3024_v36  ;;  %v3027_v54 = vld [vmem:[#allocation36_spill] sm:$0xff] }
 0x2f0   :  { %1704 = vmatpush.msra.mxu0 %v3005_v12  ;;  %1754 = vmatpush.msra.mxu1 %v2395_v26 }
 0x2f1   :  { %1858 = vmatpush.msra.mxu3 %v2366_v63  ;;  %1813 = vmatpush.msra.mxu2 %v3025_v45 }
 0x2f2   :  { %1707 = vmatpush.msra.mxu0 %v3006_v61 }
 0x2f3   :  { %1860 = vmatpush.msra.mxu3 %v2390_v13  ;;  %1817 = vmatpush.msra.mxu2 %v3026_v51 }
 0x2f4   :  { %1710 = vmatpush.msra.mxu0 %v3007_v55 }
 0x2f5   :  { %1862 = vmatpush.msra.mxu3 %v2395_v26  ;;  %1821 = vmatpush.msra.mxu2 %v3027_v54 }
 0x2f6   :  { %1713 = vmatpush.msra.mxu0 %v3008_v47 }
 0x2f7   :  { %1825 = vmatpush.msra.mxu2 %v3028_v44 }
 0x2f8   :  { %1716 = vmatpush.msra.mxu0 %v3009_v62 }
 0x34e   :  { %v1323_v63 = vpop.f32.mrf.mxu1 }
 0x356   :  { %v1222_v16 = vpop.f32.mrf.mxu0  ;;  %v1377_v21 = vpop.f32.mrf.mxu2 }
 0x357   :  { %v1324_v7 = vadd.f32 %v1323_v63, %v1222_v16  ;;  %v1522_v50 = vpop.f32.mrf.mxu1 }
 0x358   :  { %v1416_v13 = vpop.f32.mrf.mxu3 }
 0x359   :  { %v1378_v60 = vadd.f32 %v1377_v21, %v1324_v7 }
 0x35b   :  { %v1417_v48 = vadd.f32 %v1416_v13, %v1378_v60 }
 0x35e   :  { %v1485_v12 = vpop.f32.mrf.mxu0 }
 0x35f   :  { %v1486_v34 = vadd.f32 %v1485_v12, %v1417_v48 }
 0x361   :  { %v1523_v35 = vadd.f32 %v1522_v50, %v1486_v34 }
 0x363   :  { %v1525_v26 = vsub.f32 %v2813_v0, %v1523_v35 }
 0x365   :  { %v1526_v29 = vmul.f32 %v1525_v26, %v1525_v26 }
 0x367   :  { %v1559_v46 = vand.u32 4294901760, %v1526_v29 }
 0x369   :  { %1665 = vmatmul.f32.vlgmr.msrb.gmra.mxu3 %v1559_v46  ;;  %v1560_v33 = vsub.f32 %v1526_v29, %v1559_v46 }
 0x36b   :  { %1719 = vmatmul.f32.vlgmr.msra.gmra.mxu0 %v1560_v33  ;;  %v1561_v41 = vand.u32 4294901760, %v1560_v33 }
 0x36d   :  { %1758 = vmatmul.f32.vlgmr.msra.gmra.mxu1 %v1561_v41  ;;  %v1562_v15 = vsub.f32 %v1560_v33, %v1561_v41 }
 0x36f   :  { %v1563_v14 = vand.u32 4294901760, %v1562_v15 }
 0x371   :  { %1564 = vmatmul.f32.vlgmr.msrb.gmra.mxu2 %v1563_v14  ;;  %1864 = vmatmul.f32.vlgmr.msra.gmra.mxu3 %v1559_v46 }
 0x379   :  { %1827 = vmatmul.f32.vlgmr.msra.gmra.mxu2 %v1559_v46 }
 0x3e8   :  { %v1720_v57 = vpop.f32.mrf.mxu0 }
 0x3ea   :  { %v1759_v55 = vpop.f32.mrf.mxu1 }
 0x3ec   :  { %v1666_v39 = vpop.f32.mrf.mxu3 }
 0x3f4   :  { %v1565_v61 = vpop.f32.mrf.mxu2  ;;  %v1865_v20 = vpop.f32.mrf.mxu3 }
 0x3f5   :  { %v1566_v58 = vadd.f32 1e-06, %v1565_v61 }
 0x3f7   :  { %v1667_v19 = vadd.f32 %v1666_v39, %v1566_v58 }
 0x3f9   :  { %v1721_v32 = vadd.f32 %v1720_v57, %v1667_v19 }
 0x3fb   :  { %v1760_v18 = vadd.f32 %v1759_v55, %v1721_v32 }
 0x3fc   :  { %v1828_v40 = vpop.f32.mrf.mxu2 }
 0x3fd   :  { %v1829_v47 = vadd.f32 %v1828_v40, %v1760_v18 }
 0x3ff   :  { %v1866_v52 = vadd.f32 %v1865_v20, %v1829_v47 }
 0x401   :  { %2074 = vrsqrt.f32 %v1866_v52  ;;  %vm1874_vm12 = vweird.f32 %v1866_v52 }
 0x407   :  { %v2075_v62 = vpop.eup %2074 }
 0x408   :  { %v1869_v37 = vmul.f32 %v2075_v62, %v1866_v52  ;;  %vm1875_vm11 = vweird.f32 %v2075_v62 }
 0x409   :  { %vm1876_vm13 = vmor %vm1874_vm12, %vm1875_vm11 }
 0x40a   :  { %v1870_v38 = vmul.f32 %v2075_v62, %v1869_v37 }
 0x40c   :  { %v1871_v43 = vmul.f32 0.5, %v1870_v38 }
 0x40e   :  { %v1872_v49 = vsub.f32 1.5, %v1871_v43 }
 0x410   :  { %v1873_v56 = vmul.f32 %v2075_v62, %v1872_v49 }
 0x412   :  { %v1877_v0 = vsel %vm1876_vm13, %v2075_v62, %v1873_v56 }
 0x413   :  { %v1878_v2 = vmul.f32 %v1877_v0, %v1525_v26 }
 0x415   :  { %v1882_v30 = vmul.f32 %v2066_v59, %v1878_v2 }
 0x417   :  { %v1886_v42 = vadd.f32 %v2067_v6, %v1882_v30 }
 0x419   :  { %1887 = vst [vmem:[%s2901_s10] sm:$0xff] %v1886_v42 }
 0x41a   :  { %1892 = vsyncpa [#allocation3], 1 }
 0x41b   :  { %1893 = vsyncpa [#allocation5], 1 }

</bundles_post_ra>
